<compile_context>
chip_gen: v7x
topology: tpu7x:2x2x1
jax: 0.10.0
libtpu: 0.0.40
codegen_flags: <defaults>
</compile_context>

<pallas_src>
from functools import partial

import jax
import jax.numpy as jnp
from jax.experimental import pallas as pl
from jax.experimental.pallas import tpu as pltpu

EPS = 1e-5          # nn.LayerNorm default
NEG_INF = -1e30     # attention mask fill


def _layer_norm(x, gamma, beta):
    mean = jnp.mean(x, axis=-1, keepdims=True)
    xc = x - mean
    var = jnp.mean(xc * xc, axis=-1, keepdims=True)   # biased var (PyTorch LN)
    return xc * jax.lax.rsqrt(var + EPS) * gamma + beta


def _gelu_tanh(x):
    c = jnp.float32(0.7978845608028654)  # sqrt(2/pi)
    return 0.5 * x * (1.0 + jnp.tanh(c * (x + 0.044715 * x * x * x)))


# ----------------------------------------------------------------------------
# Fused CCBlock point branch for one tile of points.
# ----------------------------------------------------------------------------
def ccblock_kernel(feat_ref, qb_ref, kvb_ref, kt_ref, v_ref,
                   g1_ref, be1_ref, wq_ref, bq_ref, wp_ref, bp_ref,
                   g2_ref, be2_ref, w1_ref, b1_ref, w2_ref, b2_ref,
                   out_ref, *, num_heads):
    f32 = jnp.float32
    b16 = jnp.bfloat16

    x = feat_ref[...].astype(f32)                                   # [TN, C]

    # ---- norm1 (pre-norm), f32 elementwise ----
    xn = _layer_norm(x, g1_ref[...], be1_ref[...])
    xn_b = xn.astype(b16)

    # ---- varlen additive mask, built once per tile (0 / -inf) ----
    bias = jnp.where(qb_ref[...] == kvb_ref[...],
                     jnp.float32(0.0), jnp.float32(NEG_INF))        # [TN, M]

    # ---- multi-head cross attention; all per-head operands are leading-axis
    #      ref views (no lane slicing), matmul operands bf16, f32 accumulate.
    att = None
    for h in range(num_heads):                                      # static, unrolled
        # q_h = xn @ (scale*Wq_h) + scale*bq_h   (scale pre-folded into weights)
        q_h = jnp.dot(xn_b, wq_ref[h], preferred_element_type=f32) + bq_ref[h]
        logits = jnp.dot(q_h.astype(b16), kt_ref[h],                # [TN, M]
                         preferred_element_type=f32) + bias
        m = jnp.max(logits, axis=-1, keepdims=True)
        p = jnp.exp(logits - m)                                     # unnormalized
        denom = jnp.sum(p, axis=-1, keepdims=True)
        o_h = jnp.dot(p.astype(b16), v_ref[h],                      # [TN, Dh]
                      preferred_element_type=f32)
        o_h = o_h * pl.reciprocal(denom, approx=True)               # normalize post-PV
        contrib = jnp.dot(o_h.astype(b16), wp_ref[h],               # [TN, C]
                          preferred_element_type=f32)
        att = contrib if att is None else att + contrib

    x = x + att + bp_ref[...]                                       # residual 1

    # ---- norm2 + MLP ----
    xn2 = _layer_norm(x, g2_ref[...], be2_ref[...])
    hdn = jnp.dot(xn2.astype(b16), w1_ref[...],
                  preferred_element_type=f32) + b1_ref[...]
    hdn = _gelu_tanh(hdn)
    y = jnp.dot(hdn.astype(b16), w2_ref[...],
                preferred_element_type=f32) + b2_ref[...]

    # TODO(synk): C=64 < 128 lanes => masked stores; lane-dense output slab not
    # applied (would require packing two points per 128-wide row).
    out_ref[...] = (x + y).astype(out_ref.dtype)                    # residual 2


# ----------------------------------------------------------------------------
# One-time parameter preparation (PyTorch convention W:[out,in], b:[out]).
# ----------------------------------------------------------------------------
def prepare_params(tp):
    f32, b16 = jnp.float32, jnp.bfloat16
    H = tp["num_heads"]
    C = tp["wq"].shape[0]
    Dh = C // H
    scale = float(Dh) ** -0.5
    r2 = lambda v: v.reshape(1, -1).astype(f32)

    # Wq^T split per head with the softmax scale folded in (f32 fold, bf16 store).
    wq_hcd = (tp["wq"].T.astype(f32) * scale).reshape(C, H, Dh).transpose(1, 0, 2)
    bq_h = (tp["bq"].astype(f32) * scale).reshape(H, 1, Dh)
    # Wproj^T split per head along its input (K) dim.
    wp_hdc = tp["wp"].T.astype(f32).reshape(H, Dh, C)

    return dict(
        num_heads=H,
        ln1_g=r2(tp["ln1_g"]), ln1_b=r2(tp["ln1_b"]),
        ln2_g=r2(tp["ln2_g"]), ln2_b=r2(tp["ln2_b"]),
        wq_hcd=wq_hcd.astype(b16), bq_h=bq_h,
        wkv_t=tp["wkv"].T.astype(b16), bkv=r2(tp["bkv"]),
        wp_hdc=wp_hdc.astype(b16), bp=r2(tp["bp"]),
        w1_t=tp["w1"].T.astype(b16), b1=r2(tp["b1"]),
        w2_t=tp["w2"].T.astype(b16), b2=r2(tp["b2"]),
    )


def _vmem_limit_bytes(block_n, C, hidden, M, H, Dh):
    """Rough scoped-VMEM budget: double-buffered tiles + resident operands
    (counted twice for pipeline buffers) + per-tile live intermediates."""
    f32, b16 = 4, 2
    pad = lambda n: ((n + 127) // 128) * 128
    tiles = 2 * block_n * C * f32 * 2            # feat in + out, double-buffered
    tiles += 2 * block_n * pad(1) * 4            # per-point batch id (lane padded)
    resident = (H * Dh * pad(M) * b16            # K^T (lane-dense in M)
                + H * M * pad(Dh) * b16          # V   (lane padded to 128)
                + pad(M) * 4                     # context batch ids
                + (C * C * 2 + C * hidden * 2) * b16
                + (6 * C + 2 * hidden + H * Dh) * f32) * 2
    work = (3 * block_n * pad(M) * f32           # bias, logits, p
            + 2 * block_n * pad(hidden) * f32    # hidden activations
            + 8 * block_n * pad(C) * f32)        # x, xn, q, att, residuals, ...
    est = tiles + resident + work
    return int(min(max(2 * est, 32 << 20), 96 << 20))


# ----------------------------------------------------------------------------
# Wrapper
# ----------------------------------------------------------------------------
def ccblock_forward(feat, context, q_batch, kv_batch, kp, *, block_n=2048):
    """feat: [N, C] point features, context: [M, Kc] context tokens,
    q_batch: [N] int batch id per point, kv_batch: [M] int batch id per token.
    block_n: point-tile rows (2048+ for production N; on v7x ensure the grid
    is >= 2 so both TensorCores get work)."""
    N, C = feat.shape
    M = context.shape[0]
    H = kp["num_heads"]
    Dh = C // H
    hidden = kp["w1_t"].shape[1]

    # --- kv projection + head-major split, once per call (plain XLA matmul) ---
    kv = jnp.dot(context.astype(jnp.bfloat16), kp["wkv_t"],
                 preferred_element_type=jnp.float32) + kp["bkv"]        # [M, 2C]
    k_t = jnp.transpose(kv[:, :C].reshape(M, H, Dh), (1, 2, 0)).astype(jnp.bfloat16)  # [H,Dh,M]
    v_h = jnp.transpose(kv[:, C:].reshape(M, H, Dh), (1, 0, 2)).astype(jnp.bfloat16)  # [H,M,Dh]

    # --- tile the point axis (pad so every grid block is full) ---
    block_n = max(8, min(block_n, ((N + 7) // 8) * 8))
    grid_n = pl.cdiv(N, block_n)
    Np = grid_n * block_n
    if Np != N:
        feat_p = jnp.pad(feat, ((0, Np - N), (0, 0)))
        qb_p = jnp.pad(q_batch, (0, Np - N), mode="edge")   # padded rows discarded
    else:
        feat_p, qb_p = feat, q_batch
    qb2 = qb_p.reshape(Np, 1).astype(jnp.int32)
    kvb2 = kv_batch.reshape(1, M).astype(jnp.int32)

    tile = lambda bs: pl.BlockSpec(bs, lambda i, _n=len(bs): (i,) + (0,) * (_n - 1))
    res = lambda bs: pl.BlockSpec(bs, lambda i, _n=len(bs): (0,) * _n)

    grid_spec = pltpu.PrefetchScalarGridSpec(
        num_scalar_prefetch=0,
        grid=(grid_n,),
        in_specs=[
            tile((block_n, C)),                  # feat tile
            tile((block_n, 1)),                  # per-point batch id
            res((1, M)),                         # per-context-token batch id
            res((H, Dh, M)),                     # K^T head-major (resident)
            res((H, M, Dh)),                     # V   head-major (resident)
            res((1, C)), res((1, C)),            # ln1 gamma / beta
            res((H, C, Dh)), res((H, 1, Dh)),    # Wq (scale folded), bq
            res((H, Dh, C)), res((1, C)),        # Wproj, bproj
            res((1, C)), res((1, C)),            # ln2 gamma / beta
            res((C, hidden)), res((1, hidden)),  # fc1
            res((hidden, C)), res((1, C)),       # fc2
        ],
        out_specs=tile((block_n, C)),
    )

    out = pl.pallas_call(
        partial(ccblock_kernel, num_heads=H),
        out_shape=jax.ShapeDtypeStruct((Np, C), feat.dtype),
        grid_spec=grid_spec,
        compiler_params=pltpu.CompilerParams(
            dimension_semantics=("parallel",),
            vmem_limit_bytes=_vmem_limit_bytes(block_n, C, hidden, M, H, Dh),
        ),
    )(feat_p, qb2, kvb2, k_t, v_h,
      kp["ln1_g"], kp["ln1_b"], kp["wq_hcd"], kp["bq_h"], kp["wp_hdc"], kp["bp"],
      kp["ln2_g"], kp["ln2_b"], kp["w1_t"], kp["b1"], kp["w2_t"], kp["b2"])

    return out[:N]


# ----------------------------------------------------------------------------
# Pure-JAX reference mirroring the PyTorch forward (point branch), with the
# same bf16-operand / f32-accumulate matmul strategy as the kernel so the
# self-test is tight.  (The real module runs fp16 flash-attention, so bf16
# MXU operands are a comparable precision choice.)
# ----------------------------------------------------------------------------
def ccblock_reference(feat, context, q_batch, kv_batch, tp):
    C = feat.shape[1]
    H = tp["num_heads"]
    Dh = C // H
    scale = float(Dh) ** -0.5
    f32, b16 = jnp.float32, jnp.bfloat16
    mm = lambda a, w: jnp.dot(a.astype(b16), w.astype(b16), preferred_element_type=f32)

    x = feat.astype(f32)

    def ln(v, g, b):
        mu = jnp.mean(v, axis=-1, keepdims=True)
        va = jnp.mean((v - mu) ** 2, axis=-1, keepdims=True)
        return (v - mu) / jnp.sqrt(va + EPS) * g + b

    xn = ln(x, tp["ln1_g"], tp["ln1_b"])
    q = (mm(xn, tp["wq"].T) + tp["bq"]).reshape(-1, H, Dh)
    kv = mm(context, tp["wkv"].T) + tp["bkv"]
    k = kv[:, :C].reshape(-1, H, Dh)
    v = kv[:, C:].reshape(-1, H, Dh)
    logits = jnp.einsum("nhd,mhd->hnm", q.astype(b16), k.astype(b16),
                        preferred_element_type=f32) * scale
    mask = (q_batch[:, None] == kv_batch[None, :])[None, :, :]
    logits = jnp.where(mask, logits, NEG_INF)
    p = jax.nn.softmax(logits, axis=-1)
    att = jnp.einsum("hnm,mhd->nhd", p.astype(b16), v.astype(b16),
                     preferred_element_type=f32).reshape(-1, C)
    att = mm(att, tp["wp"].T) + tp["bp"]
    x = x + att
    xn2 = ln(x, tp["ln2_g"], tp["ln2_b"])
    h = _gelu_tanh(mm(xn2, tp["w1"].T) + tp["b1"])
    y = mm(h, tp["w2"].T) + tp["b2"]
    return (x + y).astype(feat.dtype)


if __name__ == "__main__":
    # Small shapes consistent with the module: channels=64, 4 heads,
    # kv_channels=32, mlp_ratio=4; two point clouds (120 + 80 points) with
    # 10 + 14 context tokens.
    C, H, Kc = 64, 4, 32
    hidden = int(C * 4.0)
    n_pts = (120, 80)
    n_ctx = (10, 14)
    N, M = sum(n_pts), sum(n_ctx)

    key = jax.random.PRNGKey(0)
    ks = jax.random.split(key, 16)

    feat = jax.random.normal(ks[0], (N, C), dtype=jnp.float32)
    context = jax.random.normal(ks[1], (M, Kc), dtype=jnp.float32)
    # batch ids derived from offsets (offset2batch equivalent)
    q_batch = jnp.concatenate([jnp.full((n,), i, jnp.int32) for i, n in enumerate(n_pts)])
    kv_batch = jnp.concatenate([jnp.full((n,), i, jnp.int32) for i, n in enumerate(n_ctx)])

    def w(k, o, i, s=0.05):
        return s * jax.random.normal(k, (o, i), dtype=jnp.float32)

    torch_params = {
        "num_heads": H,
        "ln1_g": 1.0 + 0.1 * jax.random.normal(ks[2], (C,), jnp.float32),
        "ln1_b": 0.1 * jax.random.normal(ks[3], (C,), jnp.float32),
        "ln2_g": 1.0 + 0.1 * jax.random.normal(ks[4], (C,), jnp.float32),
        "ln2_b": 0.1 * jax.random.normal(ks[5], (C,), jnp.float32),
        "wq": w(ks[6], C, C),          "bq": 0.02 * jax.random.normal(ks[7], (C,), jnp.float32),
        "wkv": w(ks[8], 2 * C, Kc),    "bkv": 0.02 * jax.random.normal(ks[9], (2 * C,), jnp.float32),
        "wp": w(ks[10], C, C),         "bp": 0.02 * jax.random.normal(ks[11], (C,), jnp.float32),
        "w1": w(ks[12], hidden, C),    "b1": 0.02 * jax.random.normal(ks[13], (hidden,), jnp.float32),
        "w2": w(ks[14], C, hidden),    "b2": 0.02 * jax.random.normal(ks[15], (C,), jnp.float32),
    }
    kparams = prepare_params(torch_params)

    # block_n=128 here so the multi-tile + tail-padding path (N=200 -> 256) is
    # exercised; use the 2048 default (or larger) for production point counts.
    out = ccblock_forward(feat, context, q_batch, kv_batch, kparams, block_n=128)
    jax.block_until_ready(out)

    ref = ccblock_reference(feat, context, q_batch, kv_batch, torch_params)
    assert out.shape == ref.shape
    err = float(jnp.max(jnp.abs(out - ref)))
    assert jnp.allclose(out, ref, atol=2e-2, rtol=2e-2), f"mismatch vs reference (max abs err {err})"

    print("KERNEL_OK")
</pallas_src>

<mosaic_0001>
module attributes {stable_mosaic.version = 11 : i64} {
  func.func @ccblock_kernel(%arg0: i32, %arg1: memref<128x64xf32, #tpu.memory_space<vmem>>, %arg2: memref<128x1xi32, #tpu.memory_space<vmem>>, %arg3: memref<1x24xi32, #tpu.memory_space<vmem>>, %arg4: memref<4x16x24xbf16, #tpu.memory_space<vmem>>, %arg5: memref<4x24x16xbf16, #tpu.memory_space<vmem>>, %arg6: memref<1x64xf32, #tpu.memory_space<vmem>>, %arg7: memref<1x64xf32, #tpu.memory_space<vmem>>, %arg8: memref<4x64x16xbf16, #tpu.memory_space<vmem>>, %arg9: memref<4x1x16xf32, #tpu.memory_space<vmem>>, %arg10: memref<4x16x64xbf16, #tpu.memory_space<vmem>>, %arg11: memref<1x64xf32, #tpu.memory_space<vmem>>, %arg12: memref<1x64xf32, #tpu.memory_space<vmem>>, %arg13: memref<1x64xf32, #tpu.memory_space<vmem>>, %arg14: memref<64x256xbf16, #tpu.memory_space<vmem>>, %arg15: memref<1x256xf32, #tpu.memory_space<vmem>>, %arg16: memref<256x64xbf16, #tpu.memory_space<vmem>>, %arg17: memref<1x64xf32, #tpu.memory_space<vmem>>, %arg18: memref<128x64xf32, #tpu.memory_space<vmem>>) attributes {dimension_semantics = [#tpu.dimension_semantics<parallel>], iteration_bounds = array<i64: 2>, scalar_prefetch = 0 : i64, scratch_operands = 0 : i64, tpu.core_type = #tpu.core_type<tc>, window_params = [{transform_indices = @transform_0, window_bounds = array<i64: 128, 64>}, {transform_indices = @transform_1, window_bounds = array<i64: 128, 1>}, {pipeline_mode = #tpu.pipeline_mode<synchronous>, transform_indices = @transform_2, window_bounds = array<i64: 1, 24>}, {pipeline_mode = #tpu.pipeline_mode<synchronous>, transform_indices = @transform_3, window_bounds = array<i64: 4, 16, 24>}, {pipeline_mode = #tpu.pipeline_mode<synchronous>, transform_indices = @transform_4, window_bounds = array<i64: 4, 24, 16>}, {pipeline_mode = #tpu.pipeline_mode<synchronous>, transform_indices = @transform_5, window_bounds = array<i64: 1, 64>}, {pipeline_mode = #tpu.pipeline_mode<synchronous>, transform_indices = @transform_6, window_bounds = array<i64: 1, 64>}, {pipeline_mode = #tpu.pipeline_mode<synchronous>, transform_indices = @transform_7, window_bounds = array<i64: 4, 64, 16>}, {pipeline_mode = #tpu.pipeline_mode<synchronous>, transform_indices = @transform_8, window_bounds = array<i64: 4, 1, 16>}, {pipeline_mode = #tpu.pipeline_mode<synchronous>, transform_indices = @transform_9, window_bounds = array<i64: 4, 16, 64>}, {pipeline_mode = #tpu.pipeline_mode<synchronous>, transform_indices = @transform_10, window_bounds = array<i64: 1, 64>}, {pipeline_mode = #tpu.pipeline_mode<synchronous>, transform_indices = @transform_11, window_bounds = array<i64: 1, 64>}, {pipeline_mode = #tpu.pipeline_mode<synchronous>, transform_indices = @transform_12, window_bounds = array<i64: 1, 64>}, {pipeline_mode = #tpu.pipeline_mode<synchronous>, transform_indices = @transform_13, window_bounds = array<i64: 64, 256>}, {pipeline_mode = #tpu.pipeline_mode<synchronous>, transform_indices = @transform_14, window_bounds = array<i64: 1, 256>}, {pipeline_mode = #tpu.pipeline_mode<synchronous>, transform_indices = @transform_15, window_bounds = array<i64: 256, 64>}, {pipeline_mode = #tpu.pipeline_mode<synchronous>, transform_indices = @transform_16, window_bounds = array<i64: 1, 64>}, {transform_indices = @transform_17, window_bounds = array<i64: 128, 64>}]} {
    %c0 = arith.constant 0 : index
    %c0_0 = arith.constant 0 : index
    %0 = vector.load %arg1[%c0, %c0_0] : memref<128x64xf32, #tpu.memory_space<vmem>>, vector<128x64xf32>
    %c0_1 = arith.constant 0 : index
    %c0_2 = arith.constant 0 : index
    %1 = vector.load %arg6[%c0_1, %c0_2] : memref<1x64xf32, #tpu.memory_space<vmem>>, vector<1x64xf32>
    %c0_3 = arith.constant 0 : index
    %c0_4 = arith.constant 0 : index
    %2 = vector.load %arg7[%c0_3, %c0_4] : memref<1x64xf32, #tpu.memory_space<vmem>>, vector<1x64xf32>
    %cst = arith.constant dense<0.000000e+00> : vector<128xf32>
    %3 = vector.multi_reduction <add>, %0, %cst [1] : vector<128x64xf32> to vector<128xf32>
    %4 = vector.shape_cast %3 : vector<128xf32> to vector<128x1xf32>
    %cst_5 = arith.constant 6.400000e+01 : f32
    %5 = vector.broadcast %cst_5 : f32 to vector<128x1xf32>
    %6 = arith.divf %4, %5 : vector<128x1xf32>
    %7 = vector.broadcast %6 : vector<128x1xf32> to vector<128x64xf32>
    %8 = arith.subf %0, %7 : vector<128x64xf32>
    %9 = arith.mulf %8, %8 : vector<128x64xf32>
    %cst_6 = arith.constant dense<0.000000e+00> : vector<128xf32>
    %10 = vector.multi_reduction <add>, %9, %cst_6 [1] : vector<128x64xf32> to vector<128xf32>
    %11 = vector.shape_cast %10 : vector<128xf32> to vector<128x1xf32>
    %cst_7 = arith.constant 6.400000e+01 : f32
    %12 = vector.broadcast %cst_7 : f32 to vector<128x1xf32>
    %13 = arith.divf %11, %12 : vector<128x1xf32>
    %cst_8 = arith.constant 9.99999974E-6 : f32
    %14 = vector.broadcast %cst_8 : f32 to vector<128x1xf32>
    %15 = arith.addf %13, %14 : vector<128x1xf32>
    %16 = math.rsqrt %15 : vector<128x1xf32>
    %17 = vector.broadcast %16 : vector<128x1xf32> to vector<128x64xf32>
    %18 = arith.mulf %8, %17 : vector<128x64xf32>
    %19 = vector.broadcast %1 : vector<1x64xf32> to vector<128x64xf32>
    %20 = arith.mulf %18, %19 : vector<128x64xf32>
    %21 = vector.broadcast %2 : vector<1x64xf32> to vector<128x64xf32>
    %22 = arith.addf %20, %21 : vector<128x64xf32>
    %23 = arith.truncf %22 : vector<128x64xf32> to vector<128x64xbf16>
    %c0_9 = arith.constant 0 : index
    %c0_10 = arith.constant 0 : index
    %24 = vector.load %arg2[%c0_9, %c0_10] : memref<128x1xi32, #tpu.memory_space<vmem>>, vector<128x1xi32>
    %c0_11 = arith.constant 0 : index
    %c0_12 = arith.constant 0 : index
    %25 = vector.load %arg3[%c0_11, %c0_12] : memref<1x24xi32, #tpu.memory_space<vmem>>, vector<1x24xi32>
    %26 = vector.broadcast %24 : vector<128x1xi32> to vector<128x24xi32>
    %27 = vector.broadcast %25 : vector<1x24xi32> to vector<128x24xi32>
    %28 = arith.cmpi eq, %26, %27 : vector<128x24xi32>
    %cst_13 = arith.constant 0.000000e+00 : f32
    %cst_14 = arith.constant -1.000000e+30 : f32
    %29 = vector.broadcast %cst_13 : f32 to vector<128x24xf32>
    %30 = vector.broadcast %cst_14 : f32 to vector<128x24xf32>
    %31 = arith.select %28, %29, %30 : vector<128x24xi1>, vector<128x24xf32>
    %c0_15 = arith.constant 0 : index
    %c0_16 = arith.constant 0 : index
    %c0_17 = arith.constant 0 : index
    %32 = vector.load %arg8[%c0_15, %c0_16, %c0_17] : memref<4x64x16xbf16, #tpu.memory_space<vmem>>, vector<1x64x16xbf16>
    %33 = vector.shape_cast %32 : vector<1x64x16xbf16> to vector<64x16xbf16>
    %cst_18 = arith.constant dense<0.000000e+00> : vector<128x16xf32>
    %34 = tpu.matmul %23, %33, %cst_18 {dimension_numbers = #tpu.dot_dimension_numbers<[1], [0], [0], [1], [0, 0, 1, 1], [], []>} : vector<128x64xbf16>, vector<64x16xbf16>, vector<128x16xf32> -> vector<128x16xf32>
    %c0_19 = arith.constant 0 : index
    %c0_20 = arith.constant 0 : index
    %c0_21 = arith.constant 0 : index
    %35 = vector.load %arg9[%c0_19, %c0_20, %c0_21] : memref<4x1x16xf32, #tpu.memory_space<vmem>>, vector<1x1x16xf32>
    %36 = vector.shape_cast %35 : vector<1x1x16xf32> to vector<1x16xf32>
    %37 = vector.broadcast %36 : vector<1x16xf32> to vector<128x16xf32>
    %38 = arith.addf %34, %37 : vector<128x16xf32>
    %39 = arith.truncf %38 : vector<128x16xf32> to vector<128x16xbf16>
    %c0_22 = arith.constant 0 : index
    %c0_23 = arith.constant 0 : index
    %c0_24 = arith.constant 0 : index
    %40 = vector.load %arg4[%c0_22, %c0_23, %c0_24] : memref<4x16x24xbf16, #tpu.memory_space<vmem>>, vector<1x16x24xbf16>
    %41 = vector.shape_cast %40 : vector<1x16x24xbf16> to vector<16x24xbf16>
    %cst_25 = arith.constant dense<0.000000e+00> : vector<128x24xf32>
    %42 = tpu.matmul %39, %41, %cst_25 {dimension_numbers = #tpu.dot_dimension_numbers<[1], [0], [0], [1], [0, 0, 1, 1], [], []>} : vector<128x16xbf16>, vector<16x24xbf16>, vector<128x24xf32> -> vector<128x24xf32>
    %43 = arith.addf %42, %31 : vector<128x24xf32>
    %cst_26 = arith.constant dense<0xFF800000> : vector<128xf32>
    %44 = vector.multi_reduction <maximumf>, %43, %cst_26 [1] : vector<128x24xf32> to vector<128xf32>
    %45 = vector.shape_cast %44 : vector<128xf32> to vector<128x1xf32>
    %46 = vector.broadcast %45 : vector<128x1xf32> to vector<128x24xf32>
    %47 = arith.subf %43, %46 : vector<128x24xf32>
    %48 = math.exp %47 : vector<128x24xf32>
    %cst_27 = arith.constant dense<0.000000e+00> : vector<128xf32>
    %49 = vector.multi_reduction <add>, %48, %cst_27 [1] : vector<128x24xf32> to vector<128xf32>
    %50 = vector.shape_cast %49 : vector<128xf32> to vector<128x1xf32>
    %51 = arith.truncf %48 : vector<128x24xf32> to vector<128x24xbf16>
    %c0_28 = arith.constant 0 : index
    %c0_29 = arith.constant 0 : index
    %c0_30 = arith.constant 0 : index
    %52 = vector.load %arg5[%c0_28, %c0_29, %c0_30] : memref<4x24x16xbf16, #tpu.memory_space<vmem>>, vector<1x24x16xbf16>
    %53 = vector.shape_cast %52 : vector<1x24x16xbf16> to vector<24x16xbf16>
    %cst_31 = arith.constant dense<0.000000e+00> : vector<128x16xf32>
    %54 = tpu.matmul %51, %53, %cst_31 {dimension_numbers = #tpu.dot_dimension_numbers<[1], [0], [0], [1], [0, 0, 1, 1], [], []>} : vector<128x24xbf16>, vector<24x16xbf16>, vector<128x16xf32> -> vector<128x16xf32>
    %55 = tpu.reciprocal %50 {approx = true} : vector<128x1xf32> -> vector<128x1xf32>
    %56 = vector.broadcast %55 : vector<128x1xf32> to vector<128x16xf32>
    %57 = arith.mulf %54, %56 : vector<128x16xf32>
    %58 = arith.truncf %57 : vector<128x16xf32> to vector<128x16xbf16>
    %c0_32 = arith.constant 0 : index
    %c0_33 = arith.constant 0 : index
    %c0_34 = arith.constant 0 : index
    %59 = vector.load %arg10[%c0_32, %c0_33, %c0_34] : memref<4x16x64xbf16, #tpu.memory_space<vmem>>, vector<1x16x64xbf16>
    %60 = vector.shape_cast %59 : vector<1x16x64xbf16> to vector<16x64xbf16>
    %cst_35 = arith.constant dense<0.000000e+00> : vector<128x64xf32>
    %61 = tpu.matmul %58, %60, %cst_35 {dimension_numbers = #tpu.dot_dimension_numbers<[1], [0], [0], [1], [0, 0, 1, 1], [], []>} : vector<128x16xbf16>, vector<16x64xbf16>, vector<128x64xf32> -> vector<128x64xf32>
    %c1 = arith.constant 1 : index
    %c0_36 = arith.constant 0 : index
    %c0_37 = arith.constant 0 : index
    %62 = vector.load %arg8[%c1, %c0_36, %c0_37] : memref<4x64x16xbf16, #tpu.memory_space<vmem>>, vector<1x64x16xbf16>
    %63 = vector.shape_cast %62 : vector<1x64x16xbf16> to vector<64x16xbf16>
    %cst_38 = arith.constant dense<0.000000e+00> : vector<128x16xf32>
    %64 = tpu.matmul %23, %63, %cst_38 {dimension_numbers = #tpu.dot_dimension_numbers<[1], [0], [0], [1], [0, 0, 1, 1], [], []>} : vector<128x64xbf16>, vector<64x16xbf16>, vector<128x16xf32> -> vector<128x16xf32>
    %c1_39 = arith.constant 1 : index
    %c0_40 = arith.constant 0 : index
    %c0_41 = arith.constant 0 : index
    %65 = vector.load %arg9[%c1_39, %c0_40, %c0_41] : memref<4x1x16xf32, #tpu.memory_space<vmem>>, vector<1x1x16xf32>
    %66 = vector.shape_cast %65 : vector<1x1x16xf32> to vector<1x16xf32>
    %67 = vector.broadcast %66 : vector<1x16xf32> to vector<128x16xf32>
    %68 = arith.addf %64, %67 : vector<128x16xf32>
    %69 = arith.truncf %68 : vector<128x16xf32> to vector<128x16xbf16>
    %c1_42 = arith.constant 1 : index
    %c0_43 = arith.constant 0 : index
    %c0_44 = arith.constant 0 : index
    %70 = vector.load %arg4[%c1_42, %c0_43, %c0_44] : memref<4x16x24xbf16, #tpu.memory_space<vmem>>, vector<1x16x24xbf16>
    %71 = vector.shape_cast %70 : vector<1x16x24xbf16> to vector<16x24xbf16>
    %cst_45 = arith.constant dense<0.000000e+00> : vector<128x24xf32>
    %72 = tpu.matmul %69, %71, %cst_45 {dimension_numbers = #tpu.dot_dimension_numbers<[1], [0], [0], [1], [0, 0, 1, 1], [], []>} : vector<128x16xbf16>, vector<16x24xbf16>, vector<128x24xf32> -> vector<128x24xf32>
    %73 = arith.addf %72, %31 : vector<128x24xf32>
    %cst_46 = arith.constant dense<0xFF800000> : vector<128xf32>
    %74 = vector.multi_reduction <maximumf>, %73, %cst_46 [1] : vector<128x24xf32> to vector<128xf32>
    %75 = vector.shape_cast %74 : vector<128xf32> to vector<128x1xf32>
    %76 = vector.broadcast %75 : vector<128x1xf32> to vector<128x24xf32>
    %77 = arith.subf %73, %76 : vector<128x24xf32>
    %78 = math.exp %77 : vector<128x24xf32>
    %cst_47 = arith.constant dense<0.000000e+00> : vector<128xf32>
    %79 = vector.multi_reduction <add>, %78, %cst_47 [1] : vector<128x24xf32> to vector<128xf32>
    %80 = vector.shape_cast %79 : vector<128xf32> to vector<128x1xf32>
    %81 = arith.truncf %78 : vector<128x24xf32> to vector<128x24xbf16>
    %c1_48 = arith.constant 1 : index
    %c0_49 = arith.constant 0 : index
    %c0_50 = arith.constant 0 : index
    %82 = vector.load %arg5[%c1_48, %c0_49, %c0_50] : memref<4x24x16xbf16, #tpu.memory_space<vmem>>, vector<1x24x16xbf16>
    %83 = vector.shape_cast %82 : vector<1x24x16xbf16> to vector<24x16xbf16>
    %cst_51 = arith.constant dense<0.000000e+00> : vector<128x16xf32>
    %84 = tpu.matmul %81, %83, %cst_51 {dimension_numbers = #tpu.dot_dimension_numbers<[1], [0], [0], [1], [0, 0, 1, 1], [], []>} : vector<128x24xbf16>, vector<24x16xbf16>, vector<128x16xf32> -> vector<128x16xf32>
    %85 = tpu.reciprocal %80 {approx = true} : vector<128x1xf32> -> vector<128x1xf32>
    %86 = vector.broadcast %85 : vector<128x1xf32> to vector<128x16xf32>
    %87 = arith.mulf %84, %86 : vector<128x16xf32>
    %88 = arith.truncf %87 : vector<128x16xf32> to vector<128x16xbf16>
    %c1_52 = arith.constant 1 : index
    %c0_53 = arith.constant 0 : index
    %c0_54 = arith.constant 0 : index
    %89 = vector.load %arg10[%c1_52, %c0_53, %c0_54] : memref<4x16x64xbf16, #tpu.memory_space<vmem>>, vector<1x16x64xbf16>
    %90 = vector.shape_cast %89 : vector<1x16x64xbf16> to vector<16x64xbf16>
    %cst_55 = arith.constant dense<0.000000e+00> : vector<128x64xf32>
    %91 = tpu.matmul %88, %90, %cst_55 {dimension_numbers = #tpu.dot_dimension_numbers<[1], [0], [0], [1], [0, 0, 1, 1], [], []>} : vector<128x16xbf16>, vector<16x64xbf16>, vector<128x64xf32> -> vector<128x64xf32>
    %92 = arith.addf %61, %91 : vector<128x64xf32>
    %c2 = arith.constant 2 : index
    %c0_56 = arith.constant 0 : index
    %c0_57 = arith.constant 0 : index
    %93 = vector.load %arg8[%c2, %c0_56, %c0_57] : memref<4x64x16xbf16, #tpu.memory_space<vmem>>, vector<1x64x16xbf16>
    %94 = vector.shape_cast %93 : vector<1x64x16xbf16> to vector<64x16xbf16>
    %cst_58 = arith.constant dense<0.000000e+00> : vector<128x16xf32>
    %95 = tpu.matmul %23, %94, %cst_58 {dimension_numbers = #tpu.dot_dimension_numbers<[1], [0], [0], [1], [0, 0, 1, 1], [], []>} : vector<128x64xbf16>, vector<64x16xbf16>, vector<128x16xf32> -> vector<128x16xf32>
    %c2_59 = arith.constant 2 : index
    %c0_60 = arith.constant 0 : index
    %c0_61 = arith.constant 0 : index
    %96 = vector.load %arg9[%c2_59, %c0_60, %c0_61] : memref<4x1x16xf32, #tpu.memory_space<vmem>>, vector<1x1x16xf32>
    %97 = vector.shape_cast %96 : vector<1x1x16xf32> to vector<1x16xf32>
    %98 = vector.broadcast %97 : vector<1x16xf32> to vector<128x16xf32>
    %99 = arith.addf %95, %98 : vector<128x16xf32>
    %100 = arith.truncf %99 : vector<128x16xf32> to vector<128x16xbf16>
    %c2_62 = arith.constant 2 : index
    %c0_63 = arith.constant 0 : index
    %c0_64 = arith.constant 0 : index
    %101 = vector.load %arg4[%c2_62, %c0_63, %c0_64] : memref<4x16x24xbf16, #tpu.memory_space<vmem>>, vector<1x16x24xbf16>
    %102 = vector.shape_cast %101 : vector<1x16x24xbf16> to vector<16x24xbf16>
    %cst_65 = arith.constant dense<0.000000e+00> : vector<128x24xf32>
    %103 = tpu.matmul %100, %102, %cst_65 {dimension_numbers = #tpu.dot_dimension_numbers<[1], [0], [0], [1], [0, 0, 1, 1], [], []>} : vector<128x16xbf16>, vector<16x24xbf16>, vector<128x24xf32> -> vector<128x24xf32>
    %104 = arith.addf %103, %31 : vector<128x24xf32>
    %cst_66 = arith.constant dense<0xFF800000> : vector<128xf32>
    %105 = vector.multi_reduction <maximumf>, %104, %cst_66 [1] : vector<128x24xf32> to vector<128xf32>
    %106 = vector.shape_cast %105 : vector<128xf32> to vector<128x1xf32>
    %107 = vector.broadcast %106 : vector<128x1xf32> to vector<128x24xf32>
    %108 = arith.subf %104, %107 : vector<128x24xf32>
    %109 = math.exp %108 : vector<128x24xf32>
    %cst_67 = arith.constant dense<0.000000e+00> : vector<128xf32>
    %110 = vector.multi_reduction <add>, %109, %cst_67 [1] : vector<128x24xf32> to vector<128xf32>
    %111 = vector.shape_cast %110 : vector<128xf32> to vector<128x1xf32>
    %112 = arith.truncf %109 : vector<128x24xf32> to vector<128x24xbf16>
    %c2_68 = arith.constant 2 : index
    %c0_69 = arith.constant 0 : index
    %c0_70 = arith.constant 0 : index
    %113 = vector.load %arg5[%c2_68, %c0_69, %c0_70] : memref<4x24x16xbf16, #tpu.memory_space<vmem>>, vector<1x24x16xbf16>
    %114 = vector.shape_cast %113 : vector<1x24x16xbf16> to vector<24x16xbf16>
    %cst_71 = arith.constant dense<0.000000e+00> : vector<128x16xf32>
    %115 = tpu.matmul %112, %114, %cst_71 {dimension_numbers = #tpu.dot_dimension_numbers<[1], [0], [0], [1], [0, 0, 1, 1], [], []>} : vector<128x24xbf16>, vector<24x16xbf16>, vector<128x16xf32> -> vector<128x16xf32>
    %116 = tpu.reciprocal %111 {approx = true} : vector<128x1xf32> -> vector<128x1xf32>
    %117 = vector.broadcast %116 : vector<128x1xf32> to vector<128x16xf32>
    %118 = arith.mulf %115, %117 : vector<128x16xf32>
    %119 = arith.truncf %118 : vector<128x16xf32> to vector<128x16xbf16>
    %c2_72 = arith.constant 2 : index
    %c0_73 = arith.constant 0 : index
    %c0_74 = arith.constant 0 : index
    %120 = vector.load %arg10[%c2_72, %c0_73, %c0_74] : memref<4x16x64xbf16, #tpu.memory_space<vmem>>, vector<1x16x64xbf16>
    %121 = vector.shape_cast %120 : vector<1x16x64xbf16> to vector<16x64xbf16>
    %cst_75 = arith.constant dense<0.000000e+00> : vector<128x64xf32>
    %122 = tpu.matmul %119, %121, %cst_75 {dimension_numbers = #tpu.dot_dimension_numbers<[1], [0], [0], [1], [0, 0, 1, 1], [], []>} : vector<128x16xbf16>, vector<16x64xbf16>, vector<128x64xf32> -> vector<128x64xf32>
    %123 = arith.addf %92, %122 : vector<128x64xf32>
    %c3 = arith.constant 3 : index
    %c0_76 = arith.constant 0 : index
    %c0_77 = arith.constant 0 : index
    %124 = vector.load %arg8[%c3, %c0_76, %c0_77] : memref<4x64x16xbf16, #tpu.memory_space<vmem>>, vector<1x64x16xbf16>
    %125 = vector.shape_cast %124 : vector<1x64x16xbf16> to vector<64x16xbf16>
    %cst_78 = arith.constant dense<0.000000e+00> : vector<128x16xf32>
    %126 = tpu.matmul %23, %125, %cst_78 {dimension_numbers = #tpu.dot_dimension_numbers<[1], [0], [0], [1], [0, 0, 1, 1], [], []>} : vector<128x64xbf16>, vector<64x16xbf16>, vector<128x16xf32> -> vector<128x16xf32>
    %c3_79 = arith.constant 3 : index
    %c0_80 = arith.constant 0 : index
    %c0_81 = arith.constant 0 : index
    %127 = vector.load %arg9[%c3_79, %c0_80, %c0_81] : memref<4x1x16xf32, #tpu.memory_space<vmem>>, vector<1x1x16xf32>
    %128 = vector.shape_cast %127 : vector<1x1x16xf32> to vector<1x16xf32>
    %129 = vector.broadcast %128 : vector<1x16xf32> to vector<128x16xf32>
    %130 = arith.addf %126, %129 : vector<128x16xf32>
    %131 = arith.truncf %130 : vector<128x16xf32> to vector<128x16xbf16>
    %c3_82 = arith.constant 3 : index
    %c0_83 = arith.constant 0 : index
    %c0_84 = arith.constant 0 : index
    %132 = vector.load %arg4[%c3_82, %c0_83, %c0_84] : memref<4x16x24xbf16, #tpu.memory_space<vmem>>, vector<1x16x24xbf16>
    %133 = vector.shape_cast %132 : vector<1x16x24xbf16> to vector<16x24xbf16>
    %cst_85 = arith.constant dense<0.000000e+00> : vector<128x24xf32>
    %134 = tpu.matmul %131, %133, %cst_85 {dimension_numbers = #tpu.dot_dimension_numbers<[1], [0], [0], [1], [0, 0, 1, 1], [], []>} : vector<128x16xbf16>, vector<16x24xbf16>, vector<128x24xf32> -> vector<128x24xf32>
    %135 = arith.addf %134, %31 : vector<128x24xf32>
    %cst_86 = arith.constant dense<0xFF800000> : vector<128xf32>
    %136 = vector.multi_reduction <maximumf>, %135, %cst_86 [1] : vector<128x24xf32> to vector<128xf32>
    %137 = vector.shape_cast %136 : vector<128xf32> to vector<128x1xf32>
    %138 = vector.broadcast %137 : vector<128x1xf32> to vector<128x24xf32>
    %139 = arith.subf %135, %138 : vector<128x24xf32>
    %140 = math.exp %139 : vector<128x24xf32>
    %cst_87 = arith.constant dense<0.000000e+00> : vector<128xf32>
    %141 = vector.multi_reduction <add>, %140, %cst_87 [1] : vector<128x24xf32> to vector<128xf32>
    %142 = vector.shape_cast %141 : vector<128xf32> to vector<128x1xf32>
    %143 = arith.truncf %140 : vector<128x24xf32> to vector<128x24xbf16>
    %c3_88 = arith.constant 3 : index
    %c0_89 = arith.constant 0 : index
    %c0_90 = arith.constant 0 : index
    %144 = vector.load %arg5[%c3_88, %c0_89, %c0_90] : memref<4x24x16xbf16, #tpu.memory_space<vmem>>, vector<1x24x16xbf16>
    %145 = vector.shape_cast %144 : vector<1x24x16xbf16> to vector<24x16xbf16>
    %cst_91 = arith.constant dense<0.000000e+00> : vector<128x16xf32>
    %146 = tpu.matmul %143, %145, %cst_91 {dimension_numbers = #tpu.dot_dimension_numbers<[1], [0], [0], [1], [0, 0, 1, 1], [], []>} : vector<128x24xbf16>, vector<24x16xbf16>, vector<128x16xf32> -> vector<128x16xf32>
    %147 = tpu.reciprocal %142 {approx = true} : vector<128x1xf32> -> vector<128x1xf32>
    %148 = vector.broadcast %147 : vector<128x1xf32> to vector<128x16xf32>
    %149 = arith.mulf %146, %148 : vector<128x16xf32>
    %150 = arith.truncf %149 : vector<128x16xf32> to vector<128x16xbf16>
    %c3_92 = arith.constant 3 : index
    %c0_93 = arith.constant 0 : index
    %c0_94 = arith.constant 0 : index
    %151 = vector.load %arg10[%c3_92, %c0_93, %c0_94] : memref<4x16x64xbf16, #tpu.memory_space<vmem>>, vector<1x16x64xbf16>
    %152 = vector.shape_cast %151 : vector<1x16x64xbf16> to vector<16x64xbf16>
    %cst_95 = arith.constant dense<0.000000e+00> : vector<128x64xf32>
    %153 = tpu.matmul %150, %152, %cst_95 {dimension_numbers = #tpu.dot_dimension_numbers<[1], [0], [0], [1], [0, 0, 1, 1], [], []>} : vector<128x16xbf16>, vector<16x64xbf16>, vector<128x64xf32> -> vector<128x64xf32>
    %154 = arith.addf %123, %153 : vector<128x64xf32>
    %155 = arith.addf %0, %154 : vector<128x64xf32>
    %c0_96 = arith.constant 0 : index
    %c0_97 = arith.constant 0 : index
    %156 = vector.load %arg11[%c0_96, %c0_97] : memref<1x64xf32, #tpu.memory_space<vmem>>, vector<1x64xf32>
    %157 = vector.broadcast %156 : vector<1x64xf32> to vector<128x64xf32>
    %158 = arith.addf %155, %157 : vector<128x64xf32>
    %c0_98 = arith.constant 0 : index
    %c0_99 = arith.constant 0 : index
    %159 = vector.load %arg12[%c0_98, %c0_99] : memref<1x64xf32, #tpu.memory_space<vmem>>, vector<1x64xf32>
    %c0_100 = arith.constant 0 : index
    %c0_101 = arith.constant 0 : index
    %160 = vector.load %arg13[%c0_100, %c0_101] : memref<1x64xf32, #tpu.memory_space<vmem>>, vector<1x64xf32>
    %cst_102 = arith.constant dense<0.000000e+00> : vector<128xf32>
    %161 = vector.multi_reduction <add>, %158, %cst_102 [1] : vector<128x64xf32> to vector<128xf32>
    %162 = vector.shape_cast %161 : vector<128xf32> to vector<128x1xf32>
    %cst_103 = arith.constant 6.400000e+01 : f32
    %163 = vector.broadcast %cst_103 : f32 to vector<128x1xf32>
    %164 = arith.divf %162, %163 : vector<128x1xf32>
    %165 = vector.broadcast %164 : vector<128x1xf32> to vector<128x64xf32>
    %166 = arith.subf %158, %165 : vector<128x64xf32>
    %167 = arith.mulf %166, %166 : vector<128x64xf32>
    %cst_104 = arith.constant dense<0.000000e+00> : vector<128xf32>
    %168 = vector.multi_reduction <add>, %167, %cst_104 [1] : vector<128x64xf32> to vector<128xf32>
    %169 = vector.shape_cast %168 : vector<128xf32> to vector<128x1xf32>
    %cst_105 = arith.constant 6.400000e+01 : f32
    %170 = vector.broadcast %cst_105 : f32 to vector<128x1xf32>
    %171 = arith.divf %169, %170 : vector<128x1xf32>
    %cst_106 = arith.constant 9.99999974E-6 : f32
    %172 = vector.broadcast %cst_106 : f32 to vector<128x1xf32>
    %173 = arith.addf %171, %172 : vector<128x1xf32>
    %174 = math.rsqrt %173 : vector<128x1xf32>
    %175 = vector.broadcast %174 : vector<128x1xf32> to vector<128x64xf32>
    %176 = arith.mulf %166, %175 : vector<128x64xf32>
    %177 = vector.broadcast %159 : vector<1x64xf32> to vector<128x64xf32>
    %178 = arith.mulf %176, %177 : vector<128x64xf32>
    %179 = vector.broadcast %160 : vector<1x64xf32> to vector<128x64xf32>
    %180 = arith.addf %178, %179 : vector<128x64xf32>
    %181 = arith.truncf %180 : vector<128x64xf32> to vector<128x64xbf16>
    %c0_107 = arith.constant 0 : index
    %c0_108 = arith.constant 0 : index
    %182 = vector.load %arg14[%c0_107, %c0_108] : memref<64x256xbf16, #tpu.memory_space<vmem>>, vector<64x256xbf16>
    %cst_109 = arith.constant dense<0.000000e+00> : vector<128x256xf32>
    %183 = tpu.matmul %181, %182, %cst_109 {dimension_numbers = #tpu.dot_dimension_numbers<[1], [0], [0], [1], [0, 0, 1, 1], [], []>} : vector<128x64xbf16>, vector<64x256xbf16>, vector<128x256xf32> -> vector<128x256xf32>
    %c0_110 = arith.constant 0 : index
    %c0_111 = arith.constant 0 : index
    %184 = vector.load %arg15[%c0_110, %c0_111] : memref<1x256xf32, #tpu.memory_space<vmem>>, vector<1x256xf32>
    %185 = vector.broadcast %184 : vector<1x256xf32> to vector<128x256xf32>
    %186 = arith.addf %183, %185 : vector<128x256xf32>
    %cst_112 = arith.constant 5.000000e-01 : f32
    %187 = vector.broadcast %cst_112 : f32 to vector<128x256xf32>
    %188 = arith.mulf %187, %186 : vector<128x256xf32>
    %cst_113 = arith.constant 4.471500e-02 : f32
    %189 = vector.broadcast %cst_113 : f32 to vector<128x256xf32>
    %190 = arith.mulf %189, %186 : vector<128x256xf32>
    %191 = arith.mulf %190, %186 : vector<128x256xf32>
    %192 = arith.mulf %191, %186 : vector<128x256xf32>
    %193 = arith.addf %186, %192 : vector<128x256xf32>
    %cst_114 = arith.constant 0.797884583 : f32
    %194 = vector.broadcast %cst_114 : f32 to vector<128x256xf32>
    %195 = arith.mulf %194, %193 : vector<128x256xf32>
    %196 = math.tanh %195 : vector<128x256xf32>
    %cst_115 = arith.constant 1.000000e+00 : f32
    %197 = vector.broadcast %cst_115 : f32 to vector<128x256xf32>
    %198 = arith.addf %197, %196 : vector<128x256xf32>
    %199 = arith.mulf %188, %198 : vector<128x256xf32>
    %200 = arith.truncf %199 : vector<128x256xf32> to vector<128x256xbf16>
    %c0_116 = arith.constant 0 : index
    %c0_117 = arith.constant 0 : index
    %201 = vector.load %arg16[%c0_116, %c0_117] : memref<256x64xbf16, #tpu.memory_space<vmem>>, vector<256x64xbf16>
    %cst_118 = arith.constant dense<0.000000e+00> : vector<128x64xf32>
    %202 = tpu.matmul %200, %201, %cst_118 {dimension_numbers = #tpu.dot_dimension_numbers<[1], [0], [0], [1], [0, 0, 1, 1], [], []>} : vector<128x256xbf16>, vector<256x64xbf16>, vector<128x64xf32> -> vector<128x64xf32>
    %c0_119 = arith.constant 0 : index
    %c0_120 = arith.constant 0 : index
    %203 = vector.load %arg17[%c0_119, %c0_120] : memref<1x64xf32, #tpu.memory_space<vmem>>, vector<1x64xf32>
    %204 = vector.broadcast %203 : vector<1x64xf32> to vector<128x64xf32>
    %205 = arith.addf %202, %204 : vector<128x64xf32>
    %206 = arith.addf %158, %205 : vector<128x64xf32>
    %c0_121 = arith.constant 0 : index
    %c0_122 = arith.constant 0 : index
    %207 = vector.load %arg18[%c0_121, %c0_122] : memref<128x64xf32, #tpu.memory_space<vmem>>, vector<128x64xf32>
    tpu.vector_store %arg18[%c0_121, %c0_122], %206 {strides = array<i32>} : memref<128x64xf32, #tpu.memory_space<vmem>>, vector<128x64xf32>,
    return
  }
  func.func @transform_0(%arg0: i32) -> (i32, i32) {
    %c0_i32 = arith.constant 0 : i32
    %c0_i32_0 = arith.constant 0 : i32
    return %arg0, %c0_i32 : i32, i32
  }
  func.func @transform_1(%arg0: i32) -> (i32, i32) {
    %c0_i32 = arith.constant 0 : i32
    %c0_i32_0 = arith.constant 0 : i32
    return %arg0, %c0_i32 : i32, i32
  }
  func.func @transform_2(%arg0: i32) -> (i32, i32) {
    %c0_i32 = arith.constant 0 : i32
    %c0_i32_0 = arith.constant 0 : i32
    %c0_i32_1 = arith.constant 0 : i32
    return %c0_i32, %c0_i32_0 : i32, i32
  }
  func.func @transform_3(%arg0: i32) -> (i32, i32, i32) {
    %c0_i32 = arith.constant 0 : i32
    %c0_i32_0 = arith.constant 0 : i32
    %c0_i32_1 = arith.constant 0 : i32
    %c0_i32_2 = arith.constant 0 : i32
    return %c0_i32, %c0_i32_0, %c0_i32_1 : i32, i32, i32
  }
  func.func @transform_4(%arg0: i32) -> (i32, i32, i32) {
    %c0_i32 = arith.constant 0 : i32
    %c0_i32_0 = arith.constant 0 : i32
    %c0_i32_1 = arith.constant 0 : i32
    %c0_i32_2 = arith.constant 0 : i32
    return %c0_i32, %c0_i32_0, %c0_i32_1 : i32, i32, i32
  }
  func.func @transform_5(%arg0: i32) -> (i32, i32) {
    %c0_i32 = arith.constant 0 : i32
    %c0_i32_0 = arith.constant 0 : i32
    %c0_i32_1 = arith.constant 0 : i32
    return %c0_i32, %c0_i32_0 : i32, i32
  }
  func.func @transform_6(%arg0: i32) -> (i32, i32) {
    %c0_i32 = arith.constant 0 : i32
    %c0_i32_0 = arith.constant 0 : i32
    %c0_i32_1 = arith.constant 0 : i32
    return %c0_i32, %c0_i32_0 : i32, i32
  }
  func.func @transform_7(%arg0: i32) -> (i32, i32, i32) {
    %c0_i32 = arith.constant 0 : i32
    %c0_i32_0 = arith.constant 0 : i32
    %c0_i32_1 = arith.constant 0 : i32
    %c0_i32_2 = arith.constant 0 : i32
    return %c0_i32, %c0_i32_0, %c0_i32_1 : i32, i32, i32
  }
  func.func @transform_8(%arg0: i32) -> (i32, i32, i32) {
    %c0_i32 = arith.constant 0 : i32
    %c0_i32_0 = arith.constant 0 : i32
    %c0_i32_1 = arith.constant 0 : i32
    %c0_i32_2 = arith.constant 0 : i32
    return %c0_i32, %c0_i32_0, %c0_i32_1 : i32, i32, i32
  }
  func.func @transform_9(%arg0: i32) -> (i32, i32, i32) {
    %c0_i32 = arith.constant 0 : i32
    %c0_i32_0 = arith.constant 0 : i32
    %c0_i32_1 = arith.constant 0 : i32
    %c0_i32_2 = arith.constant 0 : i32
    return %c0_i32, %c0_i32_0, %c0_i32_1 : i32, i32, i32
  }
  func.func @transform_10(%arg0: i32) -> (i32, i32) {
    %c0_i32 = arith.constant 0 : i32
    %c0_i32_0 = arith.constant 0 : i32
    %c0_i32_1 = arith.constant 0 : i32
    return %c0_i32, %c0_i32_0 : i32, i32
  }
  func.func @transform_11(%arg0: i32) -> (i32, i32) {
    %c0_i32 = arith.constant 0 : i32
    %c0_i32_0 = arith.constant 0 : i32
    %c0_i32_1 = arith.constant 0 : i32
    return %c0_i32, %c0_i32_0 : i32, i32
  }
  func.func @transform_12(%arg0: i32) -> (i32, i32) {
    %c0_i32 = arith.constant 0 : i32
    %c0_i32_0 = arith.constant 0 : i32
    %c0_i32_1 = arith.constant 0 : i32
    return %c0_i32, %c0_i32_0 : i32, i32
  }
  func.func @transform_13(%arg0: i32) -> (i32, i32) {
    %c0_i32 = arith.constant 0 : i32
    %c0_i32_0 = arith.constant 0 : i32
    %c0_i32_1 = arith.constant 0 : i32
    return %c0_i32, %c0_i32_0 : i32, i32
  }
  func.func @transform_14(%arg0: i32) -> (i32, i32) {
    %c0_i32 = arith.constant 0 : i32
    %c0_i32_0 = arith.constant 0 : i32
    %c0_i32_1 = arith.constant 0 : i32
    return %c0_i32, %c0_i32_0 : i32, i32
  }
  func.func @transform_15(%arg0: i32) -> (i32, i32) {
    %c0_i32 = arith.constant 0 : i32
    %c0_i32_0 = arith.constant 0 : i32
    %c0_i32_1 = arith.constant 0 : i32
    return %c0_i32, %c0_i32_0 : i32, i32
  }
  func.func @transform_16(%arg0: i32) -> (i32, i32) {
    %c0_i32 = arith.constant 0 : i32
    %c0_i32_0 = arith.constant 0 : i32
    %c0_i32_1 = arith.constant 0 : i32
    return %c0_i32, %c0_i32_0 : i32, i32
  }
  func.func @transform_17(%arg0: i32) -> (i32, i32) {
    %c0_i32 = arith.constant 0 : i32
    %c0_i32_0 = arith.constant 0 : i32
    return %arg0, %c0_i32 : i32, i32
  }
}

</mosaic_0001>

<bundles_post_ra>
// kernel: tpu_custom_call.1
= control target key start
LH: loop header
LB: loop body
LE: loop exit
PB: predicated region body
PF: predicated region fallthrough
CT: control target
= control target key end

     0   :  { %s6518_s24 = smov 0   ;;  %s8624_s0 = inlined_call_operand.vmem [shape: f32[256,64], index: 0, kind: input, shape index: {}]   ;;  %s8625_s1 = inlined_call_operand.vmem [shape: s32[256,1], index: 1, kind: input, shape index: {}]   ;;  %s8626_s2 = inlined_call_operand.vmem [shape: s32[1,24], index: 2, kind: input, shape index: {}]   ;;  %s8627_s3 = inlined_call_operand.vmem [shape: bf16[4,16,24], index: 3, kind: input, shape index: {}]   ;;  %s8628_s4 = inlined_call_operand.vmem [shape: bf16[4,24,16], index: 4, kind: input, shape index: {}]   ;;  %s8629_s5 = inlined_call_operand.vmem [shape: f32[1,64], index: 5, kind: input, shape index: {}]   ;;  %s8630_s6 = inlined_call_operand.vmem [shape: f32[1,64], index: 6, kind: input, shape index: {}]   ;;  %s8631_s7 = inlined_call_operand.vmem [shape: bf16[4,64,16], index: 7, kind: input, shape index: {}]   ;;  %s8632_s8 = inlined_call_operand.vmem [shape: f32[4,1,16], index: 8, kind: input, shape index: {}]   ;;  %s8633_s9 = inlined_call_operand.vmem [shape: bf16[4,16,64], index: 9, kind: input, shape index: {}]   ;;  %s8634_s10 = inlined_call_operand.vmem [shape: f32[1,64], index: 10, kind: input, shape index: {}]   ;;  %s8635_s11 = inlined_call_operand.vmem [shape: f32[1,64], index: 11, kind: input, shape index: {}]   ;;  %s8636_s12 = inlined_call_operand.vmem [shape: f32[1,64], index: 12, kind: input, shape index: {}]   ;;  %s8637_s13 = inlined_call_operand.vmem [shape: bf16[64,256], index: 13, kind: input, shape index: {}]   ;;  %s8638_s14 = inlined_call_operand.vmem [shape: f32[1,256], index: 14, kind: input, shape index: {}]   ;;  %s8639_s15 = inlined_call_operand.vmem [shape: bf16[256,64], index: 15, kind: input, shape index: {}]   ;;  %s8640_s16 = inlined_call_operand.vmem [shape: f32[1,64], index: 16, kind: input, shape index: {}]   ;;  %s8641_s17 = inlined_call_operand.vmem [shape: f32[256,64], index: 17, kind: output, shape index: {}]  }
   0x1   :  { %8690 = sst [smem:[#allocation25_spill]] %s8624_s0 }
   0x2   :  { %8691 = sst [smem:[#allocation26_spill]] %s8625_s1 }
   0x3 LB: > { %s5084_s25 = sadd.s32 4294967295, %s6424_s24   ;;  %p5088_p0 = scmp.ge.s32.totalorder %s6424_s24, 1  ;;  %s6424_s24 = sphi %s6518_s24, %s27_s24  }
   0x4   : > { %p499_p1 = scmp.lt.s32.totalorder %s6424_s24, 3 }
   0x6   : > { %p500_p2 = pnand %p5088_p0, %p499_p1 }
   0x8   : > { %503 = sbr.rel (%p500_p2) target bundleno = 3540 (0xdd4), region = 88 }
   0xf   : > { %s5089_s26 = sshll.u32 %s5084_s25, 4  ;;  %vm593_vm0 = vcmask 523264   ;;  %s8692_s0 = sld [smem:[#allocation25_spill]]  ;;  %vm1132_vm1 = vcmask 130048   ;;  %vm1254_vm5 = vcmask 195584  }
  0x10   : > { %p557_p3 = scmp.lt.s32.totalorder %s5089_s26, 31  ;;  %s8700_s23 = sld [smem:[#allocation26_spill]] }
  0x12   : > { %s8750_s26 = smov (!%p557_p3, %s5089_s26), 31 }
  0x13   : > { %s6526_s27 = sshll.u32 %s8750_s26, 3 }
  0x14   : > { %s8556_s22 = scalar_lea.vmem %s8641_s17, %s6526_s27 }
  0x15   : > { %s6532_s30 = scalar_lea.vmem %s8692_s0, %s6526_s27 }
  0x16   : > { %v575_v0 = vld [vmem:[%s6532_s30] sm:$0xff]  ;;  %v577_v1 = vld [vmem:[%s6532_s30 + $0x10] sm:$0xff]  ;;  %v576_v2 = vld [vmem:[%s6532_s30 + $0x8] sm:$0xff]  ;;  %s6814_s25 = scalar_lea.vmem %s8700_s23, %s6526_s27 }
  0x17   : > { %v594_v3 = vsel %vm593_vm0, %v575_v0, 0.0  ;;  %v600_v4 = vsel %vm593_vm0, %v577_v1, 0.0  ;;  %v578_v5 = vld [vmem:[%s6532_s30 + $0x18] sm:$0xff]  ;;  %v6541_v6 = vld [vmem:[%s6532_s30 + $0x20] sm:$0xff]  ;;  %v6544_v7 = vld [vmem:[%s6532_s30 + $0x28] sm:$0xff]  ;;  %v597_v11 = vsel %vm593_vm0, %v576_v2, 0.0 }
  0x18   : > { %595 = vadd.xlane.f32.xlu0 %v594_v3  ;;  %601 = vadd.xlane.f32.xlu1 %v600_v4  ;;  %v6547_v8 = vld [vmem:[%s6532_s30 + $0x30] sm:$0xff]  ;;  %v6550_v9 = vld [vmem:[%s6532_s30 + $0x38] sm:$0xff]  ;;  %v6553_v10 = vld [vmem:[%s6532_s30 + $0x40] sm:$0xff]  ;;  %v603_v12 = vsel %vm593_vm0, %v578_v5, 0.0  ;;  %v606_v16 = vsel %vm593_vm0, %v6541_v6, 0.0  ;;  %v609_v17 = vsel %vm593_vm0, %v6544_v7, 0.0 }
  0x19   : > { %v6558_v13 = vld [vmem:[%s6532_s30 + $0x48] sm:$0xff]  ;;  %v6561_v14 = vld [vmem:[%s6532_s30 + $0x50] sm:$0xff]  ;;  %v6564_v15 = vld [vmem:[%s6532_s30 + $0x58] sm:$0xff]  ;;  %v612_v18 = vsel %vm593_vm0, %v6547_v8, 0.0  ;;  %v615_v19 = vsel %vm593_vm0, %v6550_v9, 0.0  ;;  %v618_v20 = vsel %vm593_vm0, %v6553_v10, 0.0 }
  0x1a   : > { %v621_v21 = vsel %vm593_vm0, %v6558_v13, 0.0  ;;  %v624_v22 = vsel %vm593_vm0, %v6561_v14, 0.0  ;;  %v627_v23 = vsel %vm593_vm0, %v6564_v15, 0.0  ;;  %v6583_v24 = vld [vmem:[%s6532_s30 + $0x60] sm:$0xff]  ;;  %v6586_v25 = vld [vmem:[%s6532_s30 + $0x68] sm:$0xff]  ;;  %v6589_v26 = vld [vmem:[%s6532_s30 + $0x70] sm:$0xff] }
  0x1b   : > { %v6592_v27 = vld [vmem:[%s6532_s30 + $0x78] sm:$0xff]  ;;  %v630_v28 = vsel %vm593_vm0, %v6583_v24, 0.0  ;;  %v633_v29 = vsel %vm593_vm0, %v6586_v25, 0.0  ;;  %v636_v30 = vsel %vm593_vm0, %v6589_v26, 0.0 }
  0x1c   : > { %598 = vadd.xlane.f32.xlu0 %v597_v11  ;;  %604 = vadd.xlane.f32.xlu1 %v603_v12  ;;  %v639_v31 = vsel %vm593_vm0, %v6592_v27, 0.0 }
  0x20   : > { %607 = vadd.xlane.f32.xlu0 %v606_v16  ;;  %610 = vadd.xlane.f32.xlu1 %v609_v17 }
  0x24   : > { %613 = vadd.xlane.f32.xlu0 %v612_v18  ;;  %616 = vadd.xlane.f32.xlu1 %v615_v19 }
  0x28   : > { %619 = vadd.xlane.f32.xlu0 %v618_v20  ;;  %622 = vadd.xlane.f32.xlu1 %v621_v21 }
  0x2c   : > { %625 = vadd.xlane.f32.xlu0 %v624_v22  ;;  %628 = vadd.xlane.f32.xlu1 %v627_v23 }
  0x30   : > { %631 = vadd.xlane.f32.xlu0 %v630_v28  ;;  %634 = vadd.xlane.f32.xlu1 %v633_v29 }
  0x34   : > { %637 = vadd.xlane.f32.xlu0 %v636_v30  ;;  %640 = vadd.xlane.f32.xlu1 %v639_v31 }
  0xa5   : > { %v596_v32 = vpop.xlane.xlu0 %595  ;;  %v602_v33 = vpop.xlane.xlu1 %601 }
  0xa6   : > { %v643_v34 = vmul.f32 0.015625, %v596_v32  ;;  %v645_v35 = vmul.f32 0.015625, %v602_v33 }
  0xa8   : > { %v6602_v36 = vsub.f32 %v575_v0, %v643_v34  ;;  %v6604_v37 = vsub.f32 %v577_v1, %v645_v35 }
  0xa9   : > { %v599_v38 = vpop.xlane.xlu0 %598  ;;  %v605_v39 = vpop.xlane.xlu1 %604 }
  0xaa   : > { %v644_v40 = vmul.f32 0.015625, %v599_v38  ;;  %v646_v41 = vmul.f32 0.015625, %v605_v39  ;;  %v675_v42 = vmul.f32 %v6602_v36, %v6602_v36  ;;  %v677_v43 = vmul.f32 %v6604_v37, %v6604_v37 }
  0xac   : > { %v6610_v44 = vsub.f32 %v576_v2, %v644_v40  ;;  %v6612_v45 = vsub.f32 %v578_v5, %v646_v41  ;;  %v691_v46 = vsel %vm593_vm0, %v675_v42, 0.0  ;;  %v697_v49 = vsel %vm593_vm0, %v677_v43, 0.0 }
  0xad   : > { %692 = vadd.xlane.f32.xlu0 %v691_v46  ;;  %v608_v47 = vpop.xlane.xlu0 %607  ;;  %v611_v48 = vpop.xlane.xlu1 %610 }
  0xae   : > { %v647_v50 = vmul.f32 0.015625, %v608_v47  ;;  %v648_v51 = vmul.f32 0.015625, %v611_v48  ;;  %v676_v52 = vmul.f32 %v6610_v44, %v6610_v44  ;;  %v678_v53 = vmul.f32 %v6612_v45, %v6612_v45 }
  0xb0   : > { %v6621_v54 = vsub.f32 %v6541_v6, %v647_v50  ;;  %v6624_v55 = vsub.f32 %v6544_v7, %v648_v51  ;;  %v694_v56 = vsel %vm593_vm0, %v676_v52, 0.0  ;;  %v700_v59 = vsel %vm593_vm0, %v678_v53, 0.0  ;;  %v5959_v53 = vld [vmem:[%s8631_s7 + $0x8] sm:$0xff]  }
  0xb1   : > { %698 = vadd.xlane.f32.xlu0 %v697_v49  ;;  %695 = vadd.xlane.f32.xlu1 %v694_v56  ;;  %v614_v57 = vpop.xlane.xlu0 %613  ;;  %v617_v58 = vpop.xlane.xlu1 %616  ;;  %v5960_v56 = vld [vmem:[%s8631_s7 + $0x10] sm:$0xff]  }
  0xb2   : > { %v649_v60 = vmul.f32 0.015625, %v614_v57  ;;  %v650_v61 = vmul.f32 0.015625, %v617_v58  ;;  %v679_v62 = vmul.f32 %v6621_v54, %v6621_v54  ;;  %v680_v63 = vmul.f32 %v6624_v55, %v6624_v55  ;;  %v5961_v57 = vld [vmem:[%s8631_s7 + $0x18] sm:$0xff]   ;;  %v6709_v58 = vld [vmem:[%s8627_s3] sm:$0xff]  }
  0xb3   : > { %5892 = vmatprep.subr.bf16.mxu1 %v6709_v58 }
  0xb4   : > { %v6633_v0 = vsub.f32 %v6547_v8, %v649_v60  ;;  %v6636_v1 = vsub.f32 %v6550_v9, %v650_v61  ;;  %v703_v2 = vsel %vm593_vm0, %v679_v62, 0.0  ;;  %v706_v5 = vsel %vm593_vm0, %v680_v63, 0.0  ;;  %5893 = vmatpush3.bf16.msra.mxu1 %v6709_v58 }
  0xb5   : > { %701 = vadd.xlane.f32.xlu1 %v700_v59  ;;  %704 = vadd.xlane.f32.xlu0 %v703_v2  ;;  %v620_v3 = vpop.xlane.xlu0 %619  ;;  %v623_v4 = vpop.xlane.xlu1 %622 }
  0xb6   : > { %v651_v6 = vmul.f32 0.015625, %v620_v3  ;;  %v652_v7 = vmul.f32 0.015625, %v623_v4  ;;  %v681_v11 = vmul.f32 %v6633_v0, %v6633_v0  ;;  %v682_v8 = vmul.f32 %v6636_v1, %v6636_v1 }
  0xb8   : > { %v6645_v12 = vsub.f32 %v6553_v10, %v651_v6  ;;  %v6648_v9 = vsub.f32 %v6558_v13, %v652_v7  ;;  %v709_v16 = vsel %vm593_vm0, %v681_v11, 0.0  ;;  %v712_v19 = vsel %vm593_vm0, %v682_v8, 0.0 }
  0xb9   : > { %707 = vadd.xlane.f32.xlu1 %v706_v5  ;;  %710 = vadd.xlane.f32.xlu0 %v709_v16  ;;  %v626_v17 = vpop.xlane.xlu0 %625  ;;  %v629_v18 = vpop.xlane.xlu1 %628 }
  0xba   : > { %v653_v20 = vmul.f32 0.015625, %v626_v17  ;;  %v654_v21 = vmul.f32 0.015625, %v629_v18  ;;  %v683_v22 = vmul.f32 %v6645_v12, %v6645_v12  ;;  %v684_v10 = vmul.f32 %v6648_v9, %v6648_v9 }
  0xbc   : > { %v6657_v23 = vsub.f32 %v6561_v14, %v653_v20  ;;  %v6660_v13 = vsub.f32 %v6564_v15, %v654_v21  ;;  %v715_v28 = vsel %vm593_vm0, %v683_v22, 0.0  ;;  %v718_v31 = vsel %vm593_vm0, %v684_v10, 0.0 }
  0xbd   : > { %713 = vadd.xlane.f32.xlu1 %v712_v19  ;;  %716 = vadd.xlane.f32.xlu0 %v715_v28  ;;  %v632_v29 = vpop.xlane.xlu0 %631  ;;  %v635_v30 = vpop.xlane.xlu1 %634 }
  0xbe   : > { %v655_v32 = vmul.f32 0.015625, %v632_v29  ;;  %v656_v33 = vmul.f32 0.015625, %v635_v30  ;;  %v685_v34 = vmul.f32 %v6657_v23, %v6657_v23  ;;  %v686_v14 = vmul.f32 %v6660_v13, %v6660_v13 }
  0xc0   : > { %v6669_v35 = vsub.f32 %v6583_v24, %v655_v32  ;;  %v6672_v15 = vsub.f32 %v6586_v25, %v656_v33  ;;  %v721_v38 = vsel %vm593_vm0, %v685_v34, 0.0  ;;  %v724_v41 = vsel %vm593_vm0, %v686_v14, 0.0  ;;  %v6718_v34 = vld [vmem:[%s8629_s5] ss:$0 sm:$0xff] }
  0xc1   : > { %719 = vadd.xlane.f32.xlu1 %v718_v31  ;;  %722 = vadd.xlane.f32.xlu0 %v721_v38  ;;  %v638_v39 = vpop.xlane.xlu0 %637  ;;  %v641_v40 = vpop.xlane.xlu1 %640 }
  0xc2   : > { %v657_v42 = vmul.f32 0.015625, %v638_v39  ;;  %v658_v43 = vmul.f32 0.015625, %v641_v40  ;;  %v687_v46 = vmul.f32 %v6669_v35, %v6669_v35  ;;  %v688_v24 = vmul.f32 %v6672_v15, %v6672_v15 }
  0xc4   : > { %v6681_v47 = vsub.f32 %v6589_v26, %v657_v42  ;;  %v6684_v25 = vsub.f32 %v6592_v27, %v658_v43  ;;  %v727_v48 = vsel %vm593_vm0, %v687_v46, 0.0  ;;  %v730_v49 = vsel %vm593_vm0, %v688_v24, 0.0  ;;  %v5958_v26 = vld [vmem:[%s8631_s7] sm:$0xff]  }
  0xc5   : > { %725 = vadd.xlane.f32.xlu1 %v724_v41  ;;  %728 = vadd.xlane.f32.xlu0 %v727_v48  ;;  %v6725_v48 = vld [vmem:[%s8630_s6] ss:$0 sm:$0xff] }
  0xc6   : > { %v689_v50 = vmul.f32 %v6681_v47, %v6681_v47  ;;  %v690_v51 = vmul.f32 %v6684_v25, %v6684_v25  ;;  %5572 = vmatprep.subr.bf16.mxu0 %v5958_v26 }
  0xc7   : > { %5573 = vmatpush3.bf16.msra.mxu0 %v5958_v26 }
  0xc8   : > { %v733_v52 = vsel %vm593_vm0, %v689_v50, 0.0  ;;  %v736_v27 = vsel %vm593_vm0, %v690_v51, 0.0  ;;  %5574 = vmatprep.subr.bf16.mxu0 %v5959_v53 }
  0xc9   : > { %731 = vadd.xlane.f32.xlu1 %v730_v49  ;;  %734 = vadd.xlane.f32.xlu0 %v733_v52 }
  0xcb   : > { %5575 = vmatpush3.bf16.msra.mxu0 %v5959_v53 }
  0xcc   : > { %5576 = vmatprep.subr.bf16.mxu0 %v5960_v56 }
  0xcd   : > { %737 = vadd.xlane.f32.xlu1 %v736_v27 }
  0xcf   : > { %5577 = vmatpush3.bf16.msra.mxu0 %v5960_v56 }
  0xd0   : > { %5578 = vmatprep.subr.bf16.mxu0 %v5961_v57 }
  0xd3   : > { %5579 = vmatpush3.bf16.msra.mxu0 %v5961_v57 }
  0xd4   : > { %5596 = vmatprep.subr.bf16.mxu0 %v6709_v58 }
 0x13a   : > { %v693_v59 = vpop.xlane.xlu0 %692 }
 0x13b   : > { %v739_v60 = vmul.f32 0.015625, %v693_v59 }
 0x13d   : > { %v755_v61 = vadd.f32 1e-05, %v739_v60 }
 0x13e   : > { %v696_v62 = vpop.xlane.xlu1 %695  ;;  %v699_v63 = vpop.xlane.xlu0 %698 }
 0x13f   : > { %6018 = vrsqrt.f32 %v755_v61  ;;  %v740_v2 = vmul.f32 0.015625, %v696_v62  ;;  %v741_v3 = vmul.f32 0.015625, %v699_v63 }
 0x141   : > { %v756_v4 = vadd.f32 1e-05, %v740_v2  ;;  %v757_v5 = vadd.f32 1e-05, %v741_v3 }
 0x142   : > { %v702_v6 = vpop.xlane.xlu1 %701  ;;  %v705_v7 = vpop.xlane.xlu0 %704 }
 0x143   : > { %6020 = vrsqrt.f32 %v756_v4  ;;  %v742_v11 = vmul.f32 0.015625, %v702_v6  ;;  %v743_v8 = vmul.f32 0.015625, %v705_v7 }
 0x144   : > { %6022 = vrsqrt.f32 %v757_v5 }
 0x145   : > { %v758_v16 = vadd.f32 1e-05, %v742_v11  ;;  %v759_v17 = vadd.f32 1e-05, %v743_v8 }
 0x146   : > { %v708_v18 = vpop.xlane.xlu1 %707  ;;  %v711_v19 = vpop.xlane.xlu0 %710 }
 0x147   : > { %6024 = vrsqrt.f32 %v758_v16  ;;  %v744_v20 = vmul.f32 0.015625, %v708_v18  ;;  %v745_v21 = vmul.f32 0.015625, %v711_v19 }
 0x148   : > { %6026 = vrsqrt.f32 %v759_v17 }
 0x149   : > { %v6019_v22 = vpop.eup %6018  ;;  %v760_v10 = vadd.f32 1e-05, %v744_v20  ;;  %v761_v28 = vadd.f32 1e-05, %v745_v21 }
 0x14a   : > { %v714_v29 = vpop.xlane.xlu1 %713  ;;  %v717_v30 = vpop.xlane.xlu0 %716  ;;  %v787_v31 = vmul.f32 %v6019_v22, %v6602_v36 }
 0x14b   : > { %6028 = vrsqrt.f32 %v760_v10  ;;  %v746_v32 = vmul.f32 0.015625, %v714_v29  ;;  %v747_v33 = vmul.f32 0.015625, %v717_v30 }
 0x14c   : > { %6030 = vrsqrt.f32 %v761_v28  ;;  %v809_v46 = vmul.f32 %v6718_v34, %v787_v31 }
 0x14d   : > { %v6021_v14 = vpop.eup %6020  ;;  %v762_v38 = vadd.f32 1e-05, %v746_v32  ;;  %v763_v39 = vadd.f32 1e-05, %v747_v33 }
 0x14e   : > { %v6023_v40 = vpop.eup %6022  ;;  %v720_v41 = vpop.xlane.xlu1 %719  ;;  %v788_v43 = vmul.f32 %v6021_v14, %v6610_v44  ;;  %v831_v56 = vadd.f32 %v6725_v48, %v809_v46 }
 0x14f   : > { %v723_v42 = vpop.xlane.xlu0 %722  ;;  %6032 = vrsqrt.f32 %v762_v38  ;;  %v748_v36 = vmul.f32 0.015625, %v720_v41  ;;  %v789_v49 = vmul.f32 %v6023_v40, %v6604_v37 }
 0x150   : > { %v749_v24 = vmul.f32 0.015625, %v723_v42  ;;  %6034 = vrsqrt.f32 %v763_v39  ;;  %v810_v50 = vmul.f32 %v6718_v34, %v788_v43 }
 0x151   : > { %v6025_v51 = vpop.eup %6024  ;;  %v764_v52 = vadd.f32 1e-05, %v748_v36  ;;  %v811_v60 = vmul.f32 %v6718_v34, %v789_v49 }
 0x152   : > { %v765_v26 = vadd.f32 1e-05, %v749_v24  ;;  %v6027_v27 = vpop.eup %6026  ;;  %v726_v44 = vpop.xlane.xlu1 %725  ;;  %v832_v57 = vadd.f32 %v6725_v48, %v810_v50  ;;  %v790_v59 = vmul.f32 %v6025_v51, %v6612_v45 }
 0x153   : > { %v729_v53 = vpop.xlane.xlu0 %728  ;;  %6036 = vrsqrt.f32 %v764_v52  ;;  %v750_v61 = vmul.f32 0.015625, %v726_v44  ;;  %v791_v2 = vmul.f32 %v6027_v27, %v6621_v54  ;;  %v833_v11 = vadd.f32 %v6725_v48, %v811_v60 }
 0x154   : > { %v751_v37 = vmul.f32 0.015625, %v729_v53  ;;  %6038 = vrsqrt.f32 %v765_v26  ;;  %v6733_v62 = vpack.c.bf16 %v832_v57, %v831_v56  ;;  %v812_v63 = vmul.f32 %v6718_v34, %v790_v59 }
 0x155   : > { %v6029_v3 = vpop.eup %6028  ;;  %v766_v4 = vadd.f32 1e-05, %v750_v61  ;;  %v813_v17 = vmul.f32 %v6718_v34, %v791_v2 }
 0x156   : > { %v767_v5 = vadd.f32 1e-05, %v751_v37  ;;  %v6031_v6 = vpop.eup %6030  ;;  %v732_v7 = vpop.xlane.xlu1 %731  ;;  %5580 = vmatprep.mubr.msk.bf16.mxu0 %vm593_vm0, %v6733_v62  ;;  %v834_v8 = vadd.f32 %v6725_v48, %v812_v63  ;;  %v792_v16 = vmul.f32 %v6029_v3, %v6624_v55 }
 0x157   : > { %v735_v45 = vpop.xlane.xlu0 %734  ;;  %6040 = vrsqrt.f32 %v766_v4  ;;  %v752_v18 = vmul.f32 0.015625, %v732_v7  ;;  %v793_v19 = vmul.f32 %v6031_v6, %v6633_v0  ;;  %v835_v55 = vadd.f32 %v6725_v48, %v813_v17  ;;  %v860_v17 = vld [vmem:[%s6814_s25 + $0x28] sm:$0xff] }
 0x158   : > { %v753_v54 = vmul.f32 0.015625, %v735_v45  ;;  %6042 = vrsqrt.f32 %v767_v5  ;;  %v6744_v20 = vpack.c.bf16 %v834_v8, %v833_v11  ;;  %v814_v21 = vmul.f32 %v6718_v34, %v792_v16  ;;  %v858_v8 = vld [vmem:[%s6814_s25 + $0x18] sm:$0xff]  ;;  %v859_v16 = vld [vmem:[%s6814_s25 + $0x20] sm:$0xff] }
 0x159   : > { %v6033_v22 = vpop.eup %6032  ;;  %v768_v10 = vadd.f32 1e-05, %v752_v18  ;;  %v815_v0 = vmul.f32 %v6718_v34, %v793_v19  ;;  %v8642_v11 = vmov 0   ;;  %v855_v18 = vld [vmem:[%s6814_s25] sm:$0xff]  ;;  %v864_v19 = vld [vmem:[%s6814_s25 + $0x48] sm:$0xff] }
 0x15a   : > { %8693 = vst [vmem:[#allocation2_spill] sm:$0xff] %v6744_v20  ;;  %v769_v28 = vadd.f32 1e-05, %v753_v54  ;;  %v6035_v29 = vpop.eup %6034  ;;  %v738_v30 = vpop.xlane.xlu1 %737  ;;  %5581 = vmatmul.mubr.msk.bf16.vlgmr.msra.gmra.mrb[0].mxu0 %vm593_vm0, %v6744_v20  ;;  %v836_v31 = vadd.f32 %v6725_v48, %v814_v21  ;;  %v794_v32 = vmul.f32 %v6033_v22, %v6636_v1  ;;  %5957 = vset.pattern.permute.xlu1 %v8642_v11  ;;  %v861_v54 = vld [vmem:[%s6814_s25 + $0x30] sm:$0xff]  ;;  %v862_v21 = vld [vmem:[%s6814_s25 + $0x38] sm:$0xff] }
 0x15b   : > { %6044 = vrsqrt.f32 %v768_v10  ;;  %v754_v33 = vmul.f32 0.015625, %v738_v30  ;;  %v795_v14 = vmul.f32 %v6035_v29, %v6645_v12  ;;  %5597 = vmatpush3.bf16.msra.mxu0 %v6709_v58  ;;  %v837_v1 = vadd.f32 %v6725_v48, %v815_v0  ;;  %5956 = vset.pattern.permute.xlu0 %v8642_v11  ;;  %v866_v22 = vld [vmem:[%s6814_s25 + $0x58] sm:$0xff]  ;;  %v863_v10 = vld [vmem:[%s6814_s25 + $0x40] sm:$0xff]  ;;  %v865_v29 = vld [vmem:[%s6814_s25 + $0x50] sm:$0xff] }
 0x15c   : > { %6046 = vrsqrt.f32 %v769_v28  ;;  %v6755_v38 = vpack.c.bf16 %v836_v31, %v835_v55  ;;  %v816_v39 = vmul.f32 %v6718_v34, %v794_v32  ;;  %873 = vperm.xlu0 %5956, %v855_v18   ;;  %v868_v28 = vld [vmem:[%s6814_s25 + $0x68] sm:$0xff]  ;;  %v870_v30 = vld [vmem:[%s6814_s25 + $0x78] sm:$0xff]  ;;  %v867_v55 = vld [vmem:[%s6814_s25 + $0x60] sm:$0xff] }
 0x15d   : > { %v6037_v40 = vpop.eup %6036  ;;  %v770_v41 = vadd.f32 1e-05, %v754_v33  ;;  %v817_v12 = vmul.f32 %v6718_v34, %v795_v14  ;;  %v869_v31 = vld [vmem:[%s6814_s25 + $0x70] sm:$0xff]  ;;  %v5098_v0 = vld [vmem:[%s8632_s8] ss:$0 sm:$0xff] }
 0x15e   : > { %8694 = vst [vmem:[#allocation3_spill] sm:$0xff] %v6755_v38  ;;  %v6039_v42 = vpop.eup %6038  ;;  %5584 = vmatprep.mubr.msk.bf16.mxu0 %vm593_vm0, %v6755_v38  ;;  %v838_v43 = vadd.f32 %v6725_v48, %v816_v39  ;;  %v796_v46 = vmul.f32 %v6037_v40, %v6648_v9 }
 0x15f   : > { %6048 = vrsqrt.f32 %v770_v41  ;;  %v797_v58 = vmul.f32 %v6039_v42, %v6657_v23  ;;  %v839_v51 = vadd.f32 %v6725_v48, %v817_v12  ;;  %v5964_v12 = vld [vmem:[%s8631_s7 + $0x28] sm:$0xff]  }
 0x160   : > { %v6765_v36 = vpack.c.bf16 %v838_v43, %v837_v1  ;;  %v818_v24 = vmul.f32 %v6718_v34, %v796_v46  ;;  %900 = vperm.xlu0 %5956, %v864_v19  }
 0x161   : > { %v6041_v49 = vpop.eup %6040  ;;  %v819_v26 = vmul.f32 %v6718_v34, %v797_v58 }
 0x162   : > { %8695 = vst [vmem:[#allocation4_spill] sm:$0xff] %v6765_v36  ;;  %v6043_v50 = vpop.eup %6042  ;;  %5585 = vmatmul.mubr.msk.bf16.gmra.mrb[4].mxu0 %vm593_vm0, %v6765_v36  ;;  %v840_v52 = vadd.f32 %v6725_v48, %v818_v24  ;;  %v798_v9 = vmul.f32 %v6041_v49, %v6660_v13 }
 0x163   : > { %v799_v27 = vmul.f32 %v6043_v50, %v6669_v35  ;;  %v841_v57 = vadd.f32 %v6725_v48, %v819_v26 }
 0x164   : > { %v6775_v23 = vpack.c.bf16 %v840_v52, %v839_v51  ;;  %v820_v44 = vmul.f32 %v6718_v34, %v798_v9  ;;  %906 = vperm.xlu0 %5956, %v866_v22   ;;  %v5965_v9 = vld [vmem:[%s8631_s7 + $0x30] sm:$0xff]  }
 0x165   : > { %v6045_v53 = vpop.eup %6044  ;;  %v821_v13 = vmul.f32 %v6718_v34, %v799_v27 }
 0x166   : > { %8696 = vst [vmem:[#allocation5_spill] sm:$0xff] %v6775_v23  ;;  %v6047_v56 = vpop.eup %6046  ;;  %5588 = vmatprep.mubr.msk.bf16.mxu0 %vm593_vm0, %v6775_v23  ;;  %v842_v59 = vadd.f32 %v6725_v48, %v820_v44  ;;  %v800_v60 = vmul.f32 %v6045_v53, %v6672_v15 }
 0x167   : > { %v801_v61 = vmul.f32 %v6047_v56, %v6681_v47  ;;  %v843_v2 = vadd.f32 %v6725_v48, %v821_v13  ;;  %v5966_v56 = vld [vmem:[%s8631_s7 + $0x38] sm:$0xff]  }
 0x168   : > { %v6785_v35 = vpack.c.bf16 %v842_v59, %v841_v57  ;;  %v822_v37 = vmul.f32 %v6718_v34, %v800_v60  ;;  %912 = vperm.xlu0 %5956, %v868_v28   ;;  %v6871_v28 = vld [vmem:[%s8626_s2] ss:$0 sm:$0xff] }
 0x169   : > { %v6049_v63 = vpop.eup %6048  ;;  %v823_v15 = vmul.f32 %v6718_v34, %v801_v61 }
 0x16a   : > { %8697 = vst [vmem:[#allocation6_spill] sm:$0xff] %v6785_v35  ;;  %5589 = vmatmul.mubr.msk.bf16.gmra.mrb[8].mxu0 %vm593_vm0, %v6785_v35  ;;  %v844_v3 = vadd.f32 %v6725_v48, %v822_v37  ;;  %v802_v4 = vmul.f32 %v6049_v63, %v6684_v25  ;;  %v5963_v25 = vld [vmem:[%s8631_s7 + $0x20] sm:$0xff]  }
 0x16b   : > { %v845_v6 = vadd.f32 %v6725_v48, %v823_v15  ;;  %5634 = vmatprep.subr.bf16.mxu0 %v5963_v25 }
 0x16c   : > { %v6794_v5 = vpack.c.bf16 %v844_v3, %v843_v2  ;;  %v824_v47 = vmul.f32 %v6718_v34, %v802_v4  ;;  %v856_v34 = vld [vmem:[%s6814_s25 + $0x8] sm:$0xff]  ;;  %918 = vperm.xlu0 %5956, %v870_v30  }
 0x16d   : > { %876 = vperm.xlu1 %5957, %v856_v34  }
 0x16e   : > { %8698 = vst [vmem:[#allocation7_spill] sm:$0xff] %v6794_v5  ;;  %5592 = vmatprep.mubr.msk.bf16.mxu0 %vm593_vm0, %v6794_v5  ;;  %v846_v7 = vadd.f32 %v6725_v48, %v824_v47  ;;  %v857_v48 = vld [vmem:[%s6814_s25 + $0x10] sm:$0xff] }
 0x170   : > { %v6801_v45 = vpack.c.bf16 %v846_v7, %v845_v6 }
 0x171   : > { %879 = vperm.xlu1 %5957, %v857_v48  }
 0x172   : > { %8699 = vst [vmem:[#allocation8_spill] sm:$0xff] %v6801_v45  ;;  %5593 = vmatmul.mubr.msk.bf16.gmra.mrb[12].mxu0 %vm593_vm0, %v6801_v45 }
 0x175   : > { %882 = vperm.xlu1 %5957, %v858_v8  }
 0x179   : > { %885 = vperm.xlu1 %5957, %v859_v16  }
 0x17d   : > { %888 = vperm.xlu1 %5957, %v860_v17  }
 0x181   : > { %891 = vperm.xlu1 %5957, %v861_v54  }
 0x185   : > { %894 = vperm.xlu1 %5957, %v862_v21  }
 0x189   : > { %897 = vperm.xlu1 %5957, %v863_v10  }
 0x18d   : > { %903 = vperm.xlu1 %5957, %v865_v29  }
 0x191   : > { %909 = vperm.xlu1 %5957, %v867_v55   ;;  %v6427_v55 = vmov -1e+30  }
 0x195   : > { %915 = vperm.xlu1 %5957, %v869_v31  }
 0x1db   : > { %v874_v29 = vpop.permute.xlu0 %873 }
 0x1dc   : > { %vm924_vm2 = vcmp.eq.s32.totalorder %v874_v29, %v6871_v28 }
 0x1dd   : > { %v6875_v31 = vsel %vm924_vm2, 0.0, %v6427_v55 }
 0x1de   : > { %8701 = vst [vmem:[#allocation9_spill] sm:$0xff] %v6875_v31 }
 0x1ec   : > { %v877_v18 = vpop.permute.xlu1 %876 }
 0x1ed   : > { %vm925_vm3 = vcmp.eq.s32.totalorder %v877_v18, %v6871_v28 }
 0x1f0   : > { %v880_v54 = vpop.permute.xlu1 %879 }
 0x1f1   : > { %vm926_vm6 = vcmp.eq.s32.totalorder %v880_v54, %v6871_v28 }
 0x1f4   : > { %v883_v19 = vpop.permute.xlu1 %882 }
 0x1f5   : > { %vm927_vm4 = vcmp.eq.s32.totalorder %v883_v19, %v6871_v28 }
 0x1f8   : > { %v886_v21 = vpop.permute.xlu1 %885 }
 0x1f9   : > { %vm928_vm7 = vcmp.eq.s32.totalorder %v886_v21, %v6871_v28 }
 0x1fc   : > { %v889_v22 = vpop.permute.xlu1 %888 }
 0x1fd   : > { %vm929_vm8 = vcmp.eq.s32.totalorder %v889_v22, %v6871_v28 }
 0x200   : > { %v892_v10 = vpop.permute.xlu1 %891 }
 0x201   : > { %vm930_vm9 = vcmp.eq.s32.totalorder %v892_v10, %v6871_v28 }
 0x204   : > { %v895_v30 = vpop.permute.xlu1 %894 }
 0x205   : > { %vm931_vm10 = vcmp.eq.s32.totalorder %v895_v30, %v6871_v28 }
 0x22d   : > { %v5582_v32 = vpop.f32.mrb[0].mxu0 }
 0x22e   : > { %v1053_v33 = vpop.f32.mrb[1].mxu0  ;;  %v1062_v39 = vadd.f32 %v5582_v32, %v5098_v0 }
 0x22f   : > { %v5583_v14 = vpop.f32.mrb[2].mxu0  ;;  %v1054_v42 = vadd.f32 %v5098_v0, %v1053_v33 }
 0x230   : > { %v1065_v40 = vadd.f32 %v5583_v14, %v5098_v0  ;;  %v1056_v41 = vpop.f32.mrb[3].mxu0 }
 0x231   : > { %v1057_v1 = vadd.f32 %v5098_v0, %v1056_v41 }
 0x232   : > { %v1117_v43 = vpack.c.bf16 %v1065_v40, %v1062_v39  ;;  %v6884_v39 = vsel %vm925_vm3, 0.0, %v6427_v55  ;;  %v6887_v40 = vsel %vm927_vm4, 0.0, %v6427_v55 }
 0x233   : > { %v1116_v46 = vpack.c.bf16 %v1057_v1, %v1054_v42  ;;  %8702 = vst [vmem:[#allocation10_spill] sm:$0xff] %v6884_v39  ;;  %8703 = vst [vmem:[#allocation11_spill] sm:$0xff] %v6887_v40  ;;  %v898_v42 = vpop.permute.xlu1 %897 }
 0x234   : > { %vm932_vm11 = vcmp.eq.s32.totalorder %v898_v42, %v6871_v28 }
 0x235   : > { %v5586_v58 = vpop.f32.mrb[4].mxu0  ;;  %5598 = vmatprep.mubr.msk.bf16.mxu0 %vm1132_vm1, %v1116_v46 }
 0x236   : > { %v1069_v24 = vpop.f32.mrb[5].mxu0  ;;  %5599 = vmatmul.mubr.msk.bf16.vlgmr.msra.gmra.mrb[16].mxu0 %vm1132_vm1, %v1117_v43  ;;  %v1078_v50 = vadd.f32 %v5586_v58, %v5098_v0  ;;  %v901_v58 = vpop.permute.xlu0 %900 }
 0x237   : > { %v5587_v49 = vpop.f32.mrb[6].mxu0  ;;  %5635 = vmatpush3.bf16.msra.mxu0 %v5963_v25  ;;  %v1070_v26 = vadd.f32 %v5098_v0, %v1069_v24  ;;  %vm933_vm12 = vcmp.eq.s32.totalorder %v901_v58, %v6871_v28 }
 0x238   : > { %v1081_v51 = vadd.f32 %v5587_v49, %v5098_v0  ;;  %v1072_v52 = vpop.f32.mrb[7].mxu0  ;;  %5636 = vmatprep.subr.bf16.mxu0 %v5964_v12 }
 0x239   : > { %v1073_v27 = vadd.f32 %v5098_v0, %v1072_v52  ;;  %v6910_v52 = vsel %vm928_vm7, 0.0, %v6427_v55 }
 0x23a   : > { %v1119_v44 = vpack.c.bf16 %v1081_v51, %v1078_v50  ;;  %8705 = vst [vmem:[#allocation13_spill] sm:$0xff] %v6910_v52 }
 0x23b   : > { %v1118_v53 = vpack.c.bf16 %v1073_v27, %v1070_v26  ;;  %5637 = vmatpush3.bf16.msra.mxu0 %v5964_v12  ;;  %v6898_v12 = vsel %vm926_vm6, 0.0, %v6427_v55  ;;  %v904_v26 = vpop.permute.xlu1 %903  ;;  %vm1443_vm6 = vcmask 1043456  }
 0x23c   : > { %5638 = vmatprep.subr.bf16.mxu0 %v5965_v9  ;;  %8704 = vst [vmem:[#allocation12_spill] sm:$0xff] %v6898_v12  ;;  %vm934_vm14 = vcmp.eq.s32.totalorder %v904_v26, %v6871_v28 }
 0x23d   : > { %v5590_v57 = vpop.f32.mrb[8].mxu0  ;;  %5602 = vmatprep.mubr.msk.bf16.mxu0 %vm1132_vm1, %v1118_v53  ;;  %v6962_v54 = vsel %vm934_vm14, 0.0, %v6427_v55 }
 0x23e   : > { %v1085_v59 = vpop.f32.mrb[9].mxu0  ;;  %5603 = vmatmul.mubr.msk.bf16.gmra.mrb[20].mxu0 %vm1132_vm1, %v1119_v44  ;;  %v1094_v13 = vadd.f32 %v5590_v57, %v5098_v0  ;;  %v907_v57 = vpop.permute.xlu0 %906  ;;  %8711 = vst [vmem:[#allocation19_spill] sm:$0xff] %v6962_v54 }
 0x23f   : > { %v5591_v60 = vpop.f32.mrb[10].mxu0  ;;  %5639 = vmatpush3.bf16.msra.mxu0 %v5965_v9  ;;  %v1086_v63 = vadd.f32 %v5098_v0, %v1085_v59  ;;  %vm935_vm13 = vcmp.eq.s32.totalorder %v907_v57, %v6871_v28 }
 0x240   : > { %v1097_v61 = vadd.f32 %v5591_v60, %v5098_v0  ;;  %v1088_v37 = vpop.f32.mrb[11].mxu0  ;;  %5640 = vmatprep.subr.bf16.mxu0 %v5966_v56  ;;  %v6966_v19 = vsel %vm935_vm13, 0.0, %v6427_v55 }
 0x241   : > { %v1089_v2 = vadd.f32 %v5098_v0, %v1088_v37  ;;  %8712 = vst [vmem:[#allocation20_spill] sm:$0xff] %v6966_v19 }
 0x242   : > { %v1121_v3 = vpack.c.bf16 %v1097_v61, %v1094_v13  ;;  %v6926_v13 = vsel %vm930_vm9, 0.0, %v6427_v55  ;;  %v6929_v61 = vsel %vm931_vm10, 0.0, %v6427_v55 }
 0x243   : > { %v1120_v4 = vpack.c.bf16 %v1089_v2, %v1086_v63  ;;  %5641 = vmatpush3.bf16.msra.mxu0 %v5966_v56  ;;  %v6920_v56 = vsel %vm929_vm8, 0.0, %v6427_v55  ;;  %8707 = vst [vmem:[#allocation15_spill] sm:$0xff] %v6926_v13  ;;  %8708 = vst [vmem:[#allocation16_spill] sm:$0xff] %v6929_v61 }
 0x244   : > { %8706 = vst [vmem:[#allocation14_spill] sm:$0xff] %v6920_v56 }
 0x245   : > { %v5594_v15 = vpop.f32.mrb[12].mxu0  ;;  %5606 = vmatprep.mubr.msk.bf16.mxu0 %vm1132_vm1, %v1120_v4  ;;  %v910_v4 = vpop.permute.xlu1 %909 }
 0x246   : > { %v1101_v47 = vpop.f32.mrb[13].mxu0  ;;  %5607 = vmatmul.mubr.msk.bf16.gmra.mrb[24].mxu0 %vm1132_vm1, %v1121_v3  ;;  %v1110_v7 = vadd.f32 %v5594_v15, %v5098_v0  ;;  %vm936_vm15 = vcmp.eq.s32.totalorder %v910_v4, %v6871_v28 }
 0x247   : > { %v5595_v6 = vpop.f32.mrb[14].mxu0  ;;  %5642 = vmatprep.mubr.msk.bf16.mxu0 %vm593_vm0, %v6733_v62  ;;  %v1102_v48 = vadd.f32 %v5098_v0, %v1101_v47  ;;  %v6944_v47 = vsel %vm932_vm11, 0.0, %v6427_v55  ;;  %v6985_v42 = vsel %vm936_vm15, 0.0, %v6427_v55 }
 0x248   : > { %v1113_v25 = vadd.f32 %v5595_v6, %v5098_v0  ;;  %v1104_v34 = vpop.f32.mrb[15].mxu0  ;;  %8709 = vst [vmem:[#allocation17_spill] sm:$0xff] %v6944_v47  ;;  %v913_v6 = vpop.permute.xlu0 %912  ;;  %8713 = vst [vmem:[#allocation21_spill] sm:$0xff] %v6985_v42 }
 0x249   : > { %v1105_v8 = vadd.f32 %v5098_v0, %v1104_v34  ;;  %v916_v21 = vpop.permute.xlu1 %915  ;;  %vm937_vm2 = vcmp.eq.s32.totalorder %v913_v6, %v6871_v28 }
 0x24a   : > { %v1123_v16 = vpack.c.bf16 %v1113_v25, %v1110_v7  ;;  %vm938_vm3 = vcmp.eq.s32.totalorder %v916_v21, %v6871_v28 }
 0x24b   : > { %v1122_v17 = vpack.c.bf16 %v1105_v8, %v1102_v48 }
 0x24d   : > { %5610 = vmatprep.mubr.msk.bf16.mxu1 %vm1132_vm1, %v1122_v17 }
 0x24e   : > { %5611 = vmatmul.mubr.msk.bf16.vlgmr.msra.gmra.mrb[0].mxu1 %vm1132_vm1, %v1123_v16  ;;  %5643 = vmatmul.mubr.msk.bf16.vlgmr.msra.gmra.mrb[28].mxu0 %vm593_vm0, %v6744_v20  ;;  %v6956_v16 = vsel %vm933_vm12, 0.0, %v6427_v55 }
 0x24f   : > { %5646 = vmatprep.mubr.msk.bf16.mxu0 %vm593_vm0, %v6755_v38  ;;  %8710 = vst [vmem:[#allocation18_spill] sm:$0xff] %v6956_v16 }
 0x256   : > { %5647 = vmatmul.mubr.msk.bf16.gmra.mrb[32].mxu0 %vm593_vm0, %v6765_v36 }
 0x257   : > { %5650 = vmatprep.mubr.msk.bf16.mxu0 %vm593_vm0, %v6775_v23 }
 0x25e   : > { %5651 = vmatmul.mubr.msk.bf16.gmra.mrb[36].mxu0 %vm593_vm0, %v6785_v35 }
 0x25f   : > { %5654 = vmatprep.mubr.msk.bf16.mxu0 %vm593_vm0, %v6794_v5 }
 0x266   : > { %5655 = vmatmul.mubr.msk.bf16.gmra.mrb[40].mxu0 %vm593_vm0, %v6801_v45 }
 0x309   : > { %v5600_v32 = vpop.f32.mrb[16].mxu0 }
 0x30a   : > { %v1191_v0 = vpop.f32.mrb[17].mxu0  ;;  %v6902_v24 = vadd.f32 %v5600_v32, %v6898_v12  ;;  %v919_v32 = vpop.permute.xlu0 %918 }
 0x30b   : > { %v6881_v33 = vadd.f32 %v1191_v0, %v6875_v31  ;;  %v5601_v14 = vpop.f32.mrb[18].mxu0  ;;  %vm939_vm4 = vcmp.eq.s32.totalorder %v919_v32, %v6871_v28 }
 0x30c   : > { %v1194_v41 = vpop.f32.mrb[19].mxu0  ;;  %v6890_v1 = vadd.f32 %v5601_v14, %v6887_v40  ;;  %v1261_v53 = vsel %vm1254_vm5, %v6902_v24, -inf }
 0x30d   : > { %v6893_v43 = vadd.f32 %v1194_v41, %v6884_v39  ;;  %v1255_v46 = vsel %vm1254_vm5, %v6881_v33, -inf  ;;  %v6982_v41 = vld [vmem:[%s8632_s8 + $0x1] ss:$0 sm:$0xff] }
 0x30e   : > { %1256 = vmax.xlane.f32.xlu1 %v1255_v46  ;;  %v1264_v51 = vsel %vm1254_vm5, %v6890_v1, -inf }
 0x30f   : > { %v1258_v49 = vsel %vm1254_vm5, %v6893_v43, -inf }
 0x310   : > { %1259 = vmax.xlane.f32.xlu0 %v1258_v49 }
 0x311   : > { %v5604_v50 = vpop.f32.mrb[20].mxu0 }
 0x312   : > { %v1207_v9 = vpop.f32.mrb[21].mxu0  ;;  %1265 = vmax.xlane.f32.xlu1 %v1264_v51  ;;  %v6933_v37 = vadd.f32 %v5604_v50, %v6926_v13 }
 0x313   : > { %v6915_v27 = vadd.f32 %v1207_v9, %v6910_v52  ;;  %v5605_v44 = vpop.f32.mrb[22].mxu0 }
 0x314   : > { %v1210_v59 = vpop.f32.mrb[23].mxu0  ;;  %1262 = vmax.xlane.f32.xlu0 %v1261_v53  ;;  %v6936_v63 = vadd.f32 %v5605_v44, %v6929_v61  ;;  %v1273_v48 = vsel %vm1254_vm5, %v6933_v37, -inf  ;;  %v6997_v44 = vsel %vm937_vm2, 0.0, %v6427_v55 }
 0x315   : > { %v6923_v60 = vadd.f32 %v1210_v59, %v6920_v56  ;;  %v1267_v2 = vsel %vm1254_vm5, %v6915_v27, -inf  ;;  %8714 = vst [vmem:[#allocation22_spill] sm:$0xff] %v6997_v44 }
 0x316   : > { %v1276_v8 = vsel %vm1254_vm5, %v6936_v63, -inf }
 0x317   : > { %v1270_v3 = vsel %vm1254_vm5, %v6923_v60, -inf }
 0x318   : > { %1268 = vmax.xlane.f32.xlu0 %v1267_v2  ;;  %1271 = vmax.xlane.f32.xlu1 %v1270_v3  ;;  %v7008_v3 = vsel %vm938_vm3, 0.0, %v6427_v55 }
 0x319   : > { %v5608_v15 = vpop.f32.mrb[24].mxu0  ;;  %8715 = vst [vmem:[#allocation23_spill] sm:$0xff] %v7008_v3 }
 0x31a   : > { %v1223_v7 = vpop.f32.mrb[25].mxu0  ;;  %v6969_v22 = vadd.f32 %v5608_v15, %v6962_v54 }
 0x31b   : > { %v6949_v25 = vadd.f32 %v1223_v7, %v6944_v47  ;;  %v5609_v34 = vpop.f32.mrb[26].mxu0  ;;  %v7022_v7 = vsel %vm939_vm4, 0.0, %v6427_v55 }
 0x31c   : > { %v1226_v17 = vpop.f32.mrb[27].mxu0  ;;  %1274 = vmax.xlane.f32.xlu0 %v1273_v48  ;;  %1277 = vmax.xlane.f32.xlu1 %v1276_v8  ;;  %v6972_v10 = vadd.f32 %v5609_v34, %v6966_v19  ;;  %v1285_v9 = vsel %vm1254_vm5, %v6969_v22, -inf  ;;  %8716 = vst [vmem:[#allocation24_spill] sm:$0xff] %v7022_v7 }
 0x31d   : > { %v6959_v18 = vadd.f32 %v1226_v17, %v6956_v16  ;;  %v1279_v29 = vsel %vm1254_vm5, %v6949_v25, -inf }
 0x31e   : > { %v1288_v26 = vsel %vm1254_vm5, %v6972_v10, -inf }
 0x31f   : > { %v1282_v30 = vsel %vm1254_vm5, %v6959_v18, -inf }
 0x320   : > { %1280 = vmax.xlane.f32.xlu0 %v1279_v29  ;;  %1283 = vmax.xlane.f32.xlu1 %v1282_v30 }
 0x321   : > { %v5612_v0 = vpop.f32.mrb[0].mxu1  ;;  %v5644_v14 = vpop.f32.mrb[28].mxu0 }
 0x322   : > { %v1239_v46 = vpop.f32.mrb[1].mxu1  ;;  %v1661_v58 = vpop.f32.mrb[29].mxu0  ;;  %v7000_v53 = vadd.f32 %v5644_v14, %v6982_v41  ;;  %v7025_v34 = vadd.f32 %v5612_v0, %v7008_v3  ;;  %v5967_v14 = vld [vmem:[%s8628_s4] sm:$0xff]  }
 0x323   : > { %v6990_v49 = vadd.f32 %v1239_v46, %v6985_v42  ;;  %v5613_v50 = vpop.f32.mrb[2].mxu1  ;;  %v5645_v51 = vpop.f32.mrb[30].mxu0  ;;  %v7011_v4 = vadd.f32 %v6982_v41, %v1661_v58  ;;  %5614 = vmatprep.subr.bf16.mxu1 %v5967_v14 }
 0x324   : > { %v7003_v57 = vadd.f32 %v5645_v51, %v6982_v41  ;;  %v1664_v59 = vpop.f32.mrb[31].mxu0  ;;  %1286 = vmax.xlane.f32.xlu0 %v1285_v9  ;;  %v1242_v2 = vpop.f32.mrb[3].mxu1  ;;  %1289 = vmax.xlane.f32.xlu1 %v1288_v26  ;;  %v7030_v8 = vadd.f32 %v5613_v50, %v7022_v7  ;;  %v1297_v32 = vsel %vm1254_vm5, %v7025_v34, -inf }
 0x325   : > { %v7014_v15 = vadd.f32 %v6982_v41, %v1664_v59  ;;  %v7017_v6 = vadd.f32 %v1242_v2, %v6997_v44  ;;  %v1291_v21 = vsel %vm1254_vm5, %v6990_v49, -inf  ;;  %5615 = vmatpush3.bf16.msra.mxu1 %v5967_v14  ;;  %v5968_v2 = vld [vmem:[%s8628_s4 + $0x8] ss:$0 sps:$4 sm:$0xff]  }
 0x326   : > { %v1300_v0 = vsel %vm1254_vm5, %v7030_v8, -inf  ;;  %5942 = vmatprep.subr.msk.bf16.mxu1 %vm1443_vm6, %v5968_v2 }
 0x327   : > { %v1294_v28 = vsel %vm1254_vm5, %v7017_v6, -inf }
 0x328   : > { %1292 = vmax.xlane.f32.xlu0 %v1291_v21  ;;  %1295 = vmax.xlane.f32.xlu1 %v1294_v28  ;;  %v1445_v28 = vsel %vm1443_vm6, %v5968_v2, 0 }
 0x329   : > { %v5648_v55 = vpop.f32.mrb[32].mxu0  ;;  %5617 = vmatpush3.bf16.msra.mxu1 %v1445_v28 }
 0x32a   : > { %v1677_v29 = vpop.f32.mrb[33].mxu0  ;;  %v7046_v46 = vadd.f32 %v5648_v55, %v6982_v41 }
 0x32b   : > { %v5649_v30 = vpop.f32.mrb[34].mxu0  ;;  %v7052_v51 = vadd.f32 %v6982_v41, %v1677_v29 }
 0x32c   : > { %v7049_v58 = vadd.f32 %v5649_v30, %v6982_v41  ;;  %v1680_v50 = vpop.f32.mrb[35].mxu0  ;;  %1298 = vmax.xlane.f32.xlu0 %v1297_v32  ;;  %1301 = vmax.xlane.f32.xlu1 %v1300_v0 }
 0x32d   : > { %v7055_v9 = vadd.f32 %v6982_v41, %v1680_v50 }
 0x331   : > { %v5652_v21 = vpop.f32.mrb[36].mxu0 }
 0x332   : > { %v1693_v55 = vpop.f32.mrb[37].mxu0  ;;  %v7067_v30 = vadd.f32 %v5652_v21, %v6982_v41  ;;  %v7085_v21 = vld [vmem:[%s8627_s3 + $0x8] sm:$0xff]  }
 0x333   : > { %v5653_v29 = vpop.f32.mrb[38].mxu0  ;;  %v7073_v14 = vadd.f32 %v6982_v41, %v1693_v55  ;;  %5658 = vmatprep.subr.bf16.mxu1 %v7085_v21 }
 0x334   : > { %v7070_v32 = vadd.f32 %v5653_v29, %v6982_v41  ;;  %v1696_v0 = vpop.f32.mrb[39].mxu0 }
 0x335   : > { %v7076_v50 = vadd.f32 %v6982_v41, %v1696_v0 }
 0x339   : > { %v5656_v28 = vpop.f32.mrb[40].mxu0 }
 0x33a   : > { %v1709_v29 = vpop.f32.mrb[41].mxu0  ;;  %v7089_v26 = vadd.f32 %v5656_v28, %v6982_v41 }
 0x33b   : > { %v5657_v55 = vpop.f32.mrb[42].mxu0  ;;  %v7095_v59 = vadd.f32 %v6982_v41, %v1709_v29 }
 0x33c   : > { %v7092_v0 = vadd.f32 %v5657_v55, %v6982_v41  ;;  %v1712_v11 = vpop.f32.mrb[43].mxu0 }
 0x33d   : > { %v7098_v2 = vadd.f32 %v6982_v41, %v1712_v11 }
 0x39b   : > { %v1257_v45 = vpop.xlane.xlu1 %1256 }
 0x39c   : > { %v1303_v28 = vsub.f32 %v6881_v33, %v1257_v45 }
 0x39d   : > { %v1260_v5 = vpop.xlane.xlu0 %1259 }
 0x39e   : > { %v1319_v35 = vmul.f32 1.442695, %v1303_v28  ;;  %v1304_v55 = vsub.f32 %v6893_v43, %v1260_v5 }
 0x39f   : > { %v1266_v23 = vpop.xlane.xlu1 %1265 }
 0x3a0   : > { %v1321_v36 = vmul.f32 1.442695, %v1304_v55  ;;  %v1306_v29 = vsub.f32 %v6890_v1, %v1266_v23  ;;  %6050 = vpow2.f32 %v1319_v35 }
 0x3a1   : > { %v1263_v11 = vpop.xlane.xlu0 %1262 }
 0x3a2   : > { %6052 = vpow2.f32 %v1321_v36  ;;  %v1325_v41 = vmul.f32 1.442695, %v1306_v29  ;;  %v1305_v48 = vsub.f32 %v6902_v24, %v1263_v11 }
 0x3a4   : > { %v1323_v38 = vmul.f32 1.442695, %v1305_v48  ;;  %6054 = vpow2.f32 %v1325_v41 }
 0x3a5   : > { %v1272_v17 = vpop.xlane.xlu1 %1271  ;;  %v1269_v20 = vpop.xlane.xlu0 %1268 }
 0x3a6   : > { %6056 = vpow2.f32 %v1323_v38  ;;  %v1308_v45 = vsub.f32 %v6923_v60, %v1272_v17  ;;  %v1307_v33 = vsub.f32 %v6915_v27, %v1269_v20 }
 0x3a8   : > { %v1329_v5 = vmul.f32 1.442695, %v1308_v45  ;;  %v1327_v43 = vmul.f32 1.442695, %v1307_v33 }
 0x3a9   : > { %v1278_v28 = vpop.xlane.xlu1 %1277  ;;  %v1275_v55 = vpop.xlane.xlu0 %1274 }
 0x3aa   : > { %6058 = vpow2.f32 %v1329_v5  ;;  %v1310_v23 = vsub.f32 %v6936_v63, %v1278_v28  ;;  %v1309_v36 = vsub.f32 %v6933_v37, %v1275_v55  ;;  %v7112_v35 = vpop.eup %6050 }
 0x3ab   : > { %6060 = vpow2.f32 %v1327_v43 }
 0x3ac   : > { %v7114_v1 = vpop.eup %6052  ;;  %v1333_v24 = vmul.f32 1.442695, %v1310_v23  ;;  %v1331_v38 = vmul.f32 1.442695, %v1309_v36 }
 0x3ad   : > { %v1284_v48 = vpop.xlane.xlu1 %1283  ;;  %v1281_v60 = vpop.xlane.xlu0 %1280  ;;  %v1399_v20 = vpack.c.bf16 %v7114_v1, %v7112_v35 }
 0x3ae   : > { %6062 = vpow2.f32 %v1333_v24  ;;  %v1312_v27 = vsub.f32 %v6959_v18, %v1284_v48  ;;  %v1311_v17 = vsub.f32 %v6949_v25, %v1281_v60  ;;  %v7120_v63 = vpop.eup %6054 }
 0x3af   : > { %6064 = vpow2.f32 %v1331_v38  ;;  %5618 = vmatprep.mubr.msk.bf16.mxu1 %vm1254_vm5, %v1399_v20 }
 0x3b0   : > { %v7123_v37 = vpop.eup %6056  ;;  %v1337_v29 = vmul.f32 1.442695, %v1312_v27  ;;  %v1335_v11 = vmul.f32 1.442695, %v1311_v17 }
 0x3b1   : > { %v1290_v41 = vpop.xlane.xlu1 %1289  ;;  %v1287_v45 = vpop.xlane.xlu0 %1286  ;;  %v1400_v33 = vpack.c.bf16 %v7120_v63, %v7123_v37 }
 0x3b2   : > { %6066 = vpow2.f32 %v1337_v29  ;;  %v1314_v5 = vsub.f32 %v6972_v10, %v1290_v41  ;;  %v1313_v18 = vsub.f32 %v6969_v22, %v1287_v45 }
 0x3b3   : > { %6068 = vpow2.f32 %v1335_v11  ;;  %5619 = vmatmul.mubr.msk.bf16.vlgmr.msra.gmra.mrb[4].mxu1 %vm1254_vm5, %v1400_v33 }
 0x3b4   : > { %v7130_v25 = vpop.eup %6058  ;;  %v1341_v43 = vmul.f32 1.442695, %v1314_v5  ;;  %v1339_v28 = vmul.f32 1.442695, %v1313_v18  ;;  %5659 = vmatpush3.bf16.msra.mxu1 %v7085_v21 }
 0x3b5   : > { %v7133_v55 = vpop.eup %6060  ;;  %v1296_v23 = vpop.xlane.xlu1 %1295 }
 0x3b6   : > { %v1293_v36 = vpop.xlane.xlu0 %1292  ;;  %6070 = vpow2.f32 %v1341_v43  ;;  %v1316_v24 = vsub.f32 %v7017_v6, %v1296_v23  ;;  %v1401_v22 = vpack.c.bf16 %v7130_v25, %v7133_v55 }
 0x3b7   : > { %v1315_v10 = vsub.f32 %v6990_v49, %v1293_v36  ;;  %6072 = vpow2.f32 %v1339_v28 }
 0x3b8   : > { %v7139_v38 = vpop.eup %6062  ;;  %v1345_v48 = vmul.f32 1.442695, %v1316_v24  ;;  %5622 = vmatprep.mubr.msk.bf16.mxu1 %vm1254_vm5, %v1401_v22  ;;  %v8718_v22 = vpack.c.bf16 %v7003_v57, %v7000_v53  ;;  %v8722_v53 = vpack.c.bf16 %v7070_v32, %v7067_v30  ;;  %v8723_v57 = vpack.c.bf16 %v7098_v2, %v7095_v59 }
 0x3b9   : > { %v1343_v60 = vmul.f32 1.442695, %v1315_v10  ;;  %v7142_v21 = vpop.eup %6064  ;;  %v1302_v20 = vpop.xlane.xlu1 %1301  ;;  %v8717_v10 = vpack.c.bf16 %v7014_v15, %v7011_v4  ;;  %v8721_v4 = vpack.c.bf16 %v7076_v50, %v7073_v14  ;;  %v8724_v15 = vpack.c.bf16 %v7092_v0, %v7089_v26 }
 0x3ba   : > { %v1299_v27 = vpop.xlane.xlu0 %1298  ;;  %6074 = vpow2.f32 %v1345_v48  ;;  %v1318_v17 = vsub.f32 %v7030_v8, %v1302_v20  ;;  %v1402_v49 = vpack.c.bf16 %v7139_v38, %v7142_v21  ;;  %v8719_v48 = vpack.c.bf16 %v7055_v9, %v7052_v51 }
 0x3bb   : > { %v1317_v6 = vsub.f32 %v7025_v34, %v1299_v27  ;;  %6076 = vpow2.f32 %v1343_v60  ;;  %v8720_v60 = vpack.c.bf16 %v7049_v58, %v7046_v46  ;;  %v5970_v46 = vld [vmem:[%s8628_s4 + $0xc] sm:$0xff]  }
 0x3bc   : > { %v7148_v29 = vpop.eup %6066  ;;  %v1349_v11 = vmul.f32 1.442695, %v1318_v17  ;;  %5623 = vmatmul.mubr.msk.bf16.gmra.mrb[8].mxu1 %vm1254_vm5, %v1402_v49  ;;  %5676 = vmatprep.subr.bf16.mxu0 %v5970_v46 }
 0x3bd   : > { %v1347_v41 = vmul.f32 1.442695, %v1317_v6  ;;  %v7151_v45 = vpop.eup %6068  ;;  %5677 = vmatpush3.bf16.msra.mxu0 %v5970_v46 }
 0x3be   : > { %6078 = vpow2.f32 %v1349_v11  ;;  %v1403_v33 = vpack.c.bf16 %v7148_v29, %v7151_v45 }
 0x3bf   : > { %6080 = vpow2.f32 %v1347_v41 }
 0x3c0   : > { %v7155_v8 = vpop.eup %6070  ;;  %5626 = vmatprep.mubr.msk.bf16.mxu1 %vm1254_vm5, %v1403_v33 }
 0x3c1   : > { %v7158_v34 = vpop.eup %6072 }
 0x3c2   : > { %v1404_v5 = vpack.c.bf16 %v7155_v8, %v7158_v34 }
 0x3c4   : > { %v7162_v18 = vpop.eup %6074  ;;  %5627 = vmatmul.mubr.msk.bf16.gmra.mrb[12].mxu1 %vm1254_vm5, %v1404_v5 }
 0x3c5   : > { %v7165_v43 = vpop.eup %6076 }
 0x3c6   : > { %v1405_v28 = vpack.c.bf16 %v7162_v18, %v7165_v43 }
 0x3c8   : > { %v7169_v23 = vpop.eup %6078  ;;  %5630 = vmatprep.mubr.msk.bf16.mxu1 %vm1254_vm5, %v1405_v28 }
 0x3c9   : > { %v7172_v36 = vpop.eup %6080 }
 0x3ca   : > { %v1406_v24 = vpack.c.bf16 %v7169_v23, %v7172_v36 }
 0x3cc   : > { %5631 = vmatmul.mubr.msk.bf16.gmra.mrb[16].mxu1 %vm1254_vm5, %v1406_v24 }
 0x3cd   : > { %5660 = vmatprep.mubr.msk.bf16.mxu1 %vm1132_vm1, %v8717_v10 }
 0x3d4   : > { %5661 = vmatmul.mubr.msk.bf16.vlgmr.msra.gmra.mrb[20].mxu1 %vm1132_vm1, %v8718_v22 }
 0x3d5   : > { %5664 = vmatprep.mubr.msk.bf16.mxu1 %vm1132_vm1, %v8719_v48 }
 0x3dc   : > { %5665 = vmatmul.mubr.msk.bf16.gmra.mrb[24].mxu1 %vm1132_vm1, %v8720_v60 }
 0x3dd   : > { %5668 = vmatprep.mubr.msk.bf16.mxu1 %vm1132_vm1, %v8721_v4 }
 0x3e4   : > { %5669 = vmatmul.mubr.msk.bf16.gmra.mrb[28].mxu1 %vm1132_vm1, %v8722_v53 }
 0x3e5   : > { %5672 = vmatprep.mubr.msk.bf16.mxu1 %vm1132_vm1, %v8723_v57 }
 0x3ec   : > { %5673 = vmatmul.mubr.msk.bf16.gmra.mrb[32].mxu1 %vm1132_vm1, %v8724_v15 }
 0x486   : > { %v7212_v58 = vpop.f32.mrb[4].mxu1 }
 0x487   : > { %v7214_v51 = vpop.f32.mrb[5].mxu1 }
 0x488   : > { %v7216_v9 = vpop.f32.mrb[6].mxu1 }
 0x489   : > { %v7218_v59 = vpop.f32.mrb[7].mxu1 }
 0x48f   : > { %v7220_v30 = vpop.f32.mrb[8].mxu1 }
 0x490   : > { %v7222_v32 = vpop.f32.mrb[9].mxu1 }
 0x491   : > { %v7224_v26 = vpop.f32.mrb[10].mxu1 }
 0x492   : > { %v7226_v14 = vpop.f32.mrb[11].mxu1 }
 0x497   : > { %v7228_v50 = vpop.f32.mrb[12].mxu1 }
 0x498   : > { %v7230_v2 = vpop.f32.mrb[13].mxu1 }
 0x499   : > { %v7232_v0 = vpop.f32.mrb[14].mxu1 }
 0x49a   : > { %v7234_v20 = vpop.f32.mrb[15].mxu1 }
 0x49f   : > { %v7236_v27 = vpop.f32.mrb[16].mxu1 }
 0x4a0   : > { %v7238_v17 = vpop.f32.mrb[17].mxu1 }
 0x4a1   : > { %v7240_v6 = vpop.f32.mrb[18].mxu1 }
 0x4a2   : > { %v7242_v49 = vpop.f32.mrb[19].mxu1 }
 0x4a7   : > { %v5662_v11 = vpop.f32.mrb[20].mxu1 }
 0x4a8   : > { %v1799_v41 = vpop.f32.mrb[21].mxu1  ;;  %v7248_v24 = vadd.f32 %v5662_v11, %v6898_v12 }
 0x4a9   : > { %v7245_v33 = vadd.f32 %v1799_v41, %v6875_v31  ;;  %v5663_v5 = vpop.f32.mrb[22].mxu1 }
 0x4aa   : > { %v1802_v28 = vpop.f32.mrb[23].mxu1  ;;  %v7256_v48 = vadd.f32 %v5663_v5, %v6887_v40  ;;  %v1868_v53 = vsel %vm1254_vm5, %v7248_v24, -inf }
 0x4ab   : > { %v7251_v10 = vadd.f32 %v1802_v28, %v6884_v39  ;;  %v1862_v22 = vsel %vm1254_vm5, %v7245_v33, -inf }
 0x4ac   : > { %1863 = vmax.xlane.f32.xlu0 %v1862_v22  ;;  %v1871_v11 = vsel %vm1254_vm5, %v7256_v48, -inf }
 0x4ad   : > { %v1865_v60 = vsel %vm1254_vm5, %v7251_v10, -inf }
 0x4ae   : > { %1866 = vmax.xlane.f32.xlu1 %v1865_v60 }
 0x4af   : > { %v5666_v4 = vpop.f32.mrb[24].mxu1 }
 0x4b0   : > { %v1815_v57 = vpop.f32.mrb[25].mxu1  ;;  %1869 = vmax.xlane.f32.xlu0 %v1868_v53  ;;  %v7268_v5 = vadd.f32 %v5666_v4, %v6926_v13 }
 0x4b1   : > { %v7263_v15 = vadd.f32 %v1815_v57, %v6910_v52  ;;  %v5667_v46 = vpop.f32.mrb[26].mxu1 }
 0x4b2   : > { %v1818_v41 = vpop.f32.mrb[27].mxu1  ;;  %1872 = vmax.xlane.f32.xlu1 %v1871_v11  ;;  %v7276_v60 = vadd.f32 %v5667_v46, %v6929_v61  ;;  %v1880_v11 = vsel %vm1254_vm5, %v7268_v5, -inf }
 0x4b3   : > { %v7271_v28 = vadd.f32 %v1818_v41, %v6920_v56  ;;  %v1874_v22 = vsel %vm1254_vm5, %v7263_v15, -inf }
 0x4b4   : > { %1875 = vmax.xlane.f32.xlu0 %v1874_v22  ;;  %v1883_v22 = vsel %vm1254_vm5, %v7276_v60, -inf }
 0x4b5   : > { %v1877_v53 = vsel %vm1254_vm5, %v7271_v28, -inf }
 0x4b6   : > { %1878 = vmax.xlane.f32.xlu1 %v1877_v53 }
 0x4b7   : > { %v5670_v57 = vpop.f32.mrb[28].mxu1 }
 0x4b8   : > { %v1831_v4 = vpop.f32.mrb[29].mxu1  ;;  %1881 = vmax.xlane.f32.xlu0 %v1880_v11  ;;  %v7288_v46 = vadd.f32 %v5670_v57, %v6962_v54 }
 0x4b9   : > { %v7283_v41 = vadd.f32 %v1831_v4, %v6944_v47  ;;  %v5671_v56 = vpop.f32.mrb[30].mxu1 }
 0x4ba   : > { %v1834_v13 = vpop.f32.mrb[31].mxu1  ;;  %1884 = vmax.xlane.f32.xlu1 %v1883_v22  ;;  %v7296_v11 = vadd.f32 %v5671_v56, %v6966_v19  ;;  %v1892_v22 = vsel %vm1254_vm5, %v7288_v46, -inf }
 0x4bb   : > { %v7291_v53 = vadd.f32 %v1834_v13, %v6956_v16  ;;  %v1886_v61 = vsel %vm1254_vm5, %v7283_v41, -inf }
 0x4bc   : > { %1887 = vmax.xlane.f32.xlu0 %v1886_v61  ;;  %v1895_v61 = vsel %vm1254_vm5, %v7296_v11, -inf }
 0x4bd   : > { %v1889_v4 = vsel %vm1254_vm5, %v7291_v53, -inf }
 0x4be   : > { %1890 = vmax.xlane.f32.xlu1 %v1889_v4 }
 0x4bf   : > { %v5674_v47 = vpop.f32.mrb[32].mxu1 }
 0x4c0   : > { %v1847_v57 = vpop.f32.mrb[33].mxu1  ;;  %1893 = vmax.xlane.f32.xlu0 %v1892_v22  ;;  %v7308_v56 = vadd.f32 %v5674_v47, %v7008_v3 }
 0x4c1   : > { %v7303_v13 = vadd.f32 %v1847_v57, %v6985_v42  ;;  %v5675_v16 = vpop.f32.mrb[34].mxu1 }
 0x4c2   : > { %v1850_v54 = vpop.f32.mrb[35].mxu1  ;;  %1896 = vmax.xlane.f32.xlu1 %v1895_v61  ;;  %v7316_v22 = vadd.f32 %v5675_v16, %v7022_v7  ;;  %v1904_v61 = vsel %vm1254_vm5, %v7308_v56, -inf }
 0x4c3   : > { %v7311_v4 = vadd.f32 %v1850_v54, %v6997_v44  ;;  %v1898_v19 = vsel %vm1254_vm5, %v7303_v13, -inf  ;;  %v5971_v54 = vld [vmem:[%s8628_s4 + $0x14] ss:$0 sps:$4 sm:$0xff]  }
 0x4c4   : > { %1899 = vmax.xlane.f32.xlu0 %v1898_v19  ;;  %v1907_v47 = vsel %vm1254_vm5, %v7316_v22, -inf  ;;  %5943 = vmatprep.subr.msk.bf16.mxu0 %vm1443_vm6, %v5971_v54  ;;  %v2052_v16 = vsel %vm1443_vm6, %v5971_v54, 0  ;;  %v7332_v19 = vld [vmem:[%s8631_s7 + $0x40] sm:$0xff]  }
 0x4c5   : > { %v1901_v57 = vsel %vm1254_vm5, %v7311_v4, -inf  ;;  %5679 = vmatpush3.bf16.msra.mxu0 %v2052_v16 }
 0x4c6   : > { %1902 = vmax.xlane.f32.xlu1 %v1901_v57  ;;  %5732 = vmatprep.subr.bf16.mxu0 %v7332_v19 }
 0x4c8   : > { %1905 = vmax.xlane.f32.xlu0 %v1904_v61 }
 0x4ca   : > { %1908 = vmax.xlane.f32.xlu1 %v1907_v47 }
 0x539   : > { %v1864_v57 = vpop.xlane.xlu0 %1863 }
 0x53a   : > { %v1910_v61 = vsub.f32 %v7245_v33, %v1864_v57 }
 0x53b   : > { %v1867_v47 = vpop.xlane.xlu1 %1866 }
 0x53c   : > { %v1926_v7 = vmul.f32 1.442695, %v1910_v61  ;;  %v1911_v44 = vsub.f32 %v7251_v10, %v1867_v47 }
 0x53d   : > { %v1870_v3 = vpop.xlane.xlu0 %1869 }
 0x53e   : > { %v1928_v42 = vmul.f32 1.442695, %v1911_v44  ;;  %v1912_v52 = vsub.f32 %v7248_v24, %v1870_v3  ;;  %6082 = vpow2.f32 %v1926_v7 }
 0x53f   : > { %v1873_v54 = vpop.xlane.xlu1 %1872 }
 0x540   : > { %6084 = vpow2.f32 %v1928_v42  ;;  %v1930_v16 = vmul.f32 1.442695, %v1912_v52  ;;  %v1913_v40 = vsub.f32 %v7256_v48, %v1873_v54 }
 0x541   : > { %v1876_v39 = vpop.xlane.xlu0 %1875 }
 0x542   : > { %6086 = vpow2.f32 %v1930_v16  ;;  %v1932_v12 = vmul.f32 1.442695, %v1913_v40  ;;  %v1914_v31 = vsub.f32 %v7263_v15, %v1876_v39 }
 0x543   : > { %v1879_v33 = vpop.xlane.xlu1 %1878 }
 0x544   : > { %6088 = vpow2.f32 %v1932_v12  ;;  %v1934_v57 = vmul.f32 1.442695, %v1914_v31  ;;  %v1915_v10 = vsub.f32 %v7271_v28, %v1879_v33 }
 0x545   : > { %v1882_v61 = vpop.xlane.xlu0 %1881 }
 0x546   : > { %v1936_v44 = vmul.f32 1.442695, %v1915_v10  ;;  %v1916_v3 = vsub.f32 %v7268_v5, %v1882_v61  ;;  %6090 = vpow2.f32 %v1934_v57 }
 0x547   : > { %v1885_v7 = vpop.xlane.xlu1 %1884 }
 0x548   : > { %6092 = vpow2.f32 %v1936_v44  ;;  %v1938_v52 = vmul.f32 1.442695, %v1916_v3  ;;  %v1917_v42 = vsub.f32 %v7276_v60, %v1885_v7  ;;  %v6083_v24 = vpop.eup %6082  ;;  %v5973_v44 = vld [vmem:[%s8631_s7 + $0x48] sm:$0xff]  }
 0x549   : > { %v1888_v48 = vpop.xlane.xlu0 %1887 }
 0x54a   : > { %v6085_v40 = vpop.eup %6084  ;;  %6094 = vpow2.f32 %v1938_v52  ;;  %v1940_v39 = vmul.f32 1.442695, %v1917_v42  ;;  %v1918_v12 = vsub.f32 %v7283_v41, %v1888_v48 }
 0x54b   : > { %v1891_v31 = vpop.xlane.xlu1 %1890  ;;  %v2006_v15 = vpack.c.bf16 %v6085_v40, %v6083_v24 }
 0x54c   : > { %v6087_v28 = vpop.eup %6086  ;;  %6096 = vpow2.f32 %v1940_v39  ;;  %v1942_v47 = vmul.f32 1.442695, %v1918_v12  ;;  %v1919_v5 = vsub.f32 %v7291_v53, %v1891_v31  ;;  %v1961_v31 = vsel %vm1254_vm5, %v6085_v40, 0.0 }
 0x54d   : > { %5680 = vmatprep.mubr.msk.bf16.mxu0 %vm1254_vm5, %v2006_v15  ;;  %v1894_v54 = vpop.xlane.xlu0 %1893  ;;  %v1964_v16 = vsel %vm1254_vm5, %v6087_v28, 0.0 }
 0x54e   : > { %v6089_v60 = vpop.eup %6088  ;;  %v1944_v33 = vmul.f32 1.442695, %v1919_v5  ;;  %v1920_v57 = vsub.f32 %v7288_v46, %v1894_v54  ;;  %1965 = vadd.xlane.f32.xlu0 %v1964_v16  ;;  %6098 = vpow2.f32 %v1942_v47  ;;  %v1958_v46 = vsel %vm1254_vm5, %v6083_v24, 0.0 }
 0x54f   : > { %v2007_v10 = vpack.c.bf16 %v6089_v60, %v6087_v28  ;;  %v1897_v41 = vpop.xlane.xlu1 %1896  ;;  %v1967_v61 = vsel %vm1254_vm5, %v6089_v60, 0.0 }
 0x550   : > { %6100 = vpow2.f32 %v1944_v33  ;;  %v1946_v53 = vmul.f32 1.442695, %v1920_v57  ;;  %v1921_v3 = vsub.f32 %v7296_v11, %v1897_v41  ;;  %1968 = vadd.xlane.f32.xlu1 %v1967_v61  ;;  %v6091_v7 = vpop.eup %6090  ;;  %v5974_v11 = vld [vmem:[%s8631_s7 + $0x50] sm:$0xff]  }
 0x551   : > { %5681 = vmatmul.mubr.msk.bf16.vlgmr.msra.gmra.mrb[44].mxu0 %vm1254_vm5, %v2007_v10  ;;  %v1900_v52 = vpop.xlane.xlu0 %1899 }
 0x552   : > { %v6093_v42 = vpop.eup %6092  ;;  %6102 = vpow2.f32 %v1946_v53  ;;  %v1948_v48 = vmul.f32 1.442695, %v1921_v3  ;;  %5733 = vmatpush3.bf16.msra.mxu0 %v7332_v19  ;;  %v1922_v39 = vsub.f32 %v7303_v13, %v1900_v52  ;;  %1959 = vadd.xlane.f32.xlu0 %v1958_v46 }
 0x553   : > { %v1903_v12 = vpop.xlane.xlu1 %1902  ;;  %v2008_v15 = vpack.c.bf16 %v6093_v42, %v6091_v7  ;;  %5734 = vmatprep.subr.bf16.mxu0 %v5973_v44  ;;  %v1973_v53 = vsel %vm1254_vm5, %v6093_v42, 0.0 }
 0x554   : > { %v6095_v28 = vpop.eup %6094  ;;  %6104 = vpow2.f32 %v1948_v48  ;;  %v1950_v24 = vmul.f32 1.442695, %v1922_v39  ;;  %v1923_v47 = vsub.f32 %v7311_v4, %v1903_v12  ;;  %1962 = vadd.xlane.f32.xlu1 %v1961_v31  ;;  %v5975_v4 = vld [vmem:[%s8631_s7 + $0x58] sm:$0xff]  }
 0x555   : > { %5684 = vmatprep.mubr.msk.bf16.mxu0 %vm1254_vm5, %v2008_v15  ;;  %v1906_v19 = vpop.xlane.xlu0 %1905  ;;  %v1976_v13 = vsel %vm1254_vm5, %v6095_v28, 0.0 }
 0x556   : > { %v6097_v5 = vpop.eup %6096  ;;  %v1952_v54 = vmul.f32 1.442695, %v1923_v47  ;;  %v1924_v40 = vsub.f32 %v7308_v56, %v1906_v19  ;;  %1977 = vadd.xlane.f32.xlu0 %v1976_v13  ;;  %5735 = vmatpush3.bf16.msra.mxu0 %v5973_v44  ;;  %6106 = vpow2.f32 %v1950_v24  ;;  %v1970_v56 = vsel %vm1254_vm5, %v6091_v7, 0.0 }
 0x557   : > { %v1909_v16 = vpop.xlane.xlu1 %1908  ;;  %v1979_v60 = vsel %vm1254_vm5, %v6097_v5, 0.0  ;;  %v2009_v33 = vpack.c.bf16 %v6097_v5, %v6095_v28  ;;  %5736 = vmatprep.subr.bf16.mxu0 %v5974_v11 }
 0x558   : > { %6108 = vpow2.f32 %v1952_v54  ;;  %v1954_v57 = vmul.f32 1.442695, %v1924_v40  ;;  %v1925_v10 = vsub.f32 %v7316_v22, %v1909_v16  ;;  %1980 = vadd.xlane.f32.xlu1 %v1979_v60  ;;  %v6099_v41 = vpop.eup %6098  ;;  %v1351_v54 = vsel %vm1254_vm5, %v7112_v35, 0.0  ;;  %v8725_v16 = vld [vmem:[#allocation2_spill] sm:$0xff] }
 0x559   : > { %5685 = vmatmul.mubr.msk.bf16.gmra.mrb[48].mxu0 %vm1254_vm5, %v2009_v33  ;;  %v1982_v42 = vsel %vm1254_vm5, %v6099_v41, 0.0  ;;  %v1354_v40 = vsel %vm1254_vm5, %v7114_v1, 0.0  ;;  %v1357_v60 = vsel %vm1254_vm5, %v7123_v37, 0.0  ;;  %v8726_v33 = vld [vmem:[#allocation3_spill] sm:$0xff]  ;;  %v1363_v35 = vsel %vm1254_vm5, %v7133_v55, 0.0 }
 0x55a   : > { %v6101_v61 = vpop.eup %6100  ;;  %6110 = vpow2.f32 %v1954_v57  ;;  %v1956_v44 = vmul.f32 1.442695, %v1925_v10  ;;  %1971 = vadd.xlane.f32.xlu0 %v1970_v56  ;;  %5737 = vmatpush3.bf16.msra.mxu0 %v5974_v11  ;;  %v1366_v1 = vsel %vm1254_vm5, %v7130_v25, 0.0  ;;  %v8727_v57 = vld [vmem:[#allocation4_spill] sm:$0xff]  ;;  %v1369_v37 = vsel %vm1254_vm5, %v7142_v21, 0.0  ;;  %v8728_v10 = vld [vmem:[#allocation5_spill] sm:$0xff] }
 0x55b   : > { %v2010_v3 = vpack.c.bf16 %v6101_v61, %v6099_v41  ;;  %5738 = vmatprep.subr.bf16.mxu0 %v5975_v4  ;;  %v1985_v31 = vsel %vm1254_vm5, %v6101_v61, 0.0  ;;  %v1375_v55 = vsel %vm1254_vm5, %v7151_v45, 0.0  ;;  %v1378_v25 = vsel %vm1254_vm5, %v7148_v29, 0.0  ;;  %v8729_v41 = vld [vmem:[#allocation6_spill] sm:$0xff]  ;;  %v8730_v56 = vld [vmem:[#allocation7_spill] sm:$0xff]  ;;  %v8731_v61 = vld [vmem:[#allocation8_spill] sm:$0xff] }
 0x55c   : > { %v6103_v52 = vpop.eup %6102  ;;  %6112 = vpow2.f32 %v1956_v44  ;;  %1974 = vadd.xlane.f32.xlu1 %v1973_v53  ;;  %v1381_v21 = vsel %vm1254_vm5, %v7158_v34, 0.0  ;;  %v1387_v45 = vsel %vm1254_vm5, %v7165_v43, 0.0  ;;  %v1390_v29 = vsel %vm1254_vm5, %v7162_v18, 0.0  ;;  %v5977_v18 = vld [vmem:[%s8627_s3 + $0x10] sm:$0xff]   ;;  %v7442_v43 = vld [vmem:[%s8633_s9] sm:$0xff]  }
 0x55d   : > { %5688 = vmatprep.mubr.msk.bf16.mxu0 %vm1254_vm5, %v2010_v3  ;;  %v1988_v22 = vsel %vm1254_vm5, %v6103_v52, 0.0  ;;  %v1393_v34 = vsel %vm1254_vm5, %v7172_v36, 0.0  ;;  %v1396_v44 = vsel %vm1254_vm5, %v7169_v23, 0.0  ;;  %v7448_v23 = vld [vmem:[%s8631_s7 + $0x60] sm:$0xff]  }
 0x55e   : > { %v6105_v46 = vpop.eup %6104  ;;  %1989 = vadd.xlane.f32.xlu0 %v1988_v22  ;;  %5739 = vmatpush3.bf16.msra.mxu0 %v5975_v4  ;;  %v1360_v4 = vsel %vm1254_vm5, %v7120_v63, 0.0  ;;  %v1372_v63 = vsel %vm1254_vm5, %v7139_v38, 0.0  ;;  %v1384_v38 = vsel %vm1254_vm5, %v7155_v8, 0.0  ;;  %v5976_v8 = vld [vmem:[%s8633_s9 + $0x8] sm:$0xff]  }
 0x55f   : > { %v1991_v7 = vsel %vm1254_vm5, %v6105_v46, 0.0  ;;  %v2011_v48 = vpack.c.bf16 %v6105_v46, %v6103_v52  ;;  %5696 = vmatprep.subr.bf16.mxu1 %v5976_v8  ;;  %5756 = vmatprep.subr.bf16.mxu0 %v5977_v18 }
 0x560   : > { %1992 = vadd.xlane.f32.xlu1 %v1991_v7  ;;  %v6107_v39 = vpop.eup %6106  ;;  %5697 = vmatpush3.bf16.msra.mxu1 %v5976_v8 }
 0x561   : > { %5689 = vmatmul.mubr.msk.bf16.gmra.mrb[52].mxu0 %vm1254_vm5, %v2011_v48  ;;  %v1994_v13 = vsel %vm1254_vm5, %v6107_v39, 0.0  ;;  %5714 = vmatprep.subr.bf16.mxu1 %v7442_v43 }
 0x562   : > { %v6109_v12 = vpop.eup %6108  ;;  %1983 = vadd.xlane.f32.xlu0 %v1982_v42 }
 0x563   : > { %v2012_v15 = vpack.c.bf16 %v6109_v12, %v6107_v39  ;;  %v1997_v5 = vsel %vm1254_vm5, %v6109_v12, 0.0 }
 0x564   : > { %v6111_v11 = vpop.eup %6110  ;;  %1986 = vadd.xlane.f32.xlu1 %v1985_v31 }
 0x565   : > { %5692 = vmatprep.mubr.msk.bf16.mxu0 %vm1254_vm5, %v2012_v15  ;;  %v2000_v28 = vsel %vm1254_vm5, %v6111_v11, 0.0 }
 0x566   : > { %v6113_v24 = vpop.eup %6112  ;;  %2001 = vadd.xlane.f32.xlu0 %v2000_v28 }
 0x567   : > { %v2003_v47 = vsel %vm1254_vm5, %v6113_v24, 0.0  ;;  %v2013_v19 = vpack.c.bf16 %v6113_v24, %v6111_v11 }
 0x568   : > { %2004 = vadd.xlane.f32.xlu1 %v2003_v47 }
 0x569   : > { %5693 = vmatmul.mubr.msk.bf16.gmra.mrb[56].mxu0 %vm1254_vm5, %v2013_v19 }
 0x56a   : > { %5740 = vmatprep.mubr.msk.bf16.mxu0 %vm593_vm0, %v6733_v62  ;;  %1995 = vadd.xlane.f32.xlu0 %v1994_v13 }
 0x56c   : > { %1998 = vadd.xlane.f32.xlu1 %v1997_v5 }
 0x56e   : > { %1352 = vadd.xlane.f32.xlu0 %v1351_v54 }
 0x570   : > { %1355 = vadd.xlane.f32.xlu1 %v1354_v40 }
 0x571   : > { %5741 = vmatmul.mubr.msk.bf16.vlgmr.msra.gmra.mrb[60].mxu0 %vm593_vm0, %v8725_v16 }
 0x572   : > { %5744 = vmatprep.mubr.msk.bf16.mxu0 %vm593_vm0, %v8726_v33  ;;  %1358 = vadd.xlane.f32.xlu0 %v1357_v60 }
 0x573   : > { %5757 = vmatpush3.bf16.msra.mxu0 %v5977_v18 }
 0x574   : > { %1361 = vadd.xlane.f32.xlu1 %v1360_v4  ;;  %5812 = vmatprep.subr.bf16.mxu0 %v7448_v23 }
 0x576   : > { %1364 = vadd.xlane.f32.xlu0 %v1363_v35 }
 0x578   : > { %1367 = vadd.xlane.f32.xlu1 %v1366_v1 }
 0x579   : > { %5745 = vmatmul.mubr.msk.bf16.gmra.mrb[64].mxu0 %vm593_vm0, %v8727_v57 }
 0x57a   : > { %5748 = vmatprep.mubr.msk.bf16.mxu0 %vm593_vm0, %v8728_v10  ;;  %1370 = vadd.xlane.f32.xlu0 %v1369_v37 }
 0x57c   : > { %1373 = vadd.xlane.f32.xlu1 %v1372_v63 }
 0x57e   : > { %1376 = vadd.xlane.f32.xlu0 %v1375_v55 }
 0x580   : > { %1379 = vadd.xlane.f32.xlu1 %v1378_v25 }
 0x581   : > { %5749 = vmatmul.mubr.msk.bf16.gmra.mrb[68].mxu0 %vm593_vm0, %v8729_v41 }
 0x582   : > { %5752 = vmatprep.mubr.msk.bf16.mxu0 %vm593_vm0, %v8730_v56  ;;  %1382 = vadd.xlane.f32.xlu0 %v1381_v21 }
 0x584   : > { %1385 = vadd.xlane.f32.xlu1 %v1384_v38 }
 0x586   : > { %1388 = vadd.xlane.f32.xlu0 %v1387_v45 }
 0x588   : > { %1391 = vadd.xlane.f32.xlu1 %v1390_v29 }
 0x589   : > { %5753 = vmatmul.mubr.msk.bf16.gmra.mrb[72].mxu0 %vm593_vm0, %v8731_v61 }
 0x58a   : > { %1394 = vadd.xlane.f32.xlu0 %v1393_v34 }
 0x58c   : > { %1397 = vadd.xlane.f32.xlu1 %v1396_v44 }
 0x5db   : > { %v7451_v36 = vpop.xlane.xlu0 %1965 }
 0x5dd   : > { %v7453_v53 = vpop.xlane.xlu1 %1968 }
 0x5df   : > { %v7455_v3 = vpop.xlane.xlu0 %1959 }
 0x5e1   : > { %v7457_v52 = vpop.xlane.xlu1 %1962 }
 0x5e3   : > { %v7459_v22 = vpop.xlane.xlu0 %1977 }
 0x5e5   : > { %v7461_v46 = vpop.xlane.xlu1 %1980 }
 0x5e7   : > { %v7463_v7 = vpop.xlane.xlu0 %1971 }
 0x5e9   : > { %v7465_v48 = vpop.xlane.xlu1 %1974 }
 0x5eb   : > { %v7467_v39 = vpop.xlane.xlu0 %1989 }
 0x5ed   : > { %v7469_v42 = vpop.xlane.xlu1 %1992 }
 0x5ef   : > { %v7471_v12 = vpop.xlane.xlu0 %1983 }
 0x5f1   : > { %v7473_v31 = vpop.xlane.xlu1 %1986 }
 0x5f3   : > { %v7475_v15 = vpop.xlane.xlu0 %2001 }
 0x5f5   : > { %v7477_v11 = vpop.xlane.xlu1 %2004 }
 0x5f7   : > { %v7479_v28 = vpop.xlane.xlu0 %1995 }
 0x5f9   : > { %v7481_v24 = vpop.xlane.xlu1 %1998 }
 0x5fb   : > { %v1353_v47 = vpop.xlane.xlu0 %1352 }
 0x5fc   : > { %6114 = vrcp.f32 %v1353_v47 }
 0x5fd   : > { %v1356_v19 = vpop.xlane.xlu1 %1355 }
 0x5fe   : > { %6116 = vrcp.f32 %v1356_v19 }
 0x5ff   : > { %v1359_v13 = vpop.xlane.xlu0 %1358 }
 0x600   : > { %6118 = vrcp.f32 %v1359_v13 }
 0x601   : > { %v1362_v5 = vpop.xlane.xlu1 %1361 }
 0x602   : > { %6120 = vrcp.f32 %v1362_v5 }
 0x603   : > { %v1365_v54 = vpop.xlane.xlu0 %1364 }
 0x604   : > { %6122 = vrcp.f32 %v1365_v54 }
 0x605   : > { %v1368_v40 = vpop.xlane.xlu1 %1367 }
 0x606   : > { %v6115_v60 = vpop.eup %6114  ;;  %6124 = vrcp.f32 %v1368_v40 }
 0x607   : > { %v1371_v4 = vpop.xlane.xlu0 %1370  ;;  %v7484_v37 = vmul.f32 %v6115_v60, %v7214_v51 }
 0x608   : > { %v6117_v35 = vpop.eup %6116  ;;  %6126 = vrcp.f32 %v1371_v4 }
 0x609   : > { %v1374_v1 = vpop.xlane.xlu1 %1373  ;;  %v7487_v63 = vmul.f32 %v6117_v35, %v7218_v59 }
 0x60a   : > { %v6119_v55 = vpop.eup %6118  ;;  %6128 = vrcp.f32 %v1374_v1 }
 0x60b   : > { %v1377_v25 = vpop.xlane.xlu0 %1376  ;;  %v1576_v21 = vpack.c.bf16 %v7487_v63, %v7484_v37  ;;  %v7492_v45 = vmul.f32 %v6119_v55, %v7212_v58 }
 0x60c   : > { %v6121_v38 = vpop.eup %6120  ;;  %6130 = vrcp.f32 %v1377_v25 }
 0x60d   : > { %v7495_v29 = vmul.f32 %v6121_v38, %v7216_v9  ;;  %v1380_v34 = vpop.xlane.xlu1 %1379 }
 0x60e   : > { %v6123_v51 = vpop.eup %6122  ;;  %6132 = vrcp.f32 %v1380_v34 }
 0x60f   : > { %v1577_v59 = vpack.c.bf16 %v7495_v29, %v7492_v45  ;;  %v1383_v44 = vpop.xlane.xlu0 %1382  ;;  %v7500_v47 = vmul.f32 %v6123_v51, %v7222_v32  ;;  %v5981_v45 = vld [vmem:[%s8631_s7 + $0x70] sm:$0xff]  }
 0x610   : > { %v6125_v8 = vpop.eup %6124  ;;  %6134 = vrcp.f32 %v1383_v44 }
 0x611   : > { %v1386_v18 = vpop.xlane.xlu1 %1385  ;;  %v7503_v19 = vmul.f32 %v6125_v8, %v7226_v14 }
 0x612   : > { %v6127_v58 = vpop.eup %6126  ;;  %6136 = vrcp.f32 %v1386_v18 }
 0x613   : > { %v1389_v9 = vpop.xlane.xlu0 %1388  ;;  %v1578_v13 = vpack.c.bf16 %v7503_v19, %v7500_v47  ;;  %v7508_v40 = vmul.f32 %v6127_v58, %v7220_v30 }
 0x614   : > { %v6129_v5 = vpop.eup %6128  ;;  %6138 = vrcp.f32 %v1389_v9 }
 0x615   : > { %v1392_v54 = vpop.xlane.xlu1 %1391  ;;  %v7511_v60 = vmul.f32 %v6129_v5, %v7224_v26 }
 0x616   : > { %v6131_v32 = vpop.eup %6130  ;;  %6140 = vrcp.f32 %v1392_v54 }
 0x617   : > { %v1395_v4 = vpop.xlane.xlu0 %1394  ;;  %v1579_v14 = vpack.c.bf16 %v7511_v60, %v7508_v40  ;;  %v7517_v55 = vmul.f32 %v6131_v32, %v7230_v2 }
 0x618   : > { %v6133_v35 = vpop.eup %6132  ;;  %6142 = vrcp.f32 %v1395_v4 }
 0x619   : > { %6144 = vrcp.f32 %v7451_v36  ;;  %v1398_v1 = vpop.xlane.xlu1 %1397  ;;  %v7520_v30 = vmul.f32 %v6133_v35, %v7234_v20 }
 0x61a   : > { %v6135_v25 = vpop.eup %6134  ;;  %6146 = vrcp.f32 %v1398_v1 }
 0x61b   : > { %6148 = vrcp.f32 %v7453_v53  ;;  %v1580_v26 = vpack.c.bf16 %v7520_v30, %v7517_v55  ;;  %v7528_v36 = vmul.f32 %v6135_v25, %v7228_v50 }
 0x61c   : > { %v6137_v38 = vpop.eup %6136  ;;  %6150 = vrcp.f32 %v7455_v3 }
 0x61d   : > { %6152 = vrcp.f32 %v7457_v52  ;;  %v7531_v2 = vmul.f32 %v6137_v38, %v7232_v0 }
 0x61e   : > { %v6139_v20 = vpop.eup %6138  ;;  %6154 = vrcp.f32 %v7459_v22 }
 0x61f   : > { %v1581_v34 = vpack.c.bf16 %v7531_v2, %v7528_v36  ;;  %v7536_v53 = vmul.f32 %v6139_v20, %v7238_v17  ;;  %6156 = vrcp.f32 %v7461_v46 }
 0x620   : > { %v6141_v51 = vpop.eup %6140  ;;  %6158 = vrcp.f32 %v7463_v7 }
 0x621   : > { %v7539_v44 = vmul.f32 %v6141_v51, %v7242_v49  ;;  %6160 = vrcp.f32 %v7465_v48 }
 0x622   : > { %v6143_v3 = vpop.eup %6142  ;;  %6162 = vrcp.f32 %v7467_v39 }
 0x623   : > { %v6145_v52 = vpop.eup %6144  ;;  %v1582_v50 = vpack.c.bf16 %v7539_v44, %v7536_v53  ;;  %v7548_v49 = vmul.f32 %v6143_v3, %v7236_v27  ;;  %6164 = vrcp.f32 %v7469_v42 }
 0x624   : > { %v6147_v0 = vpop.eup %6146  ;;  %v5682_v8 = vpop.f32.mrb[44].mxu0  ;;  %6166 = vrcp.f32 %v7471_v12 }
 0x625   : > { %v6149_v18 = vpop.eup %6148  ;;  %v2088_v17 = vpop.f32.mrb[45].mxu0  ;;  %v7551_v58 = vmul.f32 %v6147_v0, %v7240_v6  ;;  %v2169_v5 = vmul.f32 %v6145_v52, %v5682_v8  ;;  %6168 = vrcp.f32 %v7473_v31 }
 0x626   : > { %v6151_v22 = vpop.eup %6150  ;;  %v5683_v9 = vpop.f32.mrb[46].mxu0  ;;  %6170 = vrcp.f32 %v7475_v15 }
 0x627   : > { %v6153_v46 = vpop.eup %6152  ;;  %v2170_v54 = vmul.f32 %v6149_v18, %v5683_v9  ;;  %v2091_v32 = vpop.f32.mrb[47].mxu0  ;;  %v1583_v7 = vpack.c.bf16 %v7551_v58, %v7548_v49  ;;  %v2167_v4 = vmul.f32 %v6151_v22, %v2088_v17  ;;  %6172 = vrcp.f32 %v7477_v11 }
 0x628   : > { %v2168_v35 = vmul.f32 %v6153_v46, %v2091_v32  ;;  %v6155_v27 = vpop.eup %6154  ;;  %6174 = vrcp.f32 %v7479_v28 }
 0x629   : > { %v2184_v1 = vpack.c.bf16 %v2170_v54, %v2169_v5  ;;  %v6157_v25 = vpop.eup %6156  ;;  %6176 = vrcp.f32 %v7481_v24 }
 0x62a   : > { %v2183_v48 = vpack.c.bf16 %v2168_v35, %v2167_v4  ;;  %v6159_v20 = vpop.eup %6158 }
 0x62b   : > { %v6161_v39 = vpop.eup %6160 }
 0x62c   : > { %v5686_v6 = vpop.f32.mrb[48].mxu0  ;;  %5698 = vmatprep.mubr.msk.bf16.mxu1 %vm1132_vm1, %v2183_v48  ;;  %v6163_v31 = vpop.eup %6162 }
 0x62d   : > { %v2104_v38 = vpop.f32.mrb[49].mxu0  ;;  %5699 = vmatmul.mubr.msk.bf16.vlgmr.msra.gmra.mrb[36].mxu1 %vm1132_vm1, %v2184_v1  ;;  %v2173_v3 = vmul.f32 %v6155_v27, %v5686_v6  ;;  %v6165_v22 = vpop.eup %6164 }
 0x62e   : > { %v5687_v51 = vpop.f32.mrb[50].mxu0  ;;  %5715 = vmatpush3.bf16.msra.mxu1 %v7442_v43  ;;  %v2171_v0 = vmul.f32 %v6159_v20, %v2104_v38  ;;  %v6167_v9 = vpop.eup %6166 }
 0x62f   : > { %v2174_v52 = vmul.f32 %v6157_v25, %v5687_v51  ;;  %v2107_v42 = vpop.f32.mrb[51].mxu0  ;;  %v6169_v5 = vpop.eup %6168 }
 0x630   : > { %v2172_v8 = vmul.f32 %v6161_v39, %v2107_v42  ;;  %v6171_v28 = vpop.eup %6170 }
 0x631   : > { %v2186_v12 = vpack.c.bf16 %v2174_v52, %v2173_v3  ;;  %v6173_v27 = vpop.eup %6172 }
 0x632   : > { %v2185_v18 = vpack.c.bf16 %v2172_v8, %v2171_v0  ;;  %v6175_v24 = vpop.eup %6174 }
 0x633   : > { %v6177_v38 = vpop.eup %6176 }
 0x634   : > { %v5690_v17 = vpop.f32.mrb[52].mxu0  ;;  %5702 = vmatprep.mubr.msk.bf16.mxu1 %vm1132_vm1, %v2185_v18 }
 0x635   : > { %v2120_v43 = vpop.f32.mrb[53].mxu0  ;;  %5703 = vmatmul.mubr.msk.bf16.gmra.mrb[40].mxu1 %vm1132_vm1, %v2186_v12  ;;  %v2177_v54 = vmul.f32 %v6163_v31, %v5690_v17  ;;  %v5205_v12 = vld [vmem:[%s8632_s8 + $0x2] ss:$0 sm:$0xff] }
 0x636   : > { %v5691_v46 = vpop.f32.mrb[54].mxu0  ;;  %v2175_v4 = vmul.f32 %v6167_v9, %v2120_v43 }
 0x637   : > { %v2178_v15 = vmul.f32 %v6165_v22, %v5691_v46  ;;  %v2123_v32 = vpop.f32.mrb[55].mxu0 }
 0x638   : > { %v2176_v11 = vmul.f32 %v6169_v5, %v2123_v32 }
 0x639   : > { %v2188_v35 = vpack.c.bf16 %v2178_v15, %v2177_v54  ;;  %v5980_v15 = vld [vmem:[%s8631_s7 + $0x68] sm:$0xff]  }
 0x63a   : > { %v2187_v1 = vpack.c.bf16 %v2176_v11, %v2175_v4 }
 0x63c   : > { %v5694_v48 = vpop.f32.mrb[56].mxu0  ;;  %5706 = vmatprep.mubr.msk.bf16.mxu1 %vm1132_vm1, %v2187_v1 }
 0x63d   : > { %v2136_v6 = vpop.f32.mrb[57].mxu0  ;;  %5707 = vmatmul.mubr.msk.bf16.gmra.mrb[44].mxu1 %vm1132_vm1, %v2188_v35  ;;  %v2181_v20 = vmul.f32 %v6171_v28, %v5694_v48 }
 0x63e   : > { %v5695_v25 = vpop.f32.mrb[58].mxu0  ;;  %v2179_v3 = vmul.f32 %v6175_v24, %v2136_v6 }
 0x63f   : > { %v2182_v51 = vmul.f32 %v6173_v27, %v5695_v25  ;;  %v2139_v39 = vpop.f32.mrb[59].mxu0 }
 0x640   : > { %v2180_v52 = vmul.f32 %v6177_v38, %v2139_v39 }
 0x641   : > { %v2190_v42 = vpack.c.bf16 %v2182_v51, %v2181_v20 }
 0x642   : > { %v2189_v0 = vpack.c.bf16 %v2180_v52, %v2179_v3 }
 0x644   : > { %5710 = vmatprep.mubr.msk.bf16.mxu1 %vm1132_vm1, %v2189_v0  ;;  %v5742_v8 = vpop.f32.mrb[60].mxu0  ;;  %v8736_v0 = vld [vmem:[#allocation13_spill] sm:$0xff] }
 0x645   : > { %5711 = vmatmul.mubr.msk.bf16.gmra.mrb[48].mxu1 %vm1132_vm1, %v2190_v42  ;;  %v2523_v18 = vpop.f32.mrb[61].mxu0  ;;  %v2532_v17 = vadd.f32 %v5742_v8, %v5205_v12 }
 0x646   : > { %5716 = vmatprep.mubr.msk.bf16.mxu1 %vm1132_vm1, %v1576_v21  ;;  %v5743_v31 = vpop.f32.mrb[62].mxu0  ;;  %v2524_v9 = vadd.f32 %v5205_v12, %v2523_v18 }
 0x647   : > { %v2535_v22 = vadd.f32 %v5743_v31, %v5205_v12  ;;  %v2526_v43 = vpop.f32.mrb[63].mxu0 }
 0x648   : > { %v2527_v46 = vadd.f32 %v5205_v12, %v2526_v43  ;;  %v8738_v43 = vld [vmem:[#allocation14_spill] sm:$0xff] }
 0x649   : > { %v2587_v5 = vpack.c.bf16 %v2535_v22, %v2532_v17  ;;  %v8737_v17 = vld [vmem:[#allocation15_spill] sm:$0xff] }
 0x64a   : > { %v2586_v54 = vpack.c.bf16 %v2527_v46, %v2524_v9 }
 0x64c   : > { %v5746_v32 = vpop.f32.mrb[64].mxu0  ;;  %5758 = vmatprep.mubr.msk.bf16.mxu0 %vm1132_vm1, %v2586_v54 }
 0x64d   : > { %5717 = vmatmul.mubr.msk.bf16.vlgmr.msra.gmra.mrb[36].mxu1 %vm1132_vm1, %v1577_v59  ;;  %v2539_v37 = vpop.f32.mrb[65].mxu0  ;;  %5759 = vmatmul.mubr.msk.bf16.vlgmr.msra.gmra.mrb[76].mxu0 %vm1132_vm1, %v2587_v5  ;;  %v2548_v21 = vadd.f32 %v5746_v32, %v5205_v12  ;;  %v8739_v5 = vld [vmem:[#allocation16_spill] sm:$0xff] }
 0x64e   : > { %5813 = vmatpush3.bf16.msra.mxu0 %v7448_v23  ;;  %5720 = vmatprep.mubr.msk.bf16.mxu1 %vm1132_vm1, %v1578_v13  ;;  %v5747_v63 = vpop.f32.mrb[66].mxu0  ;;  %v2540_v29 = vadd.f32 %v5205_v12, %v2539_v37  ;;  %v5982_v23 = vld [vmem:[%s8631_s7 + $0x78] sm:$0xff]  }
 0x64f   : > { %v2551_v4 = vadd.f32 %v5747_v63, %v5205_v12  ;;  %v2542_v11 = vpop.f32.mrb[67].mxu0  ;;  %5814 = vmatprep.subr.bf16.mxu0 %v5980_v15 }
 0x650   : > { %v2543_v59 = vadd.f32 %v5205_v12, %v2542_v11 }
 0x651   : > { %v2589_v35 = vpack.c.bf16 %v2551_v4, %v2548_v21  ;;  %v8740_v21 = vld [vmem:[#allocation17_spill] sm:$0xff] }
 0x652   : > { %v2588_v1 = vpack.c.bf16 %v2543_v59, %v2540_v29  ;;  %5815 = vmatpush3.bf16.msra.mxu0 %v5980_v15  ;;  %v8741_v59 = vld [vmem:[#allocation19_spill] sm:$0xff] }
 0x653   : > { %5816 = vmatprep.subr.bf16.mxu0 %v5981_v45 }
 0x654   : > { %v5750_v47 = vpop.f32.mrb[68].mxu0  ;;  %5762 = vmatprep.mubr.msk.bf16.mxu0 %vm1132_vm1, %v2588_v1  ;;  %v8742_v1 = vld [vmem:[#allocation18_spill] sm:$0xff] }
 0x655   : > { %5721 = vmatmul.mubr.msk.bf16.gmra.mrb[40].mxu1 %vm1132_vm1, %v1579_v14  ;;  %v2555_v19 = vpop.f32.mrb[69].mxu0  ;;  %5763 = vmatmul.mubr.msk.bf16.gmra.mrb[80].mxu0 %vm1132_vm1, %v2589_v35  ;;  %v2564_v28 = vadd.f32 %v5750_v47, %v5205_v12 }
 0x656   : > { %5724 = vmatprep.mubr.msk.bf16.mxu1 %vm1132_vm1, %v1580_v26  ;;  %v5751_v13 = vpop.f32.mrb[70].mxu0  ;;  %5817 = vmatpush3.bf16.msra.mxu0 %v5981_v45  ;;  %v2556_v6 = vadd.f32 %v5205_v12, %v2555_v19  ;;  %v8743_v19 = vld [vmem:[#allocation20_spill] sm:$0xff] }
 0x657   : > { %v2567_v48 = vadd.f32 %v5751_v13, %v5205_v12  ;;  %v2558_v27 = vpop.f32.mrb[71].mxu0  ;;  %5818 = vmatprep.subr.bf16.mxu0 %v5982_v23 }
 0x658   : > { %v2559_v24 = vadd.f32 %v5205_v12, %v2558_v27 }
 0x659   : > { %v2591_v25 = vpack.c.bf16 %v2567_v48, %v2564_v28 }
 0x65a   : > { %v2590_v40 = vpack.c.bf16 %v2559_v24, %v2556_v6  ;;  %5819 = vmatpush3.bf16.msra.mxu0 %v5982_v23  ;;  %v8744_v24 = vld [vmem:[#allocation21_spill] sm:$0xff] }
 0x65c   : > { %v5754_v60 = vpop.f32.mrb[72].mxu0  ;;  %5766 = vmatprep.mubr.msk.bf16.mxu0 %vm1132_vm1, %v2590_v40 }
 0x65d   : > { %5725 = vmatmul.mubr.msk.bf16.gmra.mrb[44].mxu1 %vm1132_vm1, %v1581_v34  ;;  %v2571_v14 = vpop.f32.mrb[73].mxu0  ;;  %5767 = vmatmul.mubr.msk.bf16.gmra.mrb[84].mxu0 %vm1132_vm1, %v2591_v25  ;;  %v2580_v30 = vadd.f32 %v5754_v60, %v5205_v12  ;;  %v8734_v34 = vld [vmem:[#allocation10_spill] sm:$0xff] }
 0x65e   : > { %5728 = vmatprep.mubr.msk.bf16.mxu1 %vm1132_vm1, %v1582_v50  ;;  %v5755_v55 = vpop.f32.mrb[74].mxu0  ;;  %v2572_v20 = vadd.f32 %v5205_v12, %v2571_v14  ;;  %v8735_v50 = vld [vmem:[#allocation11_spill] sm:$0xff] }
 0x65f   : > { %v2583_v26 = vadd.f32 %v5755_v55, %v5205_v12  ;;  %v2574_v38 = vpop.f32.mrb[75].mxu0  ;;  %v8745_v55 = vld [vmem:[#allocation23_spill] sm:$0xff] }
 0x660   : > { %v2575_v51 = vadd.f32 %v5205_v12, %v2574_v38 }
 0x661   : > { %v2593_v39 = vpack.c.bf16 %v2583_v26, %v2580_v30  ;;  %v8746_v26 = vld [vmem:[#allocation22_spill] sm:$0xff] }
 0x662   : > { %v2592_v3 = vpack.c.bf16 %v2575_v51, %v2572_v20  ;;  %v8747_v51 = vld [vmem:[#allocation24_spill] sm:$0xff] }
 0x664   : > { %5770 = vmatprep.mubr.msk.bf16.mxu0 %vm1132_vm1, %v2592_v3 }
 0x665   : > { %5729 = vmatmul.mubr.msk.bf16.gmra.mrb[48].mxu1 %vm1132_vm1, %v1583_v7  ;;  %5771 = vmatmul.mubr.msk.bf16.gmra.mrb[88].mxu0 %vm1132_vm1, %v2593_v39 }
 0x666   : > { %5820 = vmatprep.mubr.msk.bf16.mxu0 %vm593_vm0, %v6733_v62  ;;  %v5983_v62 = vld [vmem:[%s8627_s3 + $0x18] sm:$0xff]  }
 0x667   : > { %5836 = vmatprep.subr.bf16.mxu0 %v5983_v62 }
 0x66d   : > { %5821 = vmatmul.mubr.msk.bf16.vlgmr.msra.gmra.mrb[92].mxu0 %vm593_vm0, %v8725_v16  ;;  %v5984_v16 = vld [vmem:[%s8628_s4 + $0x18] sm:$0xff]  }
 0x66e   : > { %5824 = vmatprep.mubr.msk.bf16.mxu0 %vm593_vm0, %v8726_v33  ;;  %5837 = vmatpush3.bf16.msra.mxu0 %v5983_v62 }
 0x66f   : > { %5774 = vmatprep.subr.bf16.mxu1 %v5984_v16 }
 0x670   : > { %5775 = vmatpush3.bf16.msra.mxu1 %v5984_v16  ;;  %v5262_v16 = vld [vmem:[%s8632_s8 + $0x3] ss:$0 sm:$0xff] }
 0x675   : > { %5825 = vmatmul.mubr.msk.bf16.gmra.mrb[96].mxu0 %vm593_vm0, %v8727_v57 }
 0x676   : > { %5828 = vmatprep.mubr.msk.bf16.mxu0 %vm593_vm0, %v8728_v10  ;;  %v8732_v10 = vld [vmem:[#allocation9_spill] sm:$0xff] }
 0x67d   : > { %5829 = vmatmul.mubr.msk.bf16.gmra.mrb[100].mxu0 %vm593_vm0, %v8729_v41 }
 0x67e   : > { %5832 = vmatprep.mubr.msk.bf16.mxu0 %vm593_vm0, %v8730_v56 }
 0x685   : > { %5833 = vmatmul.mubr.msk.bf16.gmra.mrb[104].mxu0 %vm593_vm0, %v8731_v61  ;;  %v8733_v61 = vld [vmem:[#allocation12_spill] sm:$0xff] }
 0x720   : > { %v5760_v33 = vpop.f32.mrb[76].mxu0 }
 0x721   : > { %v2661_v57 = vpop.f32.mrb[77].mxu0  ;;  %v7651_v2 = vadd.f32 %v5760_v33, %v8733_v61 }
 0x722   : > { %v7648_v41 = vadd.f32 %v2661_v57, %v8732_v10  ;;  %v5761_v56 = vpop.f32.mrb[78].mxu0 }
 0x723   : > { %v2664_v36 = vpop.f32.mrb[79].mxu0  ;;  %v7659_v49 = vadd.f32 %v5761_v56, %v8735_v50  ;;  %v2730_v52 = vsel %vm1254_vm5, %v7651_v2, -inf }
 0x724   : > { %v7654_v53 = vadd.f32 %v2664_v36, %v8734_v34  ;;  %v2724_v44 = vsel %vm1254_vm5, %v7648_v41, -inf }
 0x725   : > { %2725 = vmax.xlane.f32.xlu0 %v2724_v44  ;;  %v2733_v18 = vsel %vm1254_vm5, %v7659_v49, -inf }
 0x726   : > { %v2727_v58 = vsel %vm1254_vm5, %v7654_v53, -inf }
 0x727   : > { %2728 = vmax.xlane.f32.xlu1 %v2727_v58 }
 0x728   : > { %v5764_v7 = vpop.f32.mrb[80].mxu0 }
 0x729   : > { %v2677_v42 = vpop.f32.mrb[81].mxu0  ;;  %2731 = vmax.xlane.f32.xlu0 %v2730_v52  ;;  %v7671_v22 = vadd.f32 %v5764_v7, %v8737_v17 }
 0x72a   : > { %v7666_v8 = vadd.f32 %v2677_v42, %v8736_v0  ;;  %v5765_v12 = vpop.f32.mrb[82].mxu0 }
 0x72b   : > { %v2680_v31 = vpop.f32.mrb[83].mxu0  ;;  %2734 = vmax.xlane.f32.xlu1 %v2733_v18  ;;  %v7679_v54 = vadd.f32 %v5765_v12, %v8739_v5  ;;  %v2742_v37 = vsel %vm1254_vm5, %v7671_v22, -inf  ;;  %v5985_v18 = vld [vmem:[%s8628_s4 + $0x20] ss:$0 sps:$4 sm:$0xff]  }
 0x72c   : > { %v7674_v9 = vadd.f32 %v2680_v31, %v8738_v43  ;;  %v2736_v46 = vsel %vm1254_vm5, %v7666_v8, -inf  ;;  %5944 = vmatprep.subr.msk.bf16.mxu1 %vm1443_vm6, %v5985_v18 }
 0x72d   : > { %2737 = vmax.xlane.f32.xlu0 %v2736_v46  ;;  %v2745_v45 = vsel %vm1254_vm5, %v7679_v54, -inf  ;;  %v2914_v46 = vsel %vm1443_vm6, %v5985_v18, 0 }
 0x72e   : > { %v2739_v15 = vsel %vm1254_vm5, %v7674_v9, -inf  ;;  %5777 = vmatpush3.bf16.msra.mxu1 %v2914_v46  ;;  %v8748_v46 = vmov 0  }
 0x72f   : > { %2740 = vmax.xlane.f32.xlu1 %v2739_v15 }
 0x730   : > { %v5768_v32 = vpop.f32.mrb[84].mxu0 }
 0x731   : > { %v2693_v63 = vpop.f32.mrb[85].mxu0  ;;  %2743 = vmax.xlane.f32.xlu0 %v2742_v37  ;;  %v7691_v35 = vadd.f32 %v5768_v32, %v8741_v59 }
 0x732   : > { %v7686_v4 = vadd.f32 %v2693_v63, %v8740_v21  ;;  %v5769_v11 = vpop.f32.mrb[86].mxu0 }
 0x733   : > { %v2696_v29 = vpop.f32.mrb[87].mxu0  ;;  %2746 = vmax.xlane.f32.xlu1 %v2745_v45  ;;  %v7699_v13 = vadd.f32 %v5769_v11, %v8743_v19  ;;  %v2754_v27 = vsel %vm1254_vm5, %v7691_v35, -inf }
 0x734   : > { %v7694_v23 = vadd.f32 %v2696_v29, %v8742_v1  ;;  %v2748_v47 = vsel %vm1254_vm5, %v7686_v4, -inf }
 0x735   : > { %2749 = vmax.xlane.f32.xlu0 %v2748_v47  ;;  %v2757_v60 = vsel %vm1254_vm5, %v7699_v13, -inf }
 0x736   : > { %v2751_v28 = vsel %vm1254_vm5, %v7694_v23, -inf }
 0x737   : > { %2752 = vmax.xlane.f32.xlu1 %v2751_v28 }
 0x738   : > { %v5772_v48 = vpop.f32.mrb[88].mxu0 }
 0x739   : > { %v2709_v6 = vpop.f32.mrb[89].mxu0  ;;  %2755 = vmax.xlane.f32.xlu0 %v2754_v27  ;;  %v7711_v30 = vadd.f32 %v5772_v48, %v8745_v55 }
 0x73a   : > { %v7706_v25 = vadd.f32 %v2709_v6, %v8744_v24  ;;  %v5773_v40 = vpop.f32.mrb[90].mxu0 }
 0x73b   : > { %v2712_v14 = vpop.f32.mrb[91].mxu0  ;;  %2758 = vmax.xlane.f32.xlu1 %v2757_v60  ;;  %v7719_v39 = vadd.f32 %v5773_v40, %v8747_v51  ;;  %v2766_v33 = vsel %vm1254_vm5, %v7711_v30, -inf }
 0x73c   : > { %v7714_v38 = vadd.f32 %v2712_v14, %v8746_v26  ;;  %v2760_v20 = vsel %vm1254_vm5, %v7706_v25, -inf }
 0x73d   : > { %2761 = vmax.xlane.f32.xlu0 %v2760_v20  ;;  %v2769_v36 = vsel %vm1254_vm5, %v7719_v39, -inf }
 0x73e   : > { %v2763_v3 = vsel %vm1254_vm5, %v7714_v38, -inf }
 0x73f   : > { %2764 = vmax.xlane.f32.xlu1 %v2763_v3 }
 0x740   : > { %v5822_v62 = vpop.f32.mrb[92].mxu0 }
 0x741   : > { %v3274_v57 = vpop.f32.mrb[93].mxu0  ;;  %2767 = vmax.xlane.f32.xlu0 %v2766_v33  ;;  %v3283_v44 = vadd.f32 %v5822_v62, %v5262_v16 }
 0x742   : > { %v5823_v56 = vpop.f32.mrb[94].mxu0  ;;  %v3275_v52 = vadd.f32 %v5262_v16, %v3274_v57 }
 0x743   : > { %v3286_v58 = vadd.f32 %v5823_v56, %v5262_v16  ;;  %v3277_v7 = vpop.f32.mrb[95].mxu0  ;;  %2770 = vmax.xlane.f32.xlu1 %v2769_v36 }
 0x744   : > { %v3278_v42 = vadd.f32 %v5262_v16, %v3277_v7 }
 0x745   : > { %v3338_v12 = vpack.c.bf16 %v3286_v58, %v3283_v44 }
 0x746   : > { %v3337_v31 = vpack.c.bf16 %v3278_v42, %v3275_v52 }
 0x748   : > { %v5826_v15 = vpop.f32.mrb[96].mxu0  ;;  %5838 = vmatprep.mubr.msk.bf16.mxu0 %vm1132_vm1, %v3337_v31 }
 0x749   : > { %v3290_v32 = vpop.f32.mrb[97].mxu0  ;;  %5839 = vmatmul.mubr.msk.bf16.vlgmr.msra.gmra.mrb[108].mxu0 %vm1132_vm1, %v3338_v12  ;;  %v3299_v63 = vadd.f32 %v5826_v15, %v5262_v16 }
 0x74a   : > { %v5827_v37 = vpop.f32.mrb[98].mxu0  ;;  %v3291_v29 = vadd.f32 %v5262_v16, %v3290_v32 }
 0x74b   : > { %v3302_v11 = vadd.f32 %v5827_v37, %v5262_v16  ;;  %v3293_v45 = vpop.f32.mrb[99].mxu0 }
 0x74c   : > { %v3294_v47 = vadd.f32 %v5262_v16, %v3293_v45 }
 0x74d   : > { %v3340_v28 = vpack.c.bf16 %v3302_v11, %v3299_v63 }
 0x74e   : > { %v3339_v48 = vpack.c.bf16 %v3294_v47, %v3291_v29 }
 0x750   : > { %v5830_v27 = vpop.f32.mrb[100].mxu0  ;;  %5842 = vmatprep.mubr.msk.bf16.mxu0 %vm1132_vm1, %v3339_v48 }
 0x751   : > { %v3306_v6 = vpop.f32.mrb[101].mxu0  ;;  %5843 = vmatmul.mubr.msk.bf16.gmra.mrb[112].mxu0 %vm1132_vm1, %v3340_v28  ;;  %v3315_v60 = vadd.f32 %v5830_v27, %v5262_v16 }
 0x752   : > { %v5831_v40 = vpop.f32.mrb[102].mxu0  ;;  %v3307_v3 = vadd.f32 %v5262_v16, %v3306_v6 }
 0x753   : > { %v3318_v14 = vadd.f32 %v5831_v40, %v5262_v16  ;;  %v3309_v20 = vpop.f32.mrb[103].mxu0 }
 0x754   : > { %v3310_v62 = vadd.f32 %v5262_v16, %v3309_v20 }
 0x755   : > { %v3342_v33 = vpack.c.bf16 %v3318_v14, %v3315_v60 }
 0x756   : > { %v3341_v57 = vpack.c.bf16 %v3310_v62, %v3307_v3 }
 0x758   : > { %v5834_v56 = vpop.f32.mrb[104].mxu0  ;;  %5846 = vmatprep.mubr.msk.bf16.mxu0 %vm1132_vm1, %v3341_v57 }
 0x759   : > { %v3322_v36 = vpop.f32.mrb[105].mxu0  ;;  %5847 = vmatmul.mubr.msk.bf16.gmra.mrb[116].mxu0 %vm1132_vm1, %v3342_v33  ;;  %v3331_v58 = vadd.f32 %v5834_v56, %v5262_v16 }
 0x75a   : > { %v5835_v44 = vpop.f32.mrb[106].mxu0  ;;  %v3323_v42 = vadd.f32 %v5262_v16, %v3322_v36 }
 0x75b   : > { %v3334_v7 = vadd.f32 %v5835_v44, %v5262_v16  ;;  %v3325_v52 = vpop.f32.mrb[107].mxu0 }
 0x75c   : > { %v3326_v12 = vadd.f32 %v5262_v16, %v3325_v52 }
 0x75d   : > { %v3344_v18 = vpack.c.bf16 %v3334_v7, %v3331_v58 }
 0x75e   : > { %v3343_v31 = vpack.c.bf16 %v3326_v12, %v3323_v42 }
 0x760   : > { %5850 = vmatprep.mubr.msk.bf16.mxu0 %vm1132_vm1, %v3343_v31 }
 0x761   : > { %5851 = vmatmul.mubr.msk.bf16.gmra.mrb[120].mxu0 %vm1132_vm1, %v3344_v18 }
 0x762   : > { %4367 = vmatprep.mubr.bf16.mxu0 %v8748_v46 }
 0x7b2   : > { %v2726_v15 = vpop.xlane.xlu0 %2725 }
 0x7b3   : > { %v2772_v32 = vsub.f32 %v7648_v41, %v2726_v15 }
 0x7b4   : > { %v2729_v37 = vpop.xlane.xlu1 %2728 }
 0x7b5   : > { %v2788_v63 = vmul.f32 1.442695, %v2772_v32  ;;  %v2773_v11 = vsub.f32 %v7654_v53, %v2729_v37 }
 0x7b6   : > { %v2732_v45 = vpop.xlane.xlu0 %2731 }
 0x7b7   : > { %v2790_v29 = vmul.f32 1.442695, %v2773_v11  ;;  %v2774_v47 = vsub.f32 %v7651_v2, %v2732_v45  ;;  %6178 = vpow2.f32 %v2788_v63 }
 0x7b8   : > { %v2735_v16 = vpop.xlane.xlu1 %2734 }
 0x7b9   : > { %6180 = vpow2.f32 %v2790_v29  ;;  %v2792_v28 = vmul.f32 1.442695, %v2774_v47  ;;  %v2775_v48 = vsub.f32 %v7659_v49, %v2735_v16 }
 0x7ba   : > { %v2738_v27 = vpop.xlane.xlu0 %2737 }
 0x7bb   : > { %6182 = vpow2.f32 %v2792_v28  ;;  %v2794_v6 = vmul.f32 1.442695, %v2775_v48  ;;  %v2776_v40 = vsub.f32 %v7666_v8, %v2738_v27 }
 0x7bc   : > { %v2741_v41 = vpop.xlane.xlu1 %2740 }
 0x7bd   : > { %6184 = vpow2.f32 %v2794_v6  ;;  %v2796_v60 = vmul.f32 1.442695, %v2776_v40  ;;  %v2777_v53 = vsub.f32 %v7674_v9, %v2741_v41 }
 0x7be   : > { %v2744_v14 = vpop.xlane.xlu0 %2743 }
 0x7bf   : > { %v2798_v20 = vmul.f32 1.442695, %v2777_v53  ;;  %v2778_v2 = vsub.f32 %v7671_v22, %v2744_v14  ;;  %6186 = vpow2.f32 %v2796_v60 }
 0x7c0   : > { %v2747_v3 = vpop.xlane.xlu1 %2746 }
 0x7c1   : > { %6188 = vpow2.f32 %v2798_v20  ;;  %v2800_v62 = vmul.f32 1.442695, %v2778_v2  ;;  %v2779_v49 = vsub.f32 %v7679_v54, %v2747_v3  ;;  %v6179_v33 = vpop.eup %6178 }
 0x7c2   : > { %v2750_v57 = vpop.xlane.xlu0 %2749  ;;  %v2820_v11 = vsel %vm1254_vm5, %v6179_v33, 0.0 }
 0x7c3   : > { %v6181_v56 = vpop.eup %6180  ;;  %6190 = vpow2.f32 %v2800_v62  ;;  %v2802_v8 = vmul.f32 1.442695, %v2779_v49  ;;  %v2780_v36 = vsub.f32 %v7686_v4, %v2750_v57 }
 0x7c4   : > { %v2753_v44 = vpop.xlane.xlu1 %2752  ;;  %v2868_v58 = vpack.c.bf16 %v6181_v56, %v6179_v33  ;;  %v2823_v16 = vsel %vm1254_vm5, %v6181_v56, 0.0 }
 0x7c5   : > { %v6183_v9 = vpop.eup %6182  ;;  %6192 = vpow2.f32 %v2802_v8  ;;  %v2804_v7 = vmul.f32 1.442695, %v2780_v36  ;;  %v2781_v22 = vsub.f32 %v7694_v23, %v2753_v44 }
 0x7c6   : > { %5778 = vmatprep.mubr.msk.bf16.mxu1 %vm1254_vm5, %v2868_v58  ;;  %v2756_v52 = vpop.xlane.xlu0 %2755  ;;  %v2826_v42 = vsel %vm1254_vm5, %v6183_v9, 0.0 }
 0x7c7   : > { %v6185_v54 = vpop.eup %6184  ;;  %v2806_v12 = vmul.f32 1.442695, %v2781_v22  ;;  %v2782_v18 = vsub.f32 %v7691_v35, %v2756_v52  ;;  %2827 = vadd.xlane.f32.xlu0 %v2826_v42  ;;  %6194 = vpow2.f32 %v2804_v7 }
 0x7c8   : > { %v2869_v31 = vpack.c.bf16 %v6185_v54, %v6183_v9  ;;  %v2759_v4 = vpop.xlane.xlu1 %2758  ;;  %v2829_v15 = vsel %vm1254_vm5, %v6185_v54, 0.0 }
 0x7c9   : > { %6196 = vpow2.f32 %v2806_v12  ;;  %v2808_v32 = vmul.f32 1.442695, %v2782_v18  ;;  %v2783_v37 = vsub.f32 %v7699_v13, %v2759_v4  ;;  %2830 = vadd.xlane.f32.xlu1 %v2829_v15  ;;  %v6187_v23 = vpop.eup %6186 }
 0x7ca   : > { %5779 = vmatmul.mubr.msk.bf16.vlgmr.msra.gmra.mrb[52].mxu1 %vm1254_vm5, %v2869_v31  ;;  %v2762_v63 = vpop.xlane.xlu0 %2761  ;;  %v2832_v62 = vsel %vm1254_vm5, %v6187_v23, 0.0 }
 0x7cb   : > { %v6189_v45 = vpop.eup %6188  ;;  %6198 = vpow2.f32 %v2808_v32  ;;  %v2810_v35 = vmul.f32 1.442695, %v2783_v37  ;;  %v2784_v29 = vsub.f32 %v7706_v25, %v2762_v63  ;;  %2821 = vadd.xlane.f32.xlu0 %v2820_v11  ;;  %v5986_v32 = vld [vmem:[%s8633_s9 + $0x10] sm:$0xff]  }
 0x7cc   : > { %v2765_v47 = vpop.xlane.xlu1 %2764  ;;  %v2870_v28 = vpack.c.bf16 %v6189_v45, %v6187_v23  ;;  %5794 = vmatprep.subr.bf16.mxu1 %v5986_v32 }
 0x7cd   : > { %v6191_v48 = vpop.eup %6190  ;;  %6200 = vpow2.f32 %v2810_v35  ;;  %v2812_v13 = vmul.f32 1.442695, %v2784_v29  ;;  %v2785_v27 = vsub.f32 %v7714_v38, %v2765_v47  ;;  %2824 = vadd.xlane.f32.xlu1 %v2823_v16  ;;  %5795 = vmatpush3.bf16.msra.mxu1 %v5986_v32 }
 0x7ce   : > { %5782 = vmatprep.mubr.msk.bf16.mxu1 %vm1254_vm5, %v2870_v28  ;;  %v2768_v6 = vpop.xlane.xlu0 %2767  ;;  %v2838_v40 = vsel %vm1254_vm5, %v6191_v48, 0.0 }
 0x7cf   : > { %v6193_v41 = vpop.eup %6192  ;;  %v2814_v60 = vmul.f32 1.442695, %v2785_v27  ;;  %v2786_v25 = vsub.f32 %v7711_v30, %v2768_v6  ;;  %2839 = vadd.xlane.f32.xlu0 %v2838_v40  ;;  %6202 = vpow2.f32 %v2812_v13  ;;  %v2835_v30 = vsel %vm1254_vm5, %v6189_v45, 0.0 }
 0x7d0   : > { %v2771_v53 = vpop.xlane.xlu1 %2770  ;;  %v2841_v14 = vsel %vm1254_vm5, %v6193_v41, 0.0  ;;  %v2871_v20 = vpack.c.bf16 %v6193_v41, %v6191_v48 }
 0x7d1   : > { %6204 = vpow2.f32 %v2814_v60  ;;  %v2816_v2 = vmul.f32 1.442695, %v2786_v25  ;;  %v2787_v38 = vsub.f32 %v7719_v39, %v2771_v53  ;;  %2842 = vadd.xlane.f32.xlu1 %v2841_v14  ;;  %v6195_v3 = vpop.eup %6194 }
 0x7d2   : > { %5783 = vmatmul.mubr.msk.bf16.gmra.mrb[56].mxu1 %vm1254_vm5, %v2871_v20  ;;  %v2844_v9 = vsel %vm1254_vm5, %v6195_v3, 0.0 }
 0x7d3   : > { %v6197_v49 = vpop.eup %6196  ;;  %6206 = vpow2.f32 %v2816_v2  ;;  %v2818_v33 = vmul.f32 1.442695, %v2787_v38  ;;  %2833 = vadd.xlane.f32.xlu0 %v2832_v62 }
 0x7d4   : > { %v2872_v57 = vpack.c.bf16 %v6197_v49, %v6195_v3  ;;  %v2847_v22 = vsel %vm1254_vm5, %v6197_v49, 0.0 }
 0x7d5   : > { %v6199_v56 = vpop.eup %6198  ;;  %6208 = vpow2.f32 %v2818_v33  ;;  %2836 = vadd.xlane.f32.xlu1 %v2835_v30 }
 0x7d6   : > { %5786 = vmatprep.mubr.msk.bf16.mxu1 %vm1254_vm5, %v2872_v57  ;;  %v2850_v39 = vsel %vm1254_vm5, %v6199_v56, 0.0 }
 0x7d7   : > { %v6201_v8 = vpop.eup %6200  ;;  %2851 = vadd.xlane.f32.xlu0 %v2850_v39 }
 0x7d8   : > { %v2853_v36 = vsel %vm1254_vm5, %v6201_v8, 0.0  ;;  %v2873_v44 = vpack.c.bf16 %v6201_v8, %v6199_v56 }
 0x7d9   : > { %2854 = vadd.xlane.f32.xlu1 %v2853_v36  ;;  %v6203_v58 = vpop.eup %6202 }
 0x7da   : > { %5787 = vmatmul.mubr.msk.bf16.gmra.mrb[60].mxu1 %vm1254_vm5, %v2873_v44  ;;  %v2856_v4 = vsel %vm1254_vm5, %v6203_v58, 0.0 }
 0x7db   : > { %v6205_v7 = vpop.eup %6204  ;;  %2845 = vadd.xlane.f32.xlu0 %v2844_v9 }
 0x7dc   : > { %v2874_v52 = vpack.c.bf16 %v6205_v7, %v6203_v58  ;;  %v2859_v15 = vsel %vm1254_vm5, %v6205_v7, 0.0 }
 0x7dd   : > { %v6207_v42 = vpop.eup %6206  ;;  %2848 = vadd.xlane.f32.xlu1 %v2847_v22 }
 0x7de   : > { %5790 = vmatprep.mubr.msk.bf16.mxu1 %vm1254_vm5, %v2874_v52  ;;  %v2862_v54 = vsel %vm1254_vm5, %v6207_v42, 0.0 }
 0x7df   : > { %v6209_v12 = vpop.eup %6208  ;;  %2863 = vadd.xlane.f32.xlu0 %v2862_v54 }
 0x7e0   : > { %v2865_v18 = vsel %vm1254_vm5, %v6209_v12, 0.0  ;;  %v2875_v31 = vpack.c.bf16 %v6209_v12, %v6207_v42 }
 0x7e1   : > { %2866 = vadd.xlane.f32.xlu1 %v2865_v18 }
 0x7e2   : > { %5791 = vmatmul.mubr.msk.bf16.gmra.mrb[64].mxu1 %vm1254_vm5, %v2875_v31 }
 0x7e3   : > { %2857 = vadd.xlane.f32.xlu0 %v2856_v4 }
 0x7e5   : > { %2860 = vadd.xlane.f32.xlu1 %v2859_v15 }
 0x81c   : > { %v5840_v37 = vpop.f32.mrb[108].mxu0 }
 0x81d   : > { %v3412_v23 = vpop.f32.mrb[109].mxu0  ;;  %v7791_v35 = vadd.f32 %v5840_v37, %v8733_v61 }
 0x81e   : > { %v7788_v63 = vadd.f32 %v3412_v23, %v8732_v10  ;;  %v5841_v11 = vpop.f32.mrb[110].mxu0 }
 0x81f   : > { %v3415_v45 = vpop.f32.mrb[111].mxu0  ;;  %v7799_v16 = vadd.f32 %v5841_v11, %v8735_v50  ;;  %v3481_v48 = vsel %vm1254_vm5, %v7791_v35, -inf  ;;  %v7813_v50 = vld [vmem:[%s8628_s4 + $0x24] sm:$0xff]  }
 0x820   : > { %v7794_v29 = vadd.f32 %v3415_v45, %v8734_v34  ;;  %v3475_v47 = vsel %vm1254_vm5, %v7788_v63, -inf  ;;  %5854 = vmatprep.subr.bf16.mxu1 %v7813_v50 }
 0x821   : > { %3476 = vmax.xlane.f32.xlu0 %v3475_v47  ;;  %v3484_v27 = vsel %vm1254_vm5, %v7799_v16, -inf }
 0x822   : > { %v3478_v28 = vsel %vm1254_vm5, %v7794_v29, -inf }
 0x823   : > { %3479 = vmax.xlane.f32.xlu1 %v3478_v28 }
 0x824   : > { %v5844_v10 = vpop.f32.mrb[112].mxu0 }
 0x825   : > { %v3428_v61 = vpop.f32.mrb[113].mxu0  ;;  %3482 = vmax.xlane.f32.xlu0 %v3481_v48  ;;  %v7816_v40 = vadd.f32 %v5844_v10, %v8737_v17 }
 0x826   : > { %v7806_v34 = vadd.f32 %v3428_v61, %v8736_v0  ;;  %v5845_v13 = vpop.f32.mrb[114].mxu0 }
 0x827   : > { %v3431_v6 = vpop.f32.mrb[115].mxu0  ;;  %3485 = vmax.xlane.f32.xlu1 %v3484_v27  ;;  %v7825_v60 = vadd.f32 %v5845_v13, %v8739_v5  ;;  %v3493_v17 = vsel %vm1254_vm5, %v7816_v40, -inf }
 0x828   : > { %v7819_v41 = vadd.f32 %v3431_v6, %v8738_v43  ;;  %v3487_v0 = vsel %vm1254_vm5, %v7806_v34, -inf }
 0x829   : > { %3488 = vmax.xlane.f32.xlu0 %v3487_v0  ;;  %v3496_v2 = vsel %vm1254_vm5, %v7825_v60, -inf }
 0x82a   : > { %v3490_v25 = vsel %vm1254_vm5, %v7819_v41, -inf }
 0x82b   : > { %3491 = vmax.xlane.f32.xlu1 %v3490_v25  ;;  %v5988_v25 = vld [vmem:[%s8628_s4 + $0x2c] ss:$0 sps:$4 sm:$0xff]  }
 0x82c   : > { %v5848_v53 = vpop.f32.mrb[116].mxu0 }
 0x82d   : > { %v3444_v14 = vpop.f32.mrb[117].mxu0  ;;  %3494 = vmax.xlane.f32.xlu0 %v3493_v17  ;;  %v7837_v5 = vadd.f32 %v5848_v53, %v8741_v59 }
 0x82e   : > { %v7832_v43 = vadd.f32 %v3444_v14, %v8740_v21  ;;  %v5849_v20 = vpop.f32.mrb[118].mxu0 }
 0x82f   : > { %v3447_v38 = vpop.f32.mrb[119].mxu0  ;;  %3497 = vmax.xlane.f32.xlu1 %v3496_v2  ;;  %v7845_v49 = vadd.f32 %v5849_v20, %v8743_v19  ;;  %v3505_v30 = vsel %vm1254_vm5, %v7837_v5, -inf }
 0x830   : > { %v7840_v3 = vadd.f32 %v3447_v38, %v8742_v1  ;;  %v3499_v62 = vsel %vm1254_vm5, %v7832_v43, -inf }
 0x831   : > { %3500 = vmax.xlane.f32.xlu0 %v3499_v62  ;;  %v3508_v56 = vsel %vm1254_vm5, %v7845_v49, -inf }
 0x832   : > { %v3502_v21 = vsel %vm1254_vm5, %v7840_v3, -inf }
 0x833   : > { %3503 = vmax.xlane.f32.xlu1 %v3502_v21 }
 0x834   : > { %v5852_v33 = vpop.f32.mrb[120].mxu0 }
 0x835   : > { %v3460_v59 = vpop.f32.mrb[121].mxu0  ;;  %3506 = vmax.xlane.f32.xlu0 %v3505_v30  ;;  %v7857_v19 = vadd.f32 %v5852_v33, %v8745_v55 }
 0x836   : > { %v7852_v1 = vadd.f32 %v3460_v59, %v8744_v24  ;;  %v5853_v57 = vpop.f32.mrb[122].mxu0 }
 0x837   : > { %v3463_v39 = vpop.f32.mrb[123].mxu0  ;;  %3509 = vmax.xlane.f32.xlu1 %v3508_v56  ;;  %v7865_v44 = vadd.f32 %v5853_v57, %v8747_v51  ;;  %v3517_v58 = vsel %vm1254_vm5, %v7857_v19, -inf  ;;  %v3665_v57 = vsel %vm1443_vm6, %v5988_v25, 0 }
 0x838   : > { %v7860_v8 = vadd.f32 %v3463_v39, %v8746_v26  ;;  %v3511_v36 = vsel %vm1254_vm5, %v7852_v1, -inf }
 0x839   : > { %3512 = vmax.xlane.f32.xlu0 %v3511_v36  ;;  %v3520_v55 = vsel %vm1254_vm5, %v7865_v44, -inf }
 0x83a   : > { %v3514_v24 = vsel %vm1254_vm5, %v7860_v8, -inf }
 0x83b   : > { %3515 = vmax.xlane.f32.xlu1 %v3514_v24 }
 0x83d   : > { %3518 = vmax.xlane.f32.xlu0 %v3517_v58 }
 0x83f   : > { %3521 = vmax.xlane.f32.xlu1 %v3520_v55 }
 0x854   : > { %v2828_v26 = vpop.xlane.xlu0 %2827 }
 0x855   : > { %6210 = vrcp.f32 %v2828_v26 }
 0x856   : > { %v2831_v9 = vpop.xlane.xlu1 %2830 }
 0x857   : > { %6212 = vrcp.f32 %v2831_v9 }
 0x858   : > { %v2822_v7 = vpop.xlane.xlu0 %2821 }
 0x859   : > { %6214 = vrcp.f32 %v2822_v7 }
 0x85a   : > { %v2825_v22 = vpop.xlane.xlu1 %2824 }
 0x85b   : > { %6216 = vrcp.f32 %v2825_v22 }
 0x85c   : > { %v2840_v52 = vpop.xlane.xlu0 %2839 }
 0x85d   : > { %6218 = vrcp.f32 %v2840_v52 }
 0x85e   : > { %v2843_v42 = vpop.xlane.xlu1 %2842 }
 0x85f   : > { %6220 = vrcp.f32 %v2843_v42  ;;  %v6211_v31 = vpop.eup %6210 }
 0x860   : > { %v2834_v51 = vpop.xlane.xlu0 %2833 }
 0x861   : > { %6222 = vrcp.f32 %v2834_v51  ;;  %v6213_v15 = vpop.eup %6212 }
 0x862   : > { %v2837_v54 = vpop.xlane.xlu1 %2836 }
 0x863   : > { %6224 = vrcp.f32 %v2837_v54  ;;  %v6215_v23 = vpop.eup %6214 }
 0x864   : > { %v2852_v12 = vpop.xlane.xlu0 %2851 }
 0x865   : > { %v6217_v47 = vpop.eup %6216  ;;  %6226 = vrcp.f32 %v2852_v12 }
 0x866   : > { %v2855_v18 = vpop.xlane.xlu1 %2854 }
 0x867   : > { %6228 = vrcp.f32 %v2855_v18  ;;  %v6219_v53 = vpop.eup %6218 }
 0x868   : > { %v2846_v32 = vpop.xlane.xlu0 %2845 }
 0x869   : > { %6230 = vrcp.f32 %v2846_v32  ;;  %v6221_v20 = vpop.eup %6220 }
 0x86a   : > { %v2849_v11 = vpop.xlane.xlu1 %2848 }
 0x86b   : > { %6232 = vrcp.f32 %v2849_v11  ;;  %v6223_v38 = vpop.eup %6222 }
 0x86c   : > { %v2864_v0 = vpop.xlane.xlu0 %2863 }
 0x86d   : > { %v6225_v21 = vpop.eup %6224  ;;  %6234 = vrcp.f32 %v2864_v0 }
 0x86e   : > { %v2867_v17 = vpop.xlane.xlu1 %2866 }
 0x86f   : > { %6236 = vrcp.f32 %v2867_v17  ;;  %v6227_v26 = vpop.eup %6226 }
 0x870   : > { %v2858_v36 = vpop.xlane.xlu0 %2857 }
 0x871   : > { %6238 = vrcp.f32 %v2858_v36  ;;  %v6229_v9 = vpop.eup %6228 }
 0x872   : > { %v2861_v58 = vpop.xlane.xlu1 %2860 }
 0x873   : > { %6240 = vrcp.f32 %v2861_v58  ;;  %v6231_v52 = vpop.eup %6230 }
 0x875   : > { %v6233_v54 = vpop.eup %6232 }
 0x89d   : > { %v5780_v4 = vpop.f32.mrb[52].mxu1 }
 0x89e   : > { %v2950_v37 = vpop.f32.mrb[53].mxu1  ;;  %v3031_v28 = vmul.f32 %v6211_v31, %v5780_v4 }
 0x89f   : > { %v5781_v45 = vpop.f32.mrb[54].mxu1  ;;  %v3029_v61 = vmul.f32 %v6215_v23, %v2950_v37 }
 0x8a0   : > { %v3032_v10 = vmul.f32 %v6213_v15, %v5781_v45  ;;  %v2953_v48 = vpop.f32.mrb[55].mxu1 }
 0x8a1   : > { %v3030_v13 = vmul.f32 %v6217_v47, %v2953_v48 }
 0x8a2   : > { %v3046_v27 = vpack.c.bf16 %v3032_v10, %v3031_v28 }
 0x8a3   : > { %v3045_v6 = vpack.c.bf16 %v3030_v13, %v3029_v61 }
 0x8a5   : > { %v5784_v14 = vpop.f32.mrb[56].mxu1  ;;  %5796 = vmatprep.mubr.msk.bf16.mxu1 %vm1132_vm1, %v3045_v6 }
 0x8a6   : > { %v2966_v2 = vpop.f32.mrb[57].mxu1  ;;  %5797 = vmatmul.mubr.msk.bf16.vlgmr.msra.gmra.mrb[36].mxu1 %vm1132_vm1, %v3046_v27  ;;  %v3035_v33 = vmul.f32 %v6219_v53, %v5784_v14 }
 0x8a7   : > { %5855 = vmatpush3.bf16.msra.mxu1 %v7813_v50  ;;  %v5785_v62 = vpop.f32.mrb[58].mxu1  ;;  %v3033_v56 = vmul.f32 %v6223_v38, %v2966_v2 }
 0x8a8   : > { %v3036_v30 = vmul.f32 %v6221_v20, %v5785_v62  ;;  %v2969_v59 = vpop.f32.mrb[59].mxu1  ;;  %5945 = vmatprep.subr.msk.bf16.mxu1 %vm1443_vm6, %v5988_v25 }
 0x8a9   : > { %v3034_v39 = vmul.f32 %v6225_v21, %v2969_v59 }
 0x8aa   : > { %v3048_v24 = vpack.c.bf16 %v3036_v30, %v3035_v33 }
 0x8ab   : > { %v3047_v55 = vpack.c.bf16 %v3034_v39, %v3033_v56  ;;  %5857 = vmatpush3.bf16.msra.mxu1 %v3665_v57 }
 0x8ad   : > { %v5788_v50 = vpop.f32.mrb[60].mxu1  ;;  %5800 = vmatprep.mubr.msk.bf16.mxu1 %vm1132_vm1, %v3047_v55 }
 0x8ae   : > { %v2982_v7 = vpop.f32.mrb[61].mxu1  ;;  %5801 = vmatmul.mubr.msk.bf16.gmra.mrb[40].mxu1 %vm1132_vm1, %v3048_v24  ;;  %v3477_v22 = vpop.xlane.xlu0 %3476  ;;  %v3039_v12 = vmul.f32 %v6227_v26, %v5788_v50 }
 0x8af   : > { %v3523_v42 = vsub.f32 %v7788_v63, %v3477_v22  ;;  %v5789_v51 = vpop.f32.mrb[62].mxu1  ;;  %v3037_v15 = vmul.f32 %v6231_v52, %v2982_v7  ;;  %v6235_v63 = vpop.eup %6234 }
 0x8b0   : > { %v3040_v18 = vmul.f32 %v6229_v9, %v5789_v51  ;;  %v3480_v31 = vpop.xlane.xlu1 %3479  ;;  %v2985_v4 = vpop.f32.mrb[63].mxu1 }
 0x8b1   : > { %v3539_v32 = vmul.f32 1.442695, %v3523_v42  ;;  %v3524_v37 = vsub.f32 %v7794_v29, %v3480_v31  ;;  %v3038_v23 = vmul.f32 %v6233_v54, %v2985_v4  ;;  %v6237_v6 = vpop.eup %6236 }
 0x8b2   : > { %v3050_v11 = vpack.c.bf16 %v3040_v18, %v3039_v12  ;;  %v3483_v45 = vpop.xlane.xlu0 %3482  ;;  %v6239_v25 = vpop.eup %6238 }
 0x8b3   : > { %6242 = vpow2.f32 %v3539_v32  ;;  %v3541_v47 = vmul.f32 1.442695, %v3524_v37  ;;  %v3049_v28 = vpack.c.bf16 %v3038_v23, %v3037_v15  ;;  %v3525_v10 = vsub.f32 %v7791_v35, %v3483_v45  ;;  %v6241_v14 = vpop.eup %6240 }
 0x8b4   : > { %v3486_v48 = vpop.xlane.xlu1 %3485 }
 0x8b5   : > { %6244 = vpow2.f32 %v3541_v47  ;;  %v3543_v61 = vmul.f32 1.442695, %v3525_v10  ;;  %v3526_v13 = vsub.f32 %v7799_v16, %v3486_v48  ;;  %v5792_v27 = vpop.f32.mrb[64].mxu1  ;;  %5804 = vmatprep.mubr.msk.bf16.mxu1 %vm1132_vm1, %v3049_v28 }
 0x8b6   : > { %v2998_v0 = vpop.f32.mrb[65].mxu1  ;;  %5805 = vmatmul.mubr.msk.bf16.gmra.mrb[44].mxu1 %vm1132_vm1, %v3050_v11  ;;  %v3489_v29 = vpop.xlane.xlu0 %3488  ;;  %v3043_v20 = vmul.f32 %v6235_v63, %v5792_v27 }
 0x8b7   : > { %6246 = vpow2.f32 %v3543_v61  ;;  %v3545_v53 = vmul.f32 1.442695, %v3526_v13  ;;  %v3527_v17 = vsub.f32 %v7806_v34, %v3489_v29  ;;  %v5793_v35 = vpop.f32.mrb[66].mxu1  ;;  %v3041_v2 = vmul.f32 %v6239_v25, %v2998_v0 }
 0x8b8   : > { %v3044_v38 = vmul.f32 %v6237_v6, %v5793_v35  ;;  %v3492_v62 = vpop.xlane.xlu1 %3491  ;;  %v3001_v16 = vpop.f32.mrb[67].mxu1 }
 0x8b9   : > { %6248 = vpow2.f32 %v3545_v53  ;;  %v3547_v21 = vmul.f32 1.442695, %v3527_v17  ;;  %v3528_v33 = vsub.f32 %v7819_v41, %v3492_v62  ;;  %v3042_v30 = vmul.f32 %v6241_v14, %v3001_v16 }
 0x8ba   : > { %v3052_v59 = vpack.c.bf16 %v3044_v38, %v3043_v20  ;;  %v3495_v57 = vpop.xlane.xlu0 %3494 }
 0x8bb   : > { %6250 = vpow2.f32 %v3547_v21  ;;  %v3549_v56 = vmul.f32 1.442695, %v3528_v33  ;;  %v3051_v39 = vpack.c.bf16 %v3042_v30, %v3041_v2  ;;  %v3529_v36 = vsub.f32 %v7816_v40, %v3495_v57 }
 0x8bc   : > { %v3498_v34 = vpop.xlane.xlu1 %3497 }
 0x8bd   : > { %v6243_v24 = vpop.eup %6242  ;;  %6252 = vpow2.f32 %v3549_v56  ;;  %v3551_v58 = vmul.f32 1.442695, %v3529_v36  ;;  %v3530_v55 = vsub.f32 %v7825_v60, %v3498_v34  ;;  %5808 = vmatprep.mubr.msk.bf16.mxu1 %vm1132_vm1, %v3051_v39 }
 0x8be   : > { %5809 = vmatmul.mubr.msk.bf16.gmra.mrb[48].mxu1 %vm1132_vm1, %v3052_v59  ;;  %v3501_v26 = vpop.xlane.xlu0 %3500  ;;  %v3571_v41 = vsel %vm1254_vm5, %v6243_v24, 0.0 }
 0x8bf   : > { %v6245_v50 = vpop.eup %6244  ;;  %6254 = vpow2.f32 %v3551_v58  ;;  %v3553_v9 = vmul.f32 1.442695, %v3530_v55  ;;  %v3531_v7 = vsub.f32 %v7832_v43, %v3501_v26  ;;  %3572 = vadd.xlane.f32.xlu0 %v3571_v41  ;;  %v5989_v41 = vld [vmem:[%s8633_s9 + $0x18] sm:$0xff]  }
 0x8c0   : > { %v3504_v40 = vpop.xlane.xlu1 %3503  ;;  %v3574_v22 = vsel %vm1254_vm5, %v6245_v50, 0.0  ;;  %v3619_v52 = vpack.c.bf16 %v6245_v50, %v6243_v24  ;;  %5874 = vmatprep.subr.bf16.mxu1 %v5989_v41 }
 0x8c1   : > { %v6247_v42 = vpop.eup %6246  ;;  %6256 = vpow2.f32 %v3553_v9  ;;  %v3555_v60 = vmul.f32 1.442695, %v3531_v7  ;;  %v3532_v51 = vsub.f32 %v7840_v3, %v3504_v40  ;;  %3575 = vadd.xlane.f32.xlu1 %v3574_v22 }
 0x8c2   : > { %5858 = vmatprep.mubr.msk.bf16.mxu1 %vm1254_vm5, %v3619_v52  ;;  %v3507_v54 = vpop.xlane.xlu0 %3506  ;;  %v3577_v12 = vsel %vm1254_vm5, %v6247_v42, 0.0 }
 0x8c3   : > { %v6249_v18 = vpop.eup %6248  ;;  %6258 = vpow2.f32 %v3555_v60  ;;  %v3557_v31 = vmul.f32 1.442695, %v3532_v51  ;;  %v3533_v43 = vsub.f32 %v7837_v5, %v3507_v54  ;;  %3578 = vadd.xlane.f32.xlu0 %v3577_v12 }
 0x8c4   : > { %v3620_v4 = vpack.c.bf16 %v6249_v18, %v6247_v42  ;;  %v3510_v15 = vpop.xlane.xlu1 %3509  ;;  %v3580_v32 = vsel %vm1254_vm5, %v6249_v18, 0.0 }
 0x8c5   : > { %v6251_v37 = vpop.eup %6250  ;;  %6260 = vpow2.f32 %v3557_v31  ;;  %v3559_v23 = vmul.f32 1.442695, %v3533_v43  ;;  %v3534_v3 = vsub.f32 %v7845_v49, %v3510_v15  ;;  %3581 = vadd.xlane.f32.xlu1 %v3580_v32 }
 0x8c6   : > { %5859 = vmatmul.mubr.msk.bf16.vlgmr.msra.gmra.mrb[68].mxu1 %vm1254_vm5, %v3620_v4  ;;  %v3513_v11 = vpop.xlane.xlu0 %3512  ;;  %v3583_v45 = vsel %vm1254_vm5, %v6251_v37, 0.0 }
 0x8c7   : > { %v6253_v47 = vpop.eup %6252  ;;  %6262 = vpow2.f32 %v3559_v23  ;;  %v3561_v28 = vmul.f32 1.442695, %v3534_v3  ;;  %v3535_v5 = vsub.f32 %v7852_v1, %v3513_v11  ;;  %3584 = vadd.xlane.f32.xlu0 %v3583_v45  ;;  %5875 = vmatpush3.bf16.msra.mxu1 %v5989_v41 }
 0x8c8   : > { %v3516_v10 = vpop.xlane.xlu1 %3515  ;;  %v3586_v48 = vsel %vm1254_vm5, %v6253_v47, 0.0  ;;  %v3621_v63 = vpack.c.bf16 %v6253_v47, %v6251_v37 }
 0x8c9   : > { %v6255_v61 = vpop.eup %6254  ;;  %6264 = vpow2.f32 %v3561_v28  ;;  %v3563_v13 = vmul.f32 1.442695, %v3535_v5  ;;  %v3536_v49 = vsub.f32 %v7860_v8, %v3516_v10  ;;  %3587 = vadd.xlane.f32.xlu1 %v3586_v48 }
 0x8ca   : > { %5862 = vmatprep.mubr.msk.bf16.mxu1 %vm1254_vm5, %v3621_v63  ;;  %v3519_v27 = vpop.xlane.xlu0 %3518  ;;  %v3589_v6 = vsel %vm1254_vm5, %v6255_v61, 0.0 }
 0x8cb   : > { %v6257_v0 = vpop.eup %6256  ;;  %6266 = vpow2.f32 %v3563_v13  ;;  %v3565_v29 = vmul.f32 1.442695, %v3536_v49  ;;  %v3537_v1 = vsub.f32 %v7857_v19, %v3519_v27  ;;  %3590 = vadd.xlane.f32.xlu0 %v3589_v6 }
 0x8cc   : > { %v3522_v25 = vpop.xlane.xlu1 %3521  ;;  %v3592_v53 = vsel %vm1254_vm5, %v6257_v0, 0.0  ;;  %v3622_v17 = vpack.c.bf16 %v6257_v0, %v6255_v61 }
 0x8cd   : > { %v6259_v35 = vpop.eup %6258  ;;  %6268 = vpow2.f32 %v3565_v29  ;;  %v3567_v14 = vmul.f32 1.442695, %v3537_v1  ;;  %v3538_v8 = vsub.f32 %v7865_v44, %v3522_v25  ;;  %3593 = vadd.xlane.f32.xlu1 %v3592_v53 }
 0x8ce   : > { %5863 = vmatmul.mubr.msk.bf16.gmra.mrb[72].mxu1 %vm1254_vm5, %v3622_v17  ;;  %v3595_v20 = vsel %vm1254_vm5, %v6259_v35, 0.0 }
 0x8cf   : > { %v6261_v2 = vpop.eup %6260  ;;  %6270 = vpow2.f32 %v3567_v14  ;;  %v3569_v38 = vmul.f32 1.442695, %v3538_v8  ;;  %3596 = vadd.xlane.f32.xlu0 %v3595_v20 }
 0x8d0   : > { %v3598_v19 = vsel %vm1254_vm5, %v6261_v2, 0.0  ;;  %v3623_v62 = vpack.c.bf16 %v6261_v2, %v6259_v35 }
 0x8d1   : > { %v6263_v16 = vpop.eup %6262  ;;  %6272 = vpow2.f32 %v3569_v38  ;;  %3599 = vadd.xlane.f32.xlu1 %v3598_v19 }
 0x8d2   : > { %5866 = vmatprep.mubr.msk.bf16.mxu1 %vm1254_vm5, %v3623_v62  ;;  %v3601_v21 = vsel %vm1254_vm5, %v6263_v16, 0.0 }
 0x8d3   : > { %v6265_v44 = vpop.eup %6264  ;;  %3602 = vadd.xlane.f32.xlu0 %v3601_v21 }
 0x8d4   : > { %v3604_v33 = vsel %vm1254_vm5, %v6265_v44, 0.0  ;;  %v3624_v30 = vpack.c.bf16 %v6265_v44, %v6263_v16 }
 0x8d5   : > { %v6267_v59 = vpop.eup %6266  ;;  %3605 = vadd.xlane.f32.xlu1 %v3604_v33 }
 0x8d6   : > { %5867 = vmatmul.mubr.msk.bf16.gmra.mrb[76].mxu1 %vm1254_vm5, %v3624_v30  ;;  %v3607_v57 = vsel %vm1254_vm5, %v6267_v59, 0.0 }
 0x8d7   : > { %v6269_v56 = vpop.eup %6268  ;;  %3608 = vadd.xlane.f32.xlu0 %v3607_v57 }
 0x8d8   : > { %v3610_v39 = vsel %vm1254_vm5, %v6269_v56, 0.0  ;;  %v3625_v36 = vpack.c.bf16 %v6269_v56, %v6267_v59 }
 0x8d9   : > { %v6271_v34 = vpop.eup %6270  ;;  %3611 = vadd.xlane.f32.xlu1 %v3610_v39 }
 0x8da   : > { %5870 = vmatprep.mubr.msk.bf16.mxu1 %vm1254_vm5, %v3625_v36  ;;  %v3613_v24 = vsel %vm1254_vm5, %v6271_v34, 0.0 }
 0x8db   : > { %v6273_v58 = vpop.eup %6272  ;;  %3614 = vadd.xlane.f32.xlu0 %v3613_v24 }
 0x8dc   : > { %v3616_v55 = vsel %vm1254_vm5, %v6273_v58, 0.0  ;;  %v3626_v26 = vpack.c.bf16 %v6273_v58, %v6271_v34 }
 0x8dd   : > { %3617 = vadd.xlane.f32.xlu1 %v3616_v55 }
 0x8de   : > { %5871 = vmatmul.mubr.msk.bf16.gmra.mrb[80].mxu1 %vm1254_vm5, %v3626_v26 }
 0x94c   : > { %v3573_v50 = vpop.xlane.xlu0 %3572 }
 0x94d   : > { %6274 = vrcp.f32 %v3573_v50 }
 0x94e   : > { %v3576_v9 = vpop.xlane.xlu1 %3575 }
 0x950   : > { %v3579_v7 = vpop.xlane.xlu0 %3578 }
 0x951   : > { %6276 = vrcp.f32 %v3579_v7 }
 0x952   : > { %v3582_v40 = vpop.xlane.xlu1 %3581 }
 0x953   : > { %6278 = vrcp.f32 %v3582_v40 }
 0x954   : > { %v3585_v22 = vpop.xlane.xlu0 %3584  ;;  %6280 = vrcp.f32 %v3576_v9 }
 0x955   : > { %6282 = vrcp.f32 %v3585_v22 }
 0x956   : > { %v3588_v52 = vpop.xlane.xlu1 %3587 }
 0x957   : > { %v6275_v12 = vpop.eup %6274 }
 0x958   : > { %v3591_v42 = vpop.xlane.xlu0 %3590 }
 0x959   : > { %6284 = vrcp.f32 %v3591_v42 }
 0x95a   : > { %v3594_v60 = vpop.xlane.xlu1 %3593 }
 0x95b   : > { %6286 = vrcp.f32 %v3594_v60  ;;  %v6277_v43 = vpop.eup %6276 }
 0x95c   : > { %v3597_v51 = vpop.xlane.xlu0 %3596  ;;  %6288 = vrcp.f32 %v3588_v52 }
 0x95d   : > { %v6279_v32 = vpop.eup %6278  ;;  %6290 = vrcp.f32 %v3597_v51 }
 0x95e   : > { %v3600_v54 = vpop.xlane.xlu1 %3599  ;;  %v6281_v23 = vpop.eup %6280 }
 0x95f   : > { %v6283_v61 = vpop.eup %6282 }
 0x960   : > { %v3603_v18 = vpop.xlane.xlu0 %3602 }
 0x961   : > { %6292 = vrcp.f32 %v3603_v18 }
 0x962   : > { %v3606_v4 = vpop.xlane.xlu1 %3605 }
 0x963   : > { %6294 = vrcp.f32 %v3606_v4  ;;  %v6285_v49 = vpop.eup %6284  ;;  %v6403_v4 = vld [vmem:[%s6532_s30] sm:$0xff] }
 0x964   : > { %v3609_v10 = vpop.xlane.xlu0 %3608  ;;  %6296 = vrcp.f32 %v3600_v54 }
 0x965   : > { %v6287_v6 = vpop.eup %6286  ;;  %6298 = vrcp.f32 %v3609_v10 }
 0x966   : > { %v3612_v63 = vpop.xlane.xlu1 %3611  ;;  %v6289_v29 = vpop.eup %6288 }
 0x967   : > { %v6291_v38 = vpop.eup %6290 }
 0x968   : > { %v3615_v17 = vpop.xlane.xlu0 %3614 }
 0x969   : > { %6300 = vrcp.f32 %v3615_v17  ;;  %v6408_v17 = vld [vmem:[%s6532_s30 + $0x38] sm:$0xff] }
 0x96a   : > { %v3618_v8 = vpop.xlane.xlu1 %3617 }
 0x96b   : > { %6302 = vrcp.f32 %v3618_v8  ;;  %v6293_v62 = vpop.eup %6292 }
 0x96c   : > { %6304 = vrcp.f32 %v3612_v63 }
 0x96d   : > { %v6295_v21 = vpop.eup %6294 }
 0x96e   : > { %v6297_v33 = vpop.eup %6296 }
 0x96f   : > { %v6299_v24 = vpop.eup %6298 }
 0x973   : > { %v6301_v55 = vpop.eup %6300 }
 0x975   : > { %v6303_v41 = vpop.eup %6302 }
 0x976   : > { %v6305_v9 = vpop.eup %6304 }
 0x999   : > { %v5860_v31 = vpop.f32.mrb[68].mxu1 }
 0x99a   : > { %v3701_v15 = vpop.f32.mrb[69].mxu1  ;;  %v3782_v3 = vmul.f32 %v6277_v43, %v5860_v31  ;;  %v6402_v31 = vld [vmem:[%s6532_s30 + $0x10] sm:$0xff] }
 0x99b   : > { %v5861_v37 = vpop.f32.mrb[70].mxu1  ;;  %v3780_v47 = vmul.f32 %v6275_v12, %v3701_v15  ;;  %v7941_v12 = vld [vmem:[%s8634_s10] ss:$0 sm:$0xff] }
 0x99c   : > { %v3783_v11 = vmul.f32 %v6279_v32, %v5861_v37  ;;  %v3704_v45 = vpop.f32.mrb[71].mxu1 }
 0x99d   : > { %v3781_v28 = vmul.f32 %v6281_v23, %v3704_v45  ;;  %v6405_v45 = vld [vmem:[%s6532_s30 + $0x8] sm:$0xff] }
 0x99e   : > { %v3797_v5 = vpack.c.bf16 %v3783_v11, %v3782_v3  ;;  %v6404_v3 = vld [vmem:[%s6532_s30 + $0x18] sm:$0xff] }
 0x99f   : > { %v3796_v48 = vpack.c.bf16 %v3781_v28, %v3780_v47 }
 0x9a1   : > { %v5864_v13 = vpop.f32.mrb[72].mxu1  ;;  %5876 = vmatprep.mubr.msk.bf16.mxu1 %vm1132_vm1, %v3796_v48 }
 0x9a2   : > { %v3717_v27 = vpop.f32.mrb[73].mxu1  ;;  %5877 = vmatmul.mubr.msk.bf16.vlgmr.msra.gmra.mrb[36].mxu1 %vm1132_vm1, %v3797_v5  ;;  %v3786_v1 = vmul.f32 %v6285_v49, %v5864_v13  ;;  %v6406_v49 = vld [vmem:[%s6532_s30 + $0x30] sm:$0xff] }
 0x9a3   : > { %v5865_v0 = vpop.f32.mrb[74].mxu1  ;;  %v3784_v35 = vmul.f32 %v6283_v61, %v3717_v27 }
 0x9a4   : > { %v3787_v25 = vmul.f32 %v6287_v6, %v5865_v0  ;;  %v3720_v53 = vpop.f32.mrb[75].mxu1  ;;  %v6407_v6 = vld [vmem:[%s6532_s30 + $0x20] sm:$0xff] }
 0x9a5   : > { %v3785_v14 = vmul.f32 %v6289_v29, %v3720_v53 }
 0x9a6   : > { %v3799_v20 = vpack.c.bf16 %v3787_v25, %v3786_v1 }
 0x9a7   : > { %v3798_v2 = vpack.c.bf16 %v3785_v14, %v3784_v35  ;;  %v6409_v14 = vld [vmem:[%s6532_s30 + $0x28] sm:$0xff] }
 0x9a9   : > { %v5868_v19 = vpop.f32.mrb[76].mxu1  ;;  %5880 = vmatprep.mubr.msk.bf16.mxu1 %vm1132_vm1, %v3798_v2 }
 0x9aa   : > { %v3733_v16 = vpop.f32.mrb[77].mxu1  ;;  %5881 = vmatmul.mubr.msk.bf16.gmra.mrb[40].mxu1 %vm1132_vm1, %v3799_v20  ;;  %v3790_v30 = vmul.f32 %v6293_v62, %v5868_v19 }
 0x9ab   : > { %v5869_v44 = vpop.f32.mrb[78].mxu1  ;;  %v3788_v56 = vmul.f32 %v6291_v38, %v3733_v16 }
 0x9ac   : > { %v3791_v59 = vmul.f32 %v6295_v21, %v5869_v44  ;;  %v3736_v57 = vpop.f32.mrb[79].mxu1 }
 0x9ad   : > { %v3789_v39 = vmul.f32 %v6297_v33, %v3736_v57  ;;  %v6410_v33 = vld [vmem:[%s6532_s30 + $0x50] sm:$0xff] }
 0x9ae   : > { %v3801_v36 = vpack.c.bf16 %v3791_v59, %v3790_v30  ;;  %v6411_v59 = vld [vmem:[%s6532_s30 + $0x40] sm:$0xff] }
 0x9af   : > { %v3800_v34 = vpack.c.bf16 %v3789_v39, %v3788_v56 }
 0x9b1   : > { %v5872_v58 = vpop.f32.mrb[80].mxu1  ;;  %5884 = vmatprep.mubr.msk.bf16.mxu1 %vm1132_vm1, %v3800_v34 }
 0x9b2   : > { %v3749_v26 = vpop.f32.mrb[81].mxu1  ;;  %5885 = vmatmul.mubr.msk.bf16.gmra.mrb[44].mxu1 %vm1132_vm1, %v3801_v36  ;;  %v3794_v7 = vmul.f32 %v6301_v55, %v5872_v58  ;;  %v6413_v55 = vld [vmem:[%s6532_s30 + $0x48] sm:$0xff] }
 0x9b3   : > { %v5873_v50 = vpop.f32.mrb[82].mxu1  ;;  %v3792_v52 = vmul.f32 %v6299_v24, %v3749_v26  ;;  %v6412_v24 = vld [vmem:[%s6532_s30 + $0x58] sm:$0xff] }
 0x9b4   : > { %v3795_v40 = vmul.f32 %v6303_v41, %v5873_v50  ;;  %v3752_v22 = vpop.f32.mrb[83].mxu1 }
 0x9b5   : > { %v3793_v42 = vmul.f32 %v6305_v9, %v3752_v22 }
 0x9b6   : > { %v3803_v60 = vpack.c.bf16 %v3795_v40, %v3794_v7 }
 0x9b7   : > { %v3802_v51 = vpack.c.bf16 %v3793_v42, %v3792_v52 }
 0x9b9   : > { %5888 = vmatprep.mubr.msk.bf16.mxu1 %vm1132_vm1, %v3802_v51 }
 0x9ba   : > { %5889 = vmatmul.mubr.msk.bf16.gmra.mrb[48].mxu1 %vm1132_vm1, %v3803_v60  ;;  %v6414_v60 = vld [vmem:[%s6532_s30 + $0x70] sm:$0xff] }
 0xa75   : > { %v5878_v54 = vpop.f32.mrb[36].mxu1 }
 0xa76   : > { %v3871_v18 = vpop.f32.mrb[37].mxu1  ;;  %v3952_v43 = vadd.f32 %v6402_v31, %v5878_v54  ;;  %v6415_v54 = vld [vmem:[%s6532_s30 + $0x60] sm:$0xff] }
 0xa77   : > { %v3950_v15 = vadd.f32 %v6403_v4, %v3871_v18  ;;  %v5879_v32 = vpop.f32.mrb[38].mxu1 }
 0xa78   : > { %v3874_v37 = vpop.f32.mrb[39].mxu1  ;;  %v3953_v11 = vadd.f32 %v6404_v3, %v5879_v32  ;;  %v7951_v28 = vadd.f32 %v7941_v12, %v3952_v43  ;;  %v6416_v32 = vld [vmem:[%s6532_s30 + $0x78] sm:$0xff]  ;;  %v6417_v3 = vld [vmem:[%s6532_s30 + $0x68] sm:$0xff] }
 0xa79   : > { %v7946_v23 = vadd.f32 %v7941_v12, %v3950_v15  ;;  %v3951_v47 = vadd.f32 %v6405_v45, %v3874_v37 }
 0xa7a   : > { %v7959_v48 = vadd.f32 %v7941_v12, %v3953_v11  ;;  %v3997_v1 = vsel %vm593_vm0, %v7951_v28, 0.0 }
 0xa7b   : > { %v7954_v5 = vadd.f32 %v7941_v12, %v3951_v47  ;;  %v3991_v10 = vsel %vm593_vm0, %v7946_v23, 0.0 }
 0xa7c   : > { %3992 = vadd.xlane.f32.xlu0 %v3991_v10  ;;  %v4000_v20 = vsel %vm593_vm0, %v7959_v48, 0.0 }
 0xa7d   : > { %v5882_v63 = vpop.f32.mrb[40].mxu1  ;;  %v3994_v61 = vsel %vm593_vm0, %v7954_v5, 0.0 }
 0xa7e   : > { %3995 = vadd.xlane.f32.xlu1 %v3994_v61  ;;  %v3887_v13 = vpop.f32.mrb[41].mxu1  ;;  %v3956_v27 = vadd.f32 %v6406_v49, %v5882_v63 }
 0xa7f   : > { %v3954_v0 = vadd.f32 %v6407_v6, %v3887_v13  ;;  %v5883_v29 = vpop.f32.mrb[42].mxu1  ;;  %v5990_v6 = vld [vmem:[%s8637_s13] ss:$8 sps:$4 sm:$0xff]  }
 0xa80   : > { %3998 = vadd.xlane.f32.xlu0 %v3997_v1  ;;  %v3890_v25 = vpop.f32.mrb[43].mxu1  ;;  %v3957_v35 = vadd.f32 %v6408_v17, %v5883_v29  ;;  %v7975_v2 = vadd.f32 %v7941_v12, %v3956_v27 }
 0xa81   : > { %v7968_v53 = vadd.f32 %v7941_v12, %v3954_v0  ;;  %v3955_v8 = vadd.f32 %v6409_v14, %v3890_v25 }
 0xa82   : > { %4001 = vadd.xlane.f32.xlu1 %v4000_v20  ;;  %v7983_v62 = vadd.f32 %v7941_v12, %v3957_v35  ;;  %v4009_v39 = vsel %vm593_vm0, %v7975_v2, 0.0 }
 0xa83   : > { %v7978_v38 = vadd.f32 %v7941_v12, %v3955_v8  ;;  %v4003_v19 = vsel %vm593_vm0, %v7968_v53, 0.0 }
 0xa84   : > { %4004 = vadd.xlane.f32.xlu0 %v4003_v19  ;;  %v4012_v41 = vsel %vm593_vm0, %v7983_v62, 0.0 }
 0xa85   : > { %v5886_v16 = vpop.f32.mrb[44].mxu1  ;;  %v4006_v21 = vsel %vm593_vm0, %v7978_v38, 0.0 }
 0xa86   : > { %4007 = vadd.xlane.f32.xlu1 %v4006_v21  ;;  %v3903_v44 = vpop.f32.mrb[45].mxu1  ;;  %v3960_v30 = vadd.f32 %v6410_v33, %v5886_v16 }
 0xa87   : > { %v3958_v57 = vadd.f32 %v6411_v59, %v3903_v44  ;;  %v5887_v56 = vpop.f32.mrb[46].mxu1 }
 0xa88   : > { %4010 = vadd.xlane.f32.xlu0 %v4009_v39  ;;  %v3906_v36 = vpop.f32.mrb[47].mxu1  ;;  %v3961_v58 = vadd.f32 %v6412_v24, %v5887_v56  ;;  %v7999_v50 = vadd.f32 %v7941_v12, %v3960_v30 }
 0xa89   : > { %v7992_v34 = vadd.f32 %v7941_v12, %v3958_v57  ;;  %v3959_v26 = vadd.f32 %v6413_v55, %v3906_v36 }
 0xa8a   : > { %4013 = vadd.xlane.f32.xlu1 %v4012_v41  ;;  %v8007_v40 = vadd.f32 %v7941_v12, %v3961_v58  ;;  %v4021_v43 = vsel %vm593_vm0, %v7999_v50, 0.0 }
 0xa8b   : > { %v8002_v9 = vadd.f32 %v7941_v12, %v3959_v26  ;;  %v4015_v7 = vsel %vm593_vm0, %v7992_v34, 0.0 }
 0xa8c   : > { %4016 = vadd.xlane.f32.xlu0 %v4015_v7  ;;  %v4024_v45 = vsel %vm593_vm0, %v8007_v40, 0.0 }
 0xa8d   : > { %v5890_v22 = vpop.f32.mrb[48].mxu1  ;;  %v4018_v52 = vsel %vm593_vm0, %v8002_v9, 0.0 }
 0xa8e   : > { %4019 = vadd.xlane.f32.xlu1 %v4018_v52  ;;  %v3919_v42 = vpop.f32.mrb[49].mxu1  ;;  %v3964_v51 = vadd.f32 %v6414_v60, %v5890_v22 }
 0xa8f   : > { %v3962_v18 = vadd.f32 %v6415_v54, %v3919_v42  ;;  %v5891_v31 = vpop.f32.mrb[50].mxu1 }
 0xa90   : > { %4022 = vadd.xlane.f32.xlu0 %v4021_v43  ;;  %v3922_v4 = vpop.f32.mrb[51].mxu1  ;;  %v3965_v37 = vadd.f32 %v6416_v32, %v5891_v31  ;;  %v8023_v47 = vadd.f32 %v7941_v12, %v3964_v51 }
 0xa91   : > { %v8016_v15 = vadd.f32 %v7941_v12, %v3962_v18  ;;  %v3963_v11 = vadd.f32 %v6417_v3, %v3922_v4 }
 0xa92   : > { %4025 = vadd.xlane.f32.xlu1 %v4024_v45  ;;  %v8031_v61 = vadd.f32 %v7941_v12, %v3965_v37  ;;  %v4033_v49 = vsel %vm593_vm0, %v8023_v47, 0.0 }
 0xa93   : > { %v8026_v10 = vadd.f32 %v7941_v12, %v3963_v11  ;;  %v4027_v63 = vsel %vm593_vm0, %v8016_v15, 0.0  ;;  %v5992_v12 = vld [vmem:[%s8637_s13 + $0x4] ss:$8 sps:$4 sm:$0xff]  }
 0xa94   : > { %4028 = vadd.xlane.f32.xlu0 %v4027_v63  ;;  %v4036_v27 = vsel %vm593_vm0, %v8031_v61, 0.0  ;;  %4335 = vmatprep.subr.bf16.mxu0 %v5992_v12 }
 0xa95   : > { %v4030_v13 = vsel %vm593_vm0, %v8026_v10, 0.0  ;;  %4336 = vmatpush1.bf16.msra.mxu0 %v5990_v6 }
 0xa96   : > { %4031 = vadd.xlane.f32.xlu1 %v4030_v13 }
 0xa98   : > { %4034 = vadd.xlane.f32.xlu0 %v4033_v49 }
 0xa9a   : > { %4037 = vadd.xlane.f32.xlu1 %v4036_v27 }
 0xb09   : > { %v3993_v0 = vpop.xlane.xlu0 %3992 }
 0xb0a   : > { %v4039_v29 = vmul.f32 0.015625, %v3993_v0 }
 0xb0b   : > { %v3996_v1 = vpop.xlane.xlu1 %3995 }
 0xb0c   : > { %v8046_v25 = vsub.f32 %v7946_v23, %v4039_v29  ;;  %v4040_v17 = vmul.f32 0.015625, %v3996_v1 }
 0xb0d   : > { %v3999_v35 = vpop.xlane.xlu0 %3998 }
 0xb0e   : > { %v8049_v14 = vsub.f32 %v7954_v5, %v4040_v17  ;;  %v4041_v8 = vmul.f32 0.015625, %v3999_v35  ;;  %v4071_v20 = vmul.f32 %v8046_v25, %v8046_v25 }
 0xb0f   : > { %v4002_v19 = vpop.xlane.xlu1 %4001 }
 0xb10   : > { %v8054_v16 = vsub.f32 %v7951_v28, %v4041_v8  ;;  %v4042_v21 = vmul.f32 0.015625, %v4002_v19  ;;  %v4087_v44 = vsel %vm593_vm0, %v4071_v20, 0.0  ;;  %v4072_v33 = vmul.f32 %v8049_v14, %v8049_v14 }
 0xb11   : > { %4088 = vadd.xlane.f32.xlu0 %v4087_v44  ;;  %v4005_v30 = vpop.xlane.xlu0 %4004 }
 0xb12   : > { %v8060_v59 = vsub.f32 %v7959_v48, %v4042_v21  ;;  %v4043_v57 = vmul.f32 0.015625, %v4005_v30  ;;  %v4090_v56 = vsel %vm593_vm0, %v4072_v33, 0.0  ;;  %v4073_v39 = vmul.f32 %v8054_v16, %v8054_v16 }
 0xb13   : > { %v4008_v36 = vpop.xlane.xlu1 %4007  ;;  %4091 = vadd.xlane.f32.xlu1 %v4090_v56 }
 0xb14   : > { %v8066_v24 = vsub.f32 %v7968_v53, %v4043_v57  ;;  %v4044_v58 = vmul.f32 0.015625, %v4008_v36  ;;  %v4093_v55 = vsel %vm593_vm0, %v4073_v39, 0.0  ;;  %v4074_v26 = vmul.f32 %v8060_v59, %v8060_v59 }
 0xb15   : > { %4094 = vadd.xlane.f32.xlu0 %v4093_v55  ;;  %v4011_v41 = vpop.xlane.xlu0 %4010 }
 0xb16   : > { %v8072_v7 = vsub.f32 %v7978_v38, %v4044_v58  ;;  %v4045_v22 = vmul.f32 0.015625, %v4011_v41  ;;  %v4096_v52 = vsel %vm593_vm0, %v4074_v26, 0.0  ;;  %v4075_v42 = vmul.f32 %v8066_v24, %v8066_v24 }
 0xb17   : > { %v4014_v60 = vpop.xlane.xlu1 %4013  ;;  %4097 = vadd.xlane.f32.xlu1 %v4096_v52 }
 0xb18   : > { %v8078_v51 = vsub.f32 %v7975_v2, %v4045_v22  ;;  %v4046_v54 = vmul.f32 0.015625, %v4014_v60  ;;  %v4099_v18 = vsel %vm593_vm0, %v4075_v42, 0.0  ;;  %v4076_v31 = vmul.f32 %v8072_v7, %v8072_v7 }
 0xb19   : > { %4100 = vadd.xlane.f32.xlu0 %v4099_v18  ;;  %v4017_v43 = vpop.xlane.xlu0 %4016 }
 0xb1a   : > { %v8084_v4 = vsub.f32 %v7983_v62, %v4046_v54  ;;  %v4047_v32 = vmul.f32 0.015625, %v4017_v43  ;;  %v4102_v37 = vsel %vm593_vm0, %v4076_v31, 0.0  ;;  %v4077_v3 = vmul.f32 %v8078_v51, %v8078_v51 }
 0xb1b   : > { %v4020_v11 = vpop.xlane.xlu1 %4019  ;;  %4103 = vadd.xlane.f32.xlu1 %v4102_v37 }
 0xb1c   : > { %v8090_v45 = vsub.f32 %v7992_v34, %v4047_v32  ;;  %v4048_v63 = vmul.f32 0.015625, %v4020_v11  ;;  %v4105_v13 = vsel %vm593_vm0, %v4077_v3, 0.0  ;;  %v4078_v49 = vmul.f32 %v8084_v4, %v8084_v4  ;;  %v5995_v3 = vld [vmem:[%s8637_s13 + $0x14] ss:$8 sps:$4 sm:$0xff]  }
 0xb1d   : > { %4106 = vadd.xlane.f32.xlu0 %v4105_v13  ;;  %v4023_v27 = vpop.xlane.xlu0 %4022  ;;  %v5993_v13 = vld [vmem:[%s8637_s13 + $0x10] ss:$8 sps:$4 sm:$0xff]   ;;  %4337 = vmatprep.subr.bf16.mxu0 %v5995_v3 }
 0xb1e   : > { %v8096_v6 = vsub.f32 %v8002_v9, %v4048_v63  ;;  %v4049_v12 = vmul.f32 0.015625, %v4023_v27  ;;  %v4108_v0 = vsel %vm593_vm0, %v4078_v49, 0.0  ;;  %v4079_v29 = vmul.f32 %v8090_v45, %v8090_v45  ;;  %4338 = vmatpush1.bf16.msra.mxu0 %v5993_v13  ;;  %v5998_v27 = vld [vmem:[%s8637_s13 + $0x24] ss:$8 sps:$4 sm:$0xff]  }
 0xb1f   : > { %v4026_v1 = vpop.xlane.xlu1 %4025  ;;  %4109 = vadd.xlane.f32.xlu1 %v4108_v0  ;;  %4339 = vmatprep.subr.bf16.mxu0 %v5998_v27  ;;  %v6001_v0 = vld [vmem:[%s8637_s13 + $0x34] ss:$8 sps:$4 sm:$0xff]  }
 0xb20   : > { %v8102_v17 = vsub.f32 %v7999_v50, %v4049_v12  ;;  %v4050_v35 = vmul.f32 0.015625, %v4026_v1  ;;  %v4111_v8 = vsel %vm593_vm0, %v4079_v29, 0.0  ;;  %v4080_v20 = vmul.f32 %v8096_v6, %v8096_v6  ;;  %v5996_v12 = vld [vmem:[%s8637_s13 + $0x20] ss:$8 sps:$4 sm:$0xff]   ;;  %v5999_v29 = vld [vmem:[%s8637_s13 + $0x30] ss:$8 sps:$4 sm:$0xff]  }
 0xb21   : > { %4112 = vadd.xlane.f32.xlu0 %v4111_v8  ;;  %v4029_v19 = vpop.xlane.xlu0 %4028 }
 0xb22   : > { %v8108_v21 = vsub.f32 %v8007_v40, %v4050_v35  ;;  %v4051_v44 = vmul.f32 0.015625, %v4029_v19  ;;  %v4114_v33 = vsel %vm593_vm0, %v4080_v20, 0.0  ;;  %v4081_v30 = vmul.f32 %v8102_v17, %v8102_v17  ;;  %4340 = vmatpush1.bf16.msra.mxu0 %v5996_v12 }
 0xb23   : > { %4115 = vadd.xlane.f32.xlu1 %v4114_v33  ;;  %v4032_v57 = vpop.xlane.xlu1 %4031  ;;  %4341 = vmatprep.subr.bf16.mxu0 %v6001_v0  ;;  %v8170_v0 = vld [vmem:[%s8636_s12] ss:$0 sm:$0xff] }
 0xb24   : > { %v8114_v56 = vsub.f32 %v8016_v15, %v4051_v44  ;;  %v4052_v39 = vmul.f32 0.015625, %v4032_v57  ;;  %v4117_v36 = vsel %vm593_vm0, %v4081_v30, 0.0  ;;  %v4082_v58 = vmul.f32 %v8108_v21, %v8108_v21 }
 0xb25   : > { %4118 = vadd.xlane.f32.xlu0 %v4117_v36  ;;  %v4035_v55 = vpop.xlane.xlu0 %4034 }
 0xb26   : > { %v8120_v26 = vsub.f32 %v8026_v10, %v4052_v39  ;;  %v4053_v41 = vmul.f32 0.015625, %v4035_v55  ;;  %v4120_v22 = vsel %vm593_vm0, %v4082_v58, 0.0  ;;  %v4083_v52 = vmul.f32 %v8114_v56, %v8114_v56  ;;  %4342 = vmatpush1.bf16.msra.mxu0 %v5999_v29 }
 0xb27   : > { %4121 = vadd.xlane.f32.xlu1 %v4120_v22  ;;  %v4038_v42 = vpop.xlane.xlu1 %4037 }
 0xb28   : > { %v8126_v60 = vsub.f32 %v8023_v47, %v4053_v41  ;;  %v4054_v54 = vmul.f32 0.015625, %v4038_v42  ;;  %v4123_v18 = vsel %vm593_vm0, %v4083_v52, 0.0  ;;  %v4084_v31 = vmul.f32 %v8120_v26, %v8120_v26 }
 0xb29   : > { %4124 = vadd.xlane.f32.xlu0 %v4123_v18 }
 0xb2a   : > { %v8132_v43 = vsub.f32 %v8031_v61, %v4054_v54  ;;  %v4126_v32 = vsel %vm593_vm0, %v4084_v31, 0.0  ;;  %v4085_v37 = vmul.f32 %v8126_v60, %v8126_v60 }
 0xb2b   : > { %4127 = vadd.xlane.f32.xlu1 %v4126_v32 }
 0xb2c   : > { %v4129_v11 = vsel %vm593_vm0, %v4085_v37, 0.0  ;;  %v4086_v63 = vmul.f32 %v8132_v43, %v8132_v43  ;;  %v8162_v37 = vld [vmem:[%s8635_s11] ss:$0 sm:$0xff] }
 0xb2d   : > { %4130 = vadd.xlane.f32.xlu0 %v4129_v11 }
 0xb2e   : > { %v4132_v49 = vsel %vm593_vm0, %v4086_v63, 0.0 }
 0xb2f   : > { %4133 = vadd.xlane.f32.xlu1 %v4132_v49 }
 0xb9e   : > { %v4089_v1 = vpop.xlane.xlu0 %4088 }
 0xb9f   : > { %v4135_v35 = vmul.f32 0.015625, %v4089_v1 }
 0xba0   : > { %v4092_v8 = vpop.xlane.xlu1 %4091 }
 0xba1   : > { %v4151_v20 = vadd.f32 1e-05, %v4135_v35  ;;  %v4136_v19 = vmul.f32 0.015625, %v4092_v8 }
 0xba2   : > { %v4095_v44 = vpop.xlane.xlu0 %4094 }
 0xba3   : > { %6306 = vrsqrt.f32 %v4151_v20  ;;  %v4152_v33 = vadd.f32 1e-05, %v4136_v19  ;;  %v4137_v30 = vmul.f32 0.015625, %v4095_v44 }
 0xba4   : > { %v4098_v57 = vpop.xlane.xlu1 %4097 }
 0xba5   : > { %6308 = vrsqrt.f32 %v4152_v33  ;;  %v4153_v39 = vadd.f32 1e-05, %v4137_v30  ;;  %v4138_v36 = vmul.f32 0.015625, %v4098_v57 }
 0xba6   : > { %v4101_v58 = vpop.xlane.xlu0 %4100 }
 0xba7   : > { %6310 = vrsqrt.f32 %v4153_v39  ;;  %v4154_v55 = vadd.f32 1e-05, %v4138_v36  ;;  %v4139_v41 = vmul.f32 0.015625, %v4101_v58 }
 0xba8   : > { %v4104_v22 = vpop.xlane.xlu1 %4103 }
 0xba9   : > { %6312 = vrsqrt.f32 %v4154_v55  ;;  %v4140_v52 = vmul.f32 0.015625, %v4104_v22  ;;  %v4155_v42 = vadd.f32 1e-05, %v4139_v41 }
 0xbaa   : > { %v4107_v18 = vpop.xlane.xlu0 %4106 }
 0xbab   : > { %v4156_v54 = vadd.f32 1e-05, %v4140_v52  ;;  %v4141_v13 = vmul.f32 0.015625, %v4107_v18 }
 0xbac   : > { %v4110_v31 = vpop.xlane.xlu1 %4109 }
 0xbad   : > { %v6307_v32 = vpop.eup %6306  ;;  %6314 = vrsqrt.f32 %v4156_v54  ;;  %v4142_v3 = vmul.f32 0.015625, %v4110_v31  ;;  %v4157_v20 = vadd.f32 1e-05, %v4141_v13 }
 0xbae   : > { %v4183_v11 = vmul.f32 %v6307_v32, %v8046_v25  ;;  %6316 = vrsqrt.f32 %v4155_v42  ;;  %v4113_v33 = vpop.xlane.xlu0 %4112 }
 0xbaf   : > { %v6309_v63 = vpop.eup %6308  ;;  %v4158_v29 = vadd.f32 1e-05, %v4142_v3  ;;  %v4143_v58 = vmul.f32 0.015625, %v4113_v33 }
 0xbb0   : > { %v4205_v49 = vmul.f32 %v8162_v37, %v4183_v11  ;;  %v4184_v27 = vmul.f32 %v6309_v63, %v8049_v14  ;;  %v4116_v35 = vpop.xlane.xlu1 %4115 }
 0xbb1   : > { %v6311_v12 = vpop.eup %6310  ;;  %6318 = vrsqrt.f32 %v4158_v29  ;;  %v4144_v30 = vmul.f32 0.015625, %v4116_v35  ;;  %v4159_v42 = vadd.f32 1e-05, %v4143_v58 }
 0xbb2   : > { %v4206_v1 = vmul.f32 %v8162_v37, %v4184_v27  ;;  %v4227_v25 = vadd.f32 %v8170_v0, %v4205_v49  ;;  %v4185_v44 = vmul.f32 %v6311_v12, %v8054_v16  ;;  %6320 = vrsqrt.f32 %v4157_v20  ;;  %v4119_v18 = vpop.xlane.xlu0 %4118 }
 0xbb3   : > { %v6313_v8 = vpop.eup %6312  ;;  %v4160_v22 = vadd.f32 1e-05, %v4144_v30  ;;  %v4145_v13 = vmul.f32 0.015625, %v4119_v18 }
 0xbb4   : > { %v4228_v19 = vadd.f32 %v8170_v0, %v4206_v1  ;;  %v4186_v14 = vmul.f32 %v6313_v8, %v8060_v59  ;;  %v4207_v55 = vmul.f32 %v8162_v37, %v4185_v44  ;;  %v4122_v59 = vpop.xlane.xlu1 %4121 }
 0xbb5   : > { %6322 = vrsqrt.f32 %v4160_v22  ;;  %v4146_v32 = vmul.f32 0.015625, %v4122_v59  ;;  %v4161_v1 = vadd.f32 1e-05, %v4145_v13 }
 0xbb6   : > { %v4243_v57 = vpack.c.bf16 %v4228_v19, %v4227_v25  ;;  %v4208_v39 = vmul.f32 %v8162_v37, %v4186_v14  ;;  %v4229_v31 = vadd.f32 %v8170_v0, %v4207_v55  ;;  %6324 = vrsqrt.f32 %v4159_v42  ;;  %v4125_v8 = vpop.xlane.xlu0 %4124 }
 0xbb7   : > { %v6315_v36 = vpop.eup %6314  ;;  %v4162_v27 = vadd.f32 1e-05, %v4146_v32  ;;  %v4147_v33 = vmul.f32 0.015625, %v4125_v8 }
 0xbb8   : > { %5321 = vmatmul.mubr.msk.bf16.vlgmr.msra.gmra.mrb[124].mxu0 %vm593_vm0, %v4243_v57  ;;  %v6317_v41 = vpop.eup %6316  ;;  %v4188_v16 = vmul.f32 %v6315_v36, %v8072_v7  ;;  %v4230_v52 = vadd.f32 %v8170_v0, %v4208_v39  ;;  %v4128_v12 = vpop.xlane.xlu1 %4127 }
 0xbb9   : > { %4377 = vmatprep.mubr.bf16.mxu0 %v8748_v46  ;;  %v4187_v54 = vmul.f32 %v6317_v41, %v8066_v24  ;;  %6326 = vrsqrt.f32 %v4162_v27  ;;  %v4148_v25 = vmul.f32 0.015625, %v4128_v12  ;;  %v4163_v58 = vadd.f32 1e-05, %v4147_v33 }
 0xbba   : > { %v4244_v3 = vpack.c.bf16 %v4230_v52, %v4229_v31  ;;  %v4210_v11 = vmul.f32 %v8162_v37, %v4188_v16  ;;  %6328 = vrsqrt.f32 %v4161_v1  ;;  %v4131_v41 = vpop.xlane.xlu0 %4130 }
 0xbbb   : > { %v6319_v63 = vpop.eup %6318  ;;  %v4209_v7 = vmul.f32 %v8162_v37, %v4187_v54  ;;  %v4164_v57 = vadd.f32 1e-05, %v4148_v25  ;;  %v4149_v54 = vmul.f32 0.015625, %v4131_v41  ;;  %v6011_v41 = vld [vmem:[%s8639_s15 + $0x20] sm:$0xff]  }
 0xbbc   : > { %v6321_v49 = vpop.eup %6320  ;;  %v4190_v24 = vmul.f32 %v6319_v63, %v8084_v4  ;;  %v4232_v29 = vadd.f32 %v8170_v0, %v4210_v11  ;;  %v4134_v39 = vpop.xlane.xlu1 %4133 }
 0xbbd   : > { %v4189_v35 = vmul.f32 %v6321_v49, %v8078_v51  ;;  %v4231_v20 = vadd.f32 %v8170_v0, %v4209_v7  ;;  %6330 = vrsqrt.f32 %v4164_v57  ;;  %v4150_v16 = vmul.f32 0.015625, %v4134_v39  ;;  %v6007_v39 = vld [vmem:[%s8639_s15 + $0x10] sm:$0xff]  }
 0xbbe   : > { %v4212_v44 = vmul.f32 %v8162_v37, %v4190_v24  ;;  %6332 = vrsqrt.f32 %v4163_v58  ;;  %v6009_v58 = vld [vmem:[%s8639_s15 + $0x18] sm:$0xff]  }
 0xbbf   : > { %v4245_v19 = vpack.c.bf16 %v4232_v29, %v4231_v20  ;;  %v6323_v14 = vpop.eup %6322  ;;  %v4211_v4 = vmul.f32 %v8162_v37, %v4189_v35  ;;  %v4166_v31 = vadd.f32 1e-05, %v4150_v16  ;;  %v6013_v16 = vld [vmem:[%s8639_s15 + $0x28] sm:$0xff]  }
 0xbc0   : > { %5322 = vmatmul.mubr.msk.bf16.gmra.mrb[128].mxu0 %vm593_vm0, %v4244_v3  ;;  %v6325_v30 = vpop.eup %6324  ;;  %v4192_v51 = vmul.f32 %v6323_v14, %v8096_v6  ;;  %v4234_v36 = vadd.f32 %v8170_v0, %v4212_v44  ;;  %v4165_v3 = vadd.f32 1e-05, %v4149_v54  ;;  %v6017_v54 = vld [vmem:[%s8639_s15 + $0x38] sm:$0xff]  }
 0xbc1   : > { %4387 = vmatprep.mubr.bf16.mxu0 %v8748_v46  ;;  %v4191_v55 = vmul.f32 %v6325_v30, %v8090_v45  ;;  %v4233_v22 = vadd.f32 %v8170_v0, %v4211_v4  ;;  %6334 = vrsqrt.f32 %v4166_v31 }
 0xbc2   : > { %v4214_v52 = vmul.f32 %v8162_v37, %v4192_v51  ;;  %6336 = vrsqrt.f32 %v4165_v3  ;;  %v6003_v51 = vld [vmem:[%s8639_s15] sm:$0xff]  }
 0xbc3   : > { %v4246_v59 = vpack.c.bf16 %v4234_v36, %v4233_v22  ;;  %v6327_v42 = vpop.eup %6326  ;;  %v4213_v6 = vmul.f32 %v8162_v37, %v4191_v55  ;;  %v6008_v36 = vld [vmem:[%s8639_s15 + $0x58] sm:$0xff]   ;;  %v6010_v55 = vld [vmem:[%s8639_s15 + $0x60] sm:$0xff]   ;;  %v6012_v22 = vld [vmem:[%s8639_s15 + $0x68] sm:$0xff]  }
 0xbc4   : > { %v6329_v18 = vpop.eup %6328  ;;  %v4194_v45 = vmul.f32 %v6327_v42, %v8108_v21  ;;  %v4236_v32 = vadd.f32 %v8170_v0, %v4214_v52  ;;  %v6015_v52 = vld [vmem:[%s8639_s15 + $0x30] sm:$0xff]   ;;  %v6016_v42 = vld [vmem:[%s8639_s15 + $0x78] sm:$0xff]  }
 0xbc5   : > { %v4193_v11 = vmul.f32 %v6329_v18, %v8102_v17  ;;  %v4235_v63 = vadd.f32 %v8170_v0, %v4213_v6  ;;  %v4261_v6 = vlaneseq }
 0xbc6   : > { %v4216_v7 = vmul.f32 %v8162_v37, %v4194_v45  ;;  %v4259_v45 = vld [vmem:[%s8638_s14] sm:$0x3] }
 0xbc7   : > { %v4247_v13 = vpack.c.bf16 %v4236_v32, %v4235_v63  ;;  %v6331_v49 = vpop.eup %6330  ;;  %v4215_v27 = vmul.f32 %v8162_v37, %v4193_v11  ;;  %v4262_v18 = vshrl.u32 %v4261_v6, 7 }
 0xbc8   : > { %5323 = vmatmul.mubr.msk.bf16.gmra.mrb[132].mxu0 %vm593_vm0, %v4245_v19  ;;  %v6333_v24 = vpop.eup %6332  ;;  %v4196_v21 = vmul.f32 %v6331_v49, %v8120_v26  ;;  %v4238_v12 = vadd.f32 %v8170_v0, %v4216_v7 }
 0xbc9   : > { %4397 = vmatprep.mubr.bf16.mxu0 %v8748_v46  ;;  %v4195_v17 = vmul.f32 %v6333_v24, %v8114_v56  ;;  %v4237_v29 = vadd.f32 %v8170_v0, %v4215_v27  ;;  %v4263_v31 = vsub.s32 0, %v4262_v18  ;;  %v4267_v32 = vsub.s32 1, %v4262_v18 }
 0xbca   : > { %v4218_v35 = vmul.f32 %v8162_v37, %v4196_v21 }
 0xbcb   : > { %v4248_v1 = vpack.c.bf16 %v4238_v12, %v4237_v29  ;;  %v6335_v8 = vpop.eup %6334  ;;  %v4217_v20 = vmul.f32 %v8162_v37, %v4195_v17  ;;  %v8283_v3 = vrot.slane %v4259_v45, %v4263_v31  ;;  %v8285_v11 = vrot.slane %v4259_v45, %v4267_v32 }
 0xbcc   : > { %v6337_v25 = vpop.eup %6336  ;;  %v4198_v19 = vmul.f32 %v6335_v8, %v8132_v43  ;;  %v4240_v26 = vadd.f32 %v8170_v0, %v4218_v35 }
 0xbcd   : > { %v4197_v44 = vmul.f32 %v6337_v25, %v8126_v60  ;;  %v4239_v56 = vadd.f32 %v8170_v0, %v4217_v20  ;;  %v6002_v60 = vld [vmem:[%s8639_s15 + $0x40] sm:$0xff]  }
 0xbce   : > { %v4220_v33 = vmul.f32 %v8162_v37, %v4198_v19  ;;  %5508 = vmatprep.subr.bf16.mxu1 %v6002_v60 }
 0xbcf   : > { %v4249_v14 = vpack.c.bf16 %v4240_v26, %v4239_v56  ;;  %v4219_v4 = vmul.f32 %v8162_v37, %v4197_v44  ;;  %5509 = vmatpush3.bf16.msra.mxu1 %v6003_v51  ;;  %v6005_v37 = vld [vmem:[%s8639_s15 + $0x8] sm:$0xff]  }
 0xbd0   : > { %5324 = vmatmul.mubr.msk.bf16.gmra.mrb[136].mxu0 %vm593_vm0, %v4246_v59  ;;  %v4242_v30 = vadd.f32 %v8170_v0, %v4220_v33  ;;  %v6014_v59 = vld [vmem:[%s8639_s15 + $0x70] sm:$0xff]  }
 0xbd1   : > { %4407 = vmatprep.mubr.bf16.mxu0 %v8748_v46  ;;  %v4241_v57 = vadd.f32 %v8170_v0, %v4219_v4  ;;  %v6006_v0 = vld [vmem:[%s8639_s15 + $0x50] sm:$0xff]  }
 0xbd3   : > { %v4250_v43 = vpack.c.bf16 %v4242_v30, %v4241_v57 }
 0xbd8   : > { %5325 = vmatmul.mubr.msk.bf16.gmra.mrb[140].mxu0 %vm593_vm0, %v4247_v13 }
 0xbd9   : > { %4417 = vmatprep.mubr.bf16.mxu0 %v8748_v46 }
 0xbe0   : > { %5326 = vmatmul.mubr.msk.bf16.gmra.mrb[144].mxu0 %vm593_vm0, %v4248_v1 }
 0xbe1   : > { %4427 = vmatprep.mubr.bf16.mxu0 %v8748_v46 }
 0xbe8   : > { %5327 = vmatmul.mubr.msk.bf16.gmra.mrb[148].mxu0 %vm593_vm0, %v4249_v14 }
 0xbe9   : > { %4437 = vmatprep.mubr.bf16.mxu0 %v8748_v46  ;;  %v6004_v46 = vld [vmem:[%s8639_s15 + $0x48] sm:$0xff]  }
 0xbea   : > { %5510 = vmatprep.subr.bf16.mxu1 %v6004_v46 }
 0xbeb   : > { %5511 = vmatpush3.bf16.msra.mxu1 %v6005_v37 }
 0xbec   : > { %5512 = vmatprep.subr.bf16.mxu1 %v6006_v0 }
 0xbef   : > { %5513 = vmatpush3.bf16.msra.mxu1 %v6007_v39 }
 0xbf0   : > { %5328 = vmatmul.mubr.msk.bf16.gmra.mrb[152].mxu0 %vm593_vm0, %v4250_v43  ;;  %5514 = vmatprep.subr.bf16.mxu1 %v6008_v36 }
 0xbf3   : > { %5515 = vmatpush3.bf16.msra.mxu1 %v6009_v58 }
 0xbf4   : > { %5516 = vmatprep.subr.bf16.mxu1 %v6010_v55 }
 0xbf7   : > { %5517 = vmatpush3.bf16.msra.mxu1 %v6011_v41 }
 0xbf8   : > { %5518 = vmatprep.subr.bf16.mxu1 %v6012_v22 }
 0xbfb   : > { %5519 = vmatpush3.bf16.msra.mxu1 %v6013_v16 }
 0xbfc   : > { %5520 = vmatprep.subr.bf16.mxu1 %v6014_v59 }
 0xbff   : > { %5521 = vmatpush3.bf16.msra.mxu1 %v6015_v52 }
 0xc00   : > { %5522 = vmatprep.subr.bf16.mxu1 %v6016_v42 }
 0xc03   : > { %5523 = vmatpush3.bf16.msra.mxu1 %v6017_v54 }
 0xc8b   : > { %v4369_v63 = vpop.f32.mrb[124].mxu0 }
 0xc8c   : > { %v4370_v13 = vadd.f32 %v4369_v63, %v8283_v3  ;;  %v4371_v7 = vpop.f32.mrb[125].mxu0 }
 0xc8d   : > { %v8289_v49 = vadd.f32 %v4371_v7, %v8285_v11  ;;  %v4373_v27 = vpop.f32.mrb[126].mxu0 }
 0xc8e   : > { %v4480_v24 = vmul.f32 0.044715, %v4370_v13  ;;  %v8292_v21 = vadd.f32 %v4373_v27, %v8283_v3  ;;  %v4375_v12 = vpop.f32.mrb[127].mxu0 }
 0xc8f   : > { %v4481_v17 = vmul.f32 0.044715, %v8289_v49  ;;  %v8296_v29 = vadd.f32 %v4375_v12, %v8285_v11 }
 0xc90   : > { %v4512_v1 = vmul.f32 %v4480_v24, %v4370_v13  ;;  %v4482_v35 = vmul.f32 0.044715, %v8292_v21 }
 0xc91   : > { %v4513_v8 = vmul.f32 %v4481_v17, %v8289_v49  ;;  %v4483_v20 = vmul.f32 0.044715, %v8296_v29 }
 0xc92   : > { %v4544_v25 = vmul.f32 %v4512_v1, %v4370_v13  ;;  %v4514_v19 = vmul.f32 %v4482_v35, %v8292_v21 }
 0xc93   : > { %v4545_v26 = vmul.f32 %v4513_v8, %v8289_v49  ;;  %v4515_v44 = vmul.f32 %v4483_v20, %v8296_v29  ;;  %v4379_v56 = vpop.f32.mrb[128].mxu0  ;;  %v4448_v8 = vmul.f32 0.5, %v4370_v13 }
 0xc94   : > { %v4576_v14 = vadd.f32 %v4544_v25, %v4370_v13  ;;  %v4546_v33 = vmul.f32 %v4514_v19, %v8292_v21  ;;  %v8306_v4 = vadd.f32 %v4379_v56, %v8283_v3  ;;  %v4381_v30 = vpop.f32.mrb[129].mxu0 }
 0xc95   : > { %v4547_v57 = vmul.f32 %v4515_v44, %v8296_v29  ;;  %v4382_v43 = vadd.f32 %v4381_v30, %v8285_v11  ;;  %v4383_v60 = vpop.f32.mrb[130].mxu0  ;;  %v4577_v51 = vadd.f32 %v4545_v26, %v8289_v49  ;;  %v4449_v30 = vmul.f32 0.5, %v8289_v49 }
 0xc96   : > { %v4608_v46 = vmul.f32 0.7978846, %v4576_v14  ;;  %v4578_v37 = vadd.f32 %v4546_v33, %v8292_v21  ;;  %v4484_v0 = vmul.f32 0.044715, %v8306_v4  ;;  %v8314_v39 = vadd.f32 %v4383_v60, %v8283_v3  ;;  %v4385_v36 = vpop.f32.mrb[131].mxu0 }
 0xc97   : > { %v4485_v58 = vmul.f32 0.044715, %v4382_v43  ;;  %v4386_v55 = vadd.f32 %v4385_v36, %v8285_v11  ;;  %v4579_v41 = vadd.f32 %v4547_v57, %v8296_v29  ;;  %v4609_v22 = vmul.f32 0.7978846, %v4577_v51 }
 0xc98   : > { %6338 = vtanh.f32 %v4608_v46  ;;  %v4610_v16 = vmul.f32 0.7978846, %v4578_v37  ;;  %v4516_v59 = vmul.f32 %v4484_v0, %v8306_v4  ;;  %v4486_v52 = vmul.f32 0.044715, %v8314_v39 }
 0xc99   : > { %v4517_v42 = vmul.f32 %v4485_v58, %v4382_v43  ;;  %v4487_v54 = vmul.f32 0.044715, %v4386_v55  ;;  %v4611_v6 = vmul.f32 0.7978846, %v4579_v41  ;;  %6340 = vtanh.f32 %v4609_v22 }
 0xc9a   : > { %6342 = vtanh.f32 %v4610_v16  ;;  %v4548_v18 = vmul.f32 %v4516_v59, %v8306_v4  ;;  %v4518_v31 = vmul.f32 %v4486_v52, %v8314_v39  ;;  %v4450_v0 = vmul.f32 0.5, %v8292_v21 }
 0xc9b   : > { %v4549_v45 = vmul.f32 %v4517_v42, %v4382_v43  ;;  %v4519_v32 = vmul.f32 %v4487_v54, %v4386_v55  ;;  %v4389_v63 = vpop.f32.mrb[132].mxu0  ;;  %6344 = vtanh.f32 %v4611_v6  ;;  %v4451_v58 = vmul.f32 0.5, %v8296_v29 }
 0xc9c   : > { %v4550_v7 = vmul.f32 %v4518_v31, %v8314_v39  ;;  %v4391_v27 = vpop.f32.mrb[133].mxu0  ;;  %v4580_v35 = vadd.f32 %v4548_v18, %v8306_v4  ;;  %v8328_v20 = vadd.f32 %v4389_v63, %v8283_v3  ;;  %v8345_v59 = vmul.f32 0.5, %v4382_v43 }
 0xc9d   : > { %v4551_v24 = vmul.f32 %v4519_v32, %v4386_v55  ;;  %v8324_v12 = vadd.f32 %v4391_v27, %v8285_v11  ;;  %v4393_v17 = vpop.f32.mrb[134].mxu0  ;;  %v4581_v1 = vadd.f32 %v4549_v45, %v4382_v43  ;;  %v4455_v18 = vmul.f32 0.5, %v4386_v55 }
 0xc9e   : > { %v4395_v25 = vpop.f32.mrb[135].mxu0  ;;  %v4582_v19 = vadd.f32 %v4550_v7, %v8314_v39  ;;  %v8336_v33 = vadd.f32 %v4393_v17, %v8283_v3  ;;  %v4612_v57 = vmul.f32 0.7978846, %v4580_v35  ;;  %v4488_v36 = vmul.f32 0.044715, %v8328_v20 }
 0xc9f   : > { %v4489_v26 = vmul.f32 0.044715, %v8324_v12  ;;  %v8333_v44 = vadd.f32 %v4395_v25, %v8285_v11  ;;  %v4583_v56 = vadd.f32 %v4551_v24, %v4386_v55  ;;  %v4613_v14 = vmul.f32 0.7978846, %v4581_v1 }
 0xca0   : > { %v4614_v13 = vmul.f32 0.7978846, %v4582_v19  ;;  %v4490_v31 = vmul.f32 0.044715, %v8336_v33  ;;  %v4520_v43 = vmul.f32 %v4488_v36, %v8328_v20  ;;  %v4452_v55 = vmul.f32 0.5, %v8306_v4 }
 0xca1   : > { %v4521_v60 = vmul.f32 %v4489_v26, %v8324_v12  ;;  %v4491_v51 = vmul.f32 0.044715, %v8333_v44  ;;  %v4615_v46 = vmul.f32 0.7978846, %v4583_v56  ;;  %6346 = vtanh.f32 %v4613_v14 }
 0xca2   : > { %v6339_v37 = vpop.eup %6338  ;;  %6348 = vtanh.f32 %v4612_v57  ;;  %v4454_v56 = vmul.f32 0.5, %v8314_v39  ;;  %v4522_v57 = vmul.f32 %v4490_v31, %v8336_v33  ;;  %v8367_v4 = vmul.f32 0.5, %v8328_v20 }
 0xca3   : > { %v6341_v41 = vpop.eup %6340  ;;  %v4523_v22 = vmul.f32 %v4491_v51, %v8333_v44  ;;  %v4399_v49 = vpop.f32.mrb[136].mxu0  ;;  %v4672_v16 = vadd.f32 1.0, %v6339_v37  ;;  %6350 = vtanh.f32 %v4615_v46  ;;  %v4553_v42 = vmul.f32 %v4521_v60, %v8324_v12 }
 0xca4   : > { %v6343_v52 = vpop.eup %6342  ;;  %v4401_v54 = vpop.f32.mrb[137].mxu0  ;;  %v4673_v6 = vadd.f32 1.0, %v6341_v41  ;;  %6352 = vtanh.f32 %v4614_v13  ;;  %v8355_v7 = vadd.f32 %v4399_v49, %v8283_v3 }
 0xca5   : > { %v6345_v21 = vpop.eup %6344  ;;  %v4555_v29 = vmul.f32 %v4523_v22, %v8333_v44  ;;  %v8351_v45 = vadd.f32 %v4401_v54, %v8285_v11  ;;  %v4403_v32 = vpop.f32.mrb[138].mxu0  ;;  %v4674_v63 = vadd.f32 1.0, %v6343_v52  ;;  %v4704_v35 = vmul.f32 %v4672_v16, %v4448_v8 }
 0xca6   : > { %v4405_v27 = vpop.f32.mrb[139].mxu0  ;;  %v4675_v24 = vadd.f32 1.0, %v6345_v21  ;;  %v4705_v19 = vmul.f32 %v4673_v6, %v4449_v30  ;;  %v4585_v14 = vadd.f32 %v4553_v42, %v8324_v12  ;;  %v4492_v51 = vmul.f32 0.044715, %v8355_v7 }
 0xca7   : > { %v4493_v17 = vmul.f32 0.044715, %v8351_v45  ;;  %v8360_v1 = vadd.f32 %v4405_v27, %v8285_v11  ;;  %v4706_v25 = vmul.f32 %v4674_v63, %v4450_v0  ;;  %v4587_v60 = vadd.f32 %v4555_v29, %v8333_v44 }
 0xca8   : > { %v4707_v26 = vmul.f32 %v4675_v24, %v4451_v58  ;;  %v4617_v37 = vmul.f32 0.7978846, %v4585_v14  ;;  %v4552_v0 = vmul.f32 %v4520_v43, %v8328_v20  ;;  %v8374_v36 = vadd.f32 %v4403_v32, %v8283_v3 }
 0xca9   : > { %v4736_v13 = vpack.c.bf16 %v4706_v25, %v4704_v35  ;;  %v4495_v46 = vmul.f32 0.044715, %v8360_v1  ;;  %v4525_v39 = vmul.f32 %v4493_v17, %v8351_v45  ;;  %v4619_v41 = vmul.f32 0.7978846, %v4587_v60 }
 0xcaa   : > { %v4737_v8 = vpack.c.bf16 %v4707_v26, %v4705_v19  ;;  %v8380_v42 = vmul.f32 0.5, %v8324_v12  ;;  %6354 = vtanh.f32 %v4617_v37  ;;  %v4554_v6 = vmul.f32 %v4522_v57, %v8336_v33 }
 0xcab   : > { %v6347_v30 = vpop.eup %6346  ;;  %v4409_v58 = vpop.f32.mrb[140].mxu0  ;;  %6356 = vtanh.f32 %v4619_v41  ;;  %v4524_v63 = vmul.f32 %v4492_v51, %v8355_v7  ;;  %v4527_v43 = vmul.f32 %v4495_v46, %v8360_v1  ;;  %v4557_v17 = vmul.f32 %v4525_v39, %v8351_v45 }
 0xcac   : > { %v6349_v22 = vpop.eup %6348  ;;  %v8377_v49 = vadd.f32 %v4409_v58, %v8283_v3  ;;  %v4411_v16 = vpop.f32.mrb[141].mxu0  ;;  %4919 = vmatprep.mubr.bf16.mxu1 %v4737_v8  ;;  %v4677_v52 = vadd.f32 1.0, %v6347_v30  ;;  %v4494_v35 = vmul.f32 0.044715, %v8374_v36  ;;  %v4586_v8 = vadd.f32 %v4554_v6, %v8336_v33 }
 0xcad   : > { %v6351_v54 = vpop.eup %6350  ;;  %v8384_v21 = vadd.f32 %v4411_v16, %v8285_v11  ;;  %v4413_v31 = vpop.f32.mrb[142].mxu0  ;;  %4920 = vmatmul.mubr.bf16.vlgmr.msra.gmra.mrb[84].mxu1 %v4736_v13  ;;  %v4676_v29 = vadd.f32 1.0, %v6349_v22  ;;  %v4584_v13 = vadd.f32 %v4552_v0, %v8328_v20  ;;  %v4559_v37 = vmul.f32 %v4527_v43, %v8360_v1 }
 0xcae   : > { %v6353_v32 = vpop.eup %6352  ;;  %v8389_v27 = vadd.f32 %v4413_v31, %v8283_v3  ;;  %v4415_v12 = vpop.f32.mrb[143].mxu0  ;;  %v4679_v24 = vadd.f32 1.0, %v6351_v54  ;;  %v4496_v25 = vmul.f32 0.044715, %v8377_v49  ;;  %v4709_v14 = vmul.f32 %v4677_v52, %v8345_v59 }
 0xcaf   : > { %v4678_v19 = vadd.f32 1.0, %v6353_v32  ;;  %v4497_v26 = vmul.f32 0.044715, %v8384_v21  ;;  %v8398_v60 = vadd.f32 %v4415_v12, %v8285_v11  ;;  %v4708_v51 = vmul.f32 %v4676_v29, %v4452_v55 }
 0xcb0   : > { %v4711_v57 = vmul.f32 %v4679_v24, %v4455_v18  ;;  %v4498_v30 = vmul.f32 0.044715, %v8389_v27  ;;  %v4616_v58 = vmul.f32 0.7978846, %v4584_v13  ;;  %v4526_v41 = vmul.f32 %v4494_v35, %v8374_v36 }
 0xcb1   : > { %v4710_v46 = vmul.f32 %v4678_v19, %v4454_v56  ;;  %v4459_v18 = vmul.f32 0.5, %v8333_v44  ;;  %v4618_v20 = vmul.f32 0.7978846, %v4586_v8  ;;  %v4556_v0 = vmul.f32 %v4524_v63, %v8355_v7 }
 0xcb2   : > { %v4739_v39 = vpack.c.bf16 %v4711_v57, %v4709_v14  ;;  %v4528_v55 = vmul.f32 %v4496_v25, %v8377_v49  ;;  %6358 = vtanh.f32 %v4616_v58  ;;  %v4529_v52 = vmul.f32 %v4497_v26, %v8384_v21 }
 0xcb3   : > { %v4419_v22 = vpop.f32.mrb[144].mxu0  ;;  %v4738_v59 = vpack.c.bf16 %v4710_v46, %v4708_v51  ;;  %v4499_v54 = vmul.f32 0.044715, %v8398_v60  ;;  %6360 = vtanh.f32 %v4618_v20  ;;  %v4530_v29 = vmul.f32 %v4498_v30, %v8389_v27 }
 0xcb4   : > { %v8408_v56 = vadd.f32 %v4419_v22, %v8283_v3  ;;  %v4421_v16 = vpop.f32.mrb[145].mxu0  ;;  %4927 = vmatprep.mubr.bf16.mxu1 %v4739_v39  ;;  %v6355_v44 = vpop.eup %6354  ;;  %v4458_v63 = vmul.f32 0.5, %v8336_v33  ;;  %v4589_v43 = vadd.f32 %v4557_v17, %v8351_v45  ;;  %v4591_v12 = vadd.f32 %v4559_v37, %v8360_v1 }
 0xcb5   : > { %v8413_v6 = vadd.f32 %v4421_v16, %v8285_v11  ;;  %v4423_v31 = vpop.f32.mrb[146].mxu0  ;;  %4928 = vmatmul.mubr.bf16.gmra.mrb[88].mxu1 %v4738_v59  ;;  %v6357_v24 = vpop.eup %6356  ;;  %v4558_v35 = vmul.f32 %v4526_v41, %v8374_v36  ;;  %v4681_v26 = vadd.f32 1.0, %v6355_v44  ;;  %v8427_v14 = vmul.f32 %v4528_v55, %v8377_v49 }
 0xcb6   : > { %v4425_v32 = vpop.f32.mrb[147].mxu0  ;;  %v8421_v25 = vadd.f32 %v4423_v31, %v8283_v3  ;;  %v4500_v57 = vmul.f32 0.044715, %v8408_v56  ;;  %v4683_v33 = vadd.f32 1.0, %v6357_v24  ;;  %v4621_v13 = vmul.f32 0.7978846, %v4589_v43 }
 0xcb7   : > { %v8424_v19 = vadd.f32 %v4425_v32, %v8285_v11  ;;  %v4561_v17 = vmul.f32 %v4529_v52, %v8384_v21  ;;  %v4531_v51 = vmul.f32 %v4499_v54, %v8398_v60  ;;  %v4501_v46 = vmul.f32 0.044715, %v8413_v6 }
 0xcb8   : > { %v4623_v8 = vmul.f32 0.7978846, %v4591_v12  ;;  %v8434_v37 = vmul.f32 %v4530_v29, %v8389_v27  ;;  %v4713_v30 = vmul.f32 %v4681_v26, %v8380_v42  ;;  %v4715_v39 = vmul.f32 %v4683_v33, %v4459_v18 }
 0xcb9   : > { %6362 = vtanh.f32 %v4621_v13  ;;  %v4502_v58 = vmul.f32 0.044715, %v8421_v25  ;;  %v4503_v41 = vmul.f32 0.044715, %v8424_v19  ;;  %v8440_v59 = vmul.f32 0.5, %v8351_v45 }
 0xcba   : > { %6364 = vtanh.f32 %v4623_v8  ;;  %v4532_v20 = vmul.f32 %v4500_v57, %v8408_v56  ;;  %v4741_v52 = vpack.c.bf16 %v4715_v39, %v4713_v30  ;;  %v4588_v42 = vadd.f32 %v4556_v0, %v8355_v7 }
 0xcbb   : > { %v4429_v22 = vpop.f32.mrb[148].mxu0  ;;  %v4563_v18 = vmul.f32 %v4531_v51, %v8398_v60  ;;  %v4533_v54 = vmul.f32 %v4501_v46, %v8413_v6  ;;  %v4463_v44 = vmul.f32 0.5, %v8360_v1  ;;  %v4590_v45 = vadd.f32 %v4558_v35, %v8374_v36 }
 0xcbc   : > { %v8444_v55 = vadd.f32 %v4429_v22, %v8283_v3  ;;  %v4431_v16 = vpop.f32.mrb[149].mxu0  ;;  %v6359_v29 = vpop.eup %6358  ;;  %4935 = vmatprep.mubr.bf16.mxu1 %v4741_v52  ;;  %v8458_v0 = vmul.f32 0.5, %v8355_v7  ;;  %v4620_v24 = vmul.f32 0.7978846, %v4588_v42  ;;  %v4534_v57 = vmul.f32 %v4502_v58, %v8421_v25 }
 0xcbd   : > { %v4433_v31 = vpop.f32.mrb[150].mxu0  ;;  %v8452_v32 = vadd.f32 %v4431_v16, %v8285_v11  ;;  %v6361_v26 = vpop.eup %6360  ;;  %v4535_v1 = vmul.f32 %v4503_v41, %v8424_v19  ;;  %v4680_v33 = vadd.f32 1.0, %v6359_v29  ;;  %v4622_v35 = vmul.f32 0.7978846, %v4590_v45 }
 0xcbe   : > { %v8455_v43 = vadd.f32 %v4433_v31, %v8283_v3  ;;  %v4435_v12 = vpop.f32.mrb[151].mxu0  ;;  %v8463_v13 = vmul.f32 %v4532_v20, %v8408_v56  ;;  %v4682_v51 = vadd.f32 1.0, %v6361_v26  ;;  %6366 = vtanh.f32 %v4620_v24 }
 0xcbf   : > { %v8466_v46 = vadd.f32 %v4435_v12, %v8285_v11  ;;  %v4565_v8 = vmul.f32 %v4533_v54, %v8413_v6  ;;  %v4504_v7 = vmul.f32 0.044715, %v8444_v55  ;;  %v4462_v30 = vmul.f32 0.5, %v8374_v36 }
 0xcc0   : > { %6368 = vtanh.f32 %v4622_v35  ;;  %v4505_v39 = vmul.f32 0.044715, %v8452_v32  ;;  %v4712_v58 = vmul.f32 %v4680_v33, %v8367_v4  ;;  %v4714_v41 = vmul.f32 %v4682_v51, %v4458_v63 }
 0xcc1   : > { %v4593_v22 = vadd.f32 %v4561_v17, %v8384_v21  ;;  %v4566_v20 = vmul.f32 %v4534_v57, %v8421_v25  ;;  %v4567_v16 = vmul.f32 %v4535_v1, %v8424_v19  ;;  %v4506_v52 = vmul.f32 0.044715, %v8455_v43 }
 0xcc2   : > { %v4595_v54 = vadd.f32 %v4563_v18, %v8398_v60  ;;  %v4740_v45 = vpack.c.bf16 %v4714_v41, %v4712_v58  ;;  %v4507_v36 = vmul.f32 0.044715, %v8466_v46  ;;  %v4536_v17 = vmul.f32 %v4504_v7, %v8444_v55 }
 0xcc3   : > { %v4439_v42 = vpop.f32.mrb[152].mxu0  ;;  %v6363_v31 = vpop.eup %6362  ;;  %v4625_v63 = vmul.f32 0.7978846, %v4593_v22  ;;  %v4537_v18 = vmul.f32 %v4505_v39, %v8452_v32  ;;  %v4538_v58 = vmul.f32 %v4506_v52, %v8455_v43  ;;  %v4465_v7 = vmul.f32 0.5, %v8384_v21 }
 0xcc4   : > { %v8480_v29 = vadd.f32 %v4439_v42, %v8283_v3  ;;  %v4441_v4 = vpop.f32.mrb[153].mxu0  ;;  %v6365_v12 = vpop.eup %6364  ;;  %v4685_v26 = vadd.f32 1.0, %v6363_v31  ;;  %v4627_v1 = vmul.f32 0.7978846, %v4595_v54  ;;  %4936 = vmatmul.mubr.bf16.gmra.mrb[92].mxu1 %v4740_v45  ;;  %v4539_v22 = vmul.f32 %v4507_v36, %v8466_v46 }
 0xcc5   : > { %v8484_v24 = vadd.f32 %v4441_v4, %v8285_v11  ;;  %v4443_v57 = vpop.f32.mrb[154].mxu0  ;;  %v4687_v33 = vadd.f32 1.0, %v6365_v12  ;;  %6370 = vtanh.f32 %v4625_v63  ;;  %v4592_v52 = vadd.f32 %v8427_v14, %v8377_v49 }
 0xcc6   : > { %v8488_v35 = vadd.f32 %v4443_v57, %v8283_v3  ;;  %v4445_v51 = vpop.f32.mrb[155].mxu0  ;;  %6372 = vtanh.f32 %v4627_v1  ;;  %v4717_v39 = vmul.f32 %v4685_v26, %v8440_v59  ;;  %v4508_v3 = vmul.f32 0.044715, %v8480_v29 }
 0xcc7   : > { %v8492_v41 = vadd.f32 %v4445_v51, %v8285_v11  ;;  %v4509_v42 = vmul.f32 0.044715, %v8484_v24  ;;  %v4719_v54 = vmul.f32 %v4687_v33, %v4463_v44  ;;  %v4594_v11 = vadd.f32 %v8434_v37, %v8389_v27 }
 0xcc8   : > { %v6367_v45 = vpop.eup %6366  ;;  %v4568_v21 = vmul.f32 %v4536_v17, %v8444_v55  ;;  %v4569_v36 = vmul.f32 %v4537_v18, %v8452_v32  ;;  %v4467_v63 = vmul.f32 0.5, %v8398_v60  ;;  %v4570_v44 = vmul.f32 %v4538_v58, %v8455_v43 }
 0xcc9   : > { %v4511_v31 = vmul.f32 0.044715, %v8492_v41  ;;  %v4743_v4 = vpack.c.bf16 %v4719_v54, %v4717_v39  ;;  %v4510_v12 = vmul.f32 0.044715, %v8488_v35  ;;  %v4684_v26 = vadd.f32 1.0, %v6367_v45 }
 0xcca   : > { %v6369_v59 = vpop.eup %6368  ;;  %v4624_v57 = vmul.f32 0.7978846, %v4592_v52  ;;  %v4541_v14 = vmul.f32 %v4509_v42, %v8484_v24  ;;  %v4626_v33 = vmul.f32 0.7978846, %v4594_v11  ;;  %v4571_v17 = vmul.f32 %v4539_v22, %v8466_v46 }
 0xccb   : > { %4943 = vmatprep.mubr.bf16.mxu1 %v4743_v4  ;;  %v4686_v1 = vadd.f32 1.0, %v6369_v59  ;;  %v4543_v37 = vmul.f32 %v4511_v31, %v8492_v41  ;;  %v4540_v18 = vmul.f32 %v4508_v3, %v8480_v29  ;;  %v4597_v60 = vadd.f32 %v4565_v8, %v8413_v6 }
 0xccc   : > { %6374 = vtanh.f32 %v4624_v57  ;;  %v4716_v51 = vmul.f32 %v4684_v26, %v8458_v0  ;;  %v4599_v39 = vadd.f32 %v4567_v16, %v8424_v19  ;;  %v4542_v42 = vmul.f32 %v4510_v12, %v8488_v35 }
 0xccd   : > { %v4718_v58 = vmul.f32 %v4686_v1, %v4462_v30  ;;  %6376 = vtanh.f32 %v4626_v33  ;;  %v4629_v54 = vmul.f32 0.7978846, %v4597_v60  ;;  %v4596_v31 = vadd.f32 %v8463_v13, %v8408_v56 }
 0xcce   : > { %v4598_v52 = vadd.f32 %v4566_v20, %v8421_v25  ;;  %v4573_v3 = vmul.f32 %v4541_v14, %v8484_v24  ;;  %v4575_v8 = vmul.f32 %v4543_v37, %v8492_v41  ;;  %v4631_v45 = vmul.f32 0.7978846, %v4599_v39 }
 0xccf   : > { %v6371_v22 = vpop.eup %6370  ;;  %v4742_v11 = vpack.c.bf16 %v4718_v58, %v4716_v51  ;;  %6378 = vtanh.f32 %v4629_v54  ;;  %v4628_v4 = vmul.f32 0.7978846, %v4596_v31  ;;  %v4601_v12 = vadd.f32 %v4569_v36, %v8452_v32 }
 0xcd0   : > { %v6373_v0 = vpop.eup %6372  ;;  %v4689_v30 = vadd.f32 1.0, %v6371_v22  ;;  %v4630_v16 = vmul.f32 0.7978846, %v4598_v52  ;;  %6380 = vtanh.f32 %v4631_v45  ;;  %v4603_v13 = vadd.f32 %v4571_v17, %v8466_v46 }
 0xcd1   : > { %4944 = vmatmul.mubr.bf16.gmra.mrb[96].mxu1 %v4742_v11  ;;  %v4691_v59 = vadd.f32 1.0, %v6373_v0  ;;  %6382 = vtanh.f32 %v4628_v4  ;;  %v4633_v57 = vmul.f32 0.7978846, %v4601_v12  ;;  %v4572_v1 = vmul.f32 %v4540_v18, %v8480_v29 }
 0xcd2   : > { %v4721_v20 = vmul.f32 %v4689_v30, %v4465_v7  ;;  %6384 = vtanh.f32 %v4630_v16  ;;  %v4635_v14 = vmul.f32 0.7978846, %v4603_v13  ;;  %v4574_v37 = vmul.f32 %v4542_v42, %v8488_v35 }
 0xcd3   : > { %v4723_v26 = vmul.f32 %v4691_v59, %v4467_v63  ;;  %v4600_v33 = vadd.f32 %v4568_v21, %v8444_v55  ;;  %v4602_v60 = vadd.f32 %v4570_v44, %v8455_v43  ;;  %6386 = vtanh.f32 %v4633_v57 }
 0xcd4   : > { %v4605_v36 = vadd.f32 %v4573_v3, %v8484_v24  ;;  %v4607_v17 = vadd.f32 %v4575_v8, %v8492_v41  ;;  %v4464_v63 = vmul.f32 0.5, %v8377_v49  ;;  %6388 = vtanh.f32 %v4635_v14 }
 0xcd5   : > { %v4745_v51 = vpack.c.bf16 %v4723_v26, %v4721_v20  ;;  %v4632_v58 = vmul.f32 0.7978846, %v4600_v33  ;;  %v4634_v39 = vmul.f32 0.7978846, %v4602_v60  ;;  %v4466_v18 = vmul.f32 0.5, %v8389_v27 }
 0xcd6   : > { %v6375_v7 = vpop.eup %6374  ;;  %v4637_v21 = vmul.f32 0.7978846, %v4605_v36  ;;  %v4639_v31 = vmul.f32 0.7978846, %v4607_v17  ;;  %v4604_v52 = vadd.f32 %v4572_v1, %v8480_v29  ;;  %v4606_v22 = vadd.f32 %v4574_v37, %v8488_v35 }
 0xcd7   : > { %v6377_v54 = vpop.eup %6376  ;;  %4951 = vmatprep.mubr.bf16.mxu1 %v4745_v51  ;;  %v4688_v42 = vadd.f32 1.0, %v6375_v7  ;;  %6390 = vtanh.f32 %v4632_v58  ;;  %v4469_v30 = vmul.f32 0.5, %v8413_v6  ;;  %v4471_v59 = vmul.f32 0.5, %v8424_v19 }
 0xcd8   : > { %v4690_v44 = vadd.f32 1.0, %v6377_v54  ;;  %6392 = vtanh.f32 %v4634_v39  ;;  %v4636_v8 = vmul.f32 0.7978846, %v4604_v52  ;;  %v4638_v45 = vmul.f32 0.7978846, %v4606_v22 }
 0xcd9   : > { %v4720_v3 = vmul.f32 %v4688_v42, %v4464_v63  ;;  %v6379_v11 = vpop.eup %6378  ;;  %6394 = vtanh.f32 %v4637_v21  ;;  %v4468_v20 = vmul.f32 0.5, %v8408_v56  ;;  %v4470_v1 = vmul.f32 0.5, %v8421_v25 }
 0xcda   : > { %v4722_v49 = vmul.f32 %v4690_v44, %v4466_v18  ;;  %v6381_v0 = vpop.eup %6380  ;;  %v4693_v27 = vadd.f32 1.0, %v6379_v11  ;;  %6396 = vtanh.f32 %v4639_v31  ;;  %v4473_v19 = vmul.f32 0.5, %v8452_v32 }
 0xcdb   : > { %v6383_v4 = vpop.eup %6382  ;;  %v4695_v12 = vadd.f32 1.0, %v6381_v0  ;;  %6398 = vtanh.f32 %v4636_v8  ;;  %v4475_v7 = vmul.f32 0.5, %v8466_v46  ;;  %v4472_v21 = vmul.f32 0.5, %v8444_v55 }
 0xcdc   : > { %v4744_v16 = vpack.c.bf16 %v4722_v49, %v4720_v3  ;;  %v6385_v13 = vpop.eup %6384  ;;  %v4692_v26 = vadd.f32 1.0, %v6383_v4  ;;  %6400 = vtanh.f32 %v4638_v45  ;;  %v4725_v57 = vmul.f32 %v4693_v27, %v4469_v30 }
 0xcdd   : > { %v4727_v14 = vmul.f32 %v4695_v12, %v4471_v59  ;;  %v4694_v37 = vadd.f32 1.0, %v6385_v13  ;;  %v6387_v6 = vpop.eup %6386  ;;  %v4474_v31 = vmul.f32 0.5, %v8455_v43  ;;  %v4477_v32 = vmul.f32 0.5, %v8484_v24 }
 0xcde   : > { %4952 = vmatmul.mubr.bf16.gmra.mrb[100].mxu1 %v4744_v16  ;;  %v6389_v33 = vpop.eup %6388  ;;  %v4724_v51 = vmul.f32 %v4692_v26, %v4468_v20  ;;  %v4697_v17 = vadd.f32 1.0, %v6387_v6  ;;  %v4479_v8 = vmul.f32 0.5, %v8492_v41  ;;  %v4476_v30 = vmul.f32 0.5, %v8480_v29  ;;  %v8549_v29 = vld [vmem:[%s8640_s16] ss:$0 sm:$0xff] }
 0xcdf   : > { %v4747_v60 = vpack.c.bf16 %v4727_v14, %v4725_v57  ;;  %v4726_v36 = vmul.f32 %v4694_v37, %v4470_v1  ;;  %v4699_v63 = vadd.f32 1.0, %v6389_v33  ;;  %v4478_v55 = vmul.f32 0.5, %v8488_v35 }
 0xce0   : > { %v4729_v54 = vmul.f32 %v4697_v17, %v4473_v19 }
 0xce1   : > { %v6391_v56 = vpop.eup %6390  ;;  %4959 = vmatprep.mubr.bf16.mxu1 %v4747_v60  ;;  %v4746_v58 = vpack.c.bf16 %v4726_v36, %v4724_v51  ;;  %v4731_v18 = vmul.f32 %v4699_v63, %v4475_v7 }
 0xce2   : > { %v6393_v39 = vpop.eup %6392  ;;  %v4696_v42 = vadd.f32 1.0, %v6391_v56 }
 0xce3   : > { %v6395_v25 = vpop.eup %6394  ;;  %v4698_v44 = vadd.f32 1.0, %v6393_v39  ;;  %v4749_v22 = vpack.c.bf16 %v4731_v18, %v4729_v54 }
 0xce4   : > { %v6397_v52 = vpop.eup %6396  ;;  %v4701_v3 = vadd.f32 1.0, %v6395_v25  ;;  %v4728_v11 = vmul.f32 %v4696_v42, %v4472_v21 }
 0xce5   : > { %v6399_v46 = vpop.eup %6398  ;;  %v4730_v49 = vmul.f32 %v4698_v44, %v4474_v31  ;;  %v4703_v45 = vadd.f32 1.0, %v6397_v52 }
 0xce6   : > { %4960 = vmatmul.mubr.bf16.gmra.mrb[104].mxu1 %v4746_v58  ;;  %v6401_v0 = vpop.eup %6400  ;;  %v4700_v43 = vadd.f32 1.0, %v6399_v46  ;;  %v4733_v4 = vmul.f32 %v4701_v3, %v4477_v32 }
 0xce7   : > { %4967 = vmatprep.mubr.bf16.mxu1 %v4749_v22  ;;  %v4748_v27 = vpack.c.bf16 %v4730_v49, %v4728_v11  ;;  %v4735_v16 = vmul.f32 %v4703_v45, %v4479_v8  ;;  %v4702_v59 = vadd.f32 1.0, %v6401_v0 }
 0xce8   : > { %v4732_v12 = vmul.f32 %v4700_v43, %v4476_v30 }
 0xce9   : > { %v4751_v24 = vpack.c.bf16 %v4735_v16, %v4733_v4  ;;  %v4734_v13 = vmul.f32 %v4702_v59, %v4478_v55 }
 0xceb   : > { %v4750_v20 = vpack.c.bf16 %v4734_v13, %v4732_v12 }
 0xcee   : > { %4968 = vmatmul.mubr.bf16.gmra.mrb[108].mxu1 %v4748_v27 }
 0xcef   : > { %4975 = vmatprep.mubr.bf16.mxu1 %v4751_v24 }
 0xcf6   : > { %4976 = vmatmul.mubr.bf16.gmra.mrb[112].mxu1 %v4750_v20 }
 0xd80   : > { %v5524_v41 = vpop.f32.mrb[84].mxu1 }
 0xd81   : > { %v5525_v35 = vpop.f32.mrb[85].mxu1 }
 0xd82   : > { %v5526_v26 = vadd.f32 %v5525_v35, %v5524_v41  ;;  %v5527_v57 = vpop.f32.mrb[86].mxu1 }
 0xd83   : > { %v5528_v14 = vpop.f32.mrb[87].mxu1 }
 0xd84   : > { %v4922_v1 = vadd.f32 %v5526_v26, %v8549_v29  ;;  %v5529_v37 = vadd.f32 %v5528_v14, %v5527_v57 }
 0xd86   : > { %v4984_v6 = vadd.f32 %v4922_v1, %v7946_v23  ;;  %v4925_v33 = vadd.f32 %v5529_v37, %v8549_v29 }
 0xd88   : > { %5000 = vst.msk [vmem:[%s8556_s22] sm:$0xff] %vm593_vm0, %v4984_v6  ;;  %v4985_v60 = vadd.f32 %v4925_v33, %v7954_v5  ;;  %v5530_v51 = vpop.f32.mrb[88].mxu1 }
 0xd89   : > { %v5531_v36 = vpop.f32.mrb[89].mxu1 }
 0xd8a   : > { %5001 = vst.msk [vmem:[%s8556_s22 + $0x8] sm:$0xff] %vm593_vm0, %v4985_v60  ;;  %v5532_v17 = vadd.f32 %v5531_v36, %v5530_v51  ;;  %v5533_v19 = vpop.f32.mrb[90].mxu1 }
 0xd8b   : > { %v5534_v7 = vpop.f32.mrb[91].mxu1 }
 0xd8c   : > { %v4930_v63 = vadd.f32 %v5532_v17, %v8549_v29  ;;  %v5535_v56 = vadd.f32 %v5534_v7, %v5533_v19 }
 0xd8e   : > { %v4986_v23 = vadd.f32 %v4930_v63, %v7951_v28  ;;  %v4933_v58 = vadd.f32 %v5535_v56, %v8549_v29 }
 0xd90   : > { %5002 = vst.msk [vmem:[%s8556_s22 + $0x10] sm:$0xff] %vm593_vm0, %v4986_v23  ;;  %v4987_v5 = vadd.f32 %v4933_v58, %v7959_v48 }
 0xd92   : > { %5003 = vst.msk [vmem:[%s8556_s22 + $0x18] sm:$0xff] %vm593_vm0, %v4987_v5 }
 0xd97   : > { %v5536_v39 = vpop.f32.mrb[92].mxu1 }
 0xd98   : > { %v5537_v54 = vpop.f32.mrb[93].mxu1 }
 0xd99   : > { %v5538_v18 = vadd.f32 %v5537_v54, %v5536_v39  ;;  %v5539_v42 = vpop.f32.mrb[94].mxu1 }
 0xd9a   : > { %v5540_v25 = vpop.f32.mrb[95].mxu1 }
 0xd9b   : > { %v4938_v21 = vadd.f32 %v5538_v18, %v8549_v29  ;;  %v5541_v31 = vadd.f32 %v5540_v25, %v5539_v42 }
 0xd9d   : > { %v4988_v28 = vadd.f32 %v4938_v21, %v7968_v53  ;;  %v4941_v44 = vadd.f32 %v5541_v31, %v8549_v29 }
 0xd9f   : > { %5004 = vst.msk [vmem:[%s8556_s22 + $0x20] sm:$0xff] %vm593_vm0, %v4988_v28  ;;  %v4989_v48 = vadd.f32 %v4941_v44, %v7978_v38 }
 0xda1   : > { %5005 = vst.msk [vmem:[%s8556_s22 + $0x28] sm:$0xff] %vm593_vm0, %v4989_v48 }
 0xda4   : > { %v5542_v52 = vpop.f32.mrb[96].mxu1 }
 0xda5   : > { %v5543_v22 = vpop.f32.mrb[97].mxu1 }
 0xda6   : > { %v5544_v32 = vadd.f32 %v5543_v22, %v5542_v52  ;;  %v5545_v3 = vpop.f32.mrb[98].mxu1 }
 0xda7   : > { %v5546_v46 = vpop.f32.mrb[99].mxu1 }
 0xda8   : > { %v4946_v11 = vadd.f32 %v5544_v32, %v8549_v29  ;;  %v5547_v49 = vadd.f32 %v5546_v46, %v5545_v3 }
 0xdaa   : > { %v4990_v53 = vadd.f32 %v4946_v11, %v7975_v2  ;;  %v4949_v8 = vadd.f32 %v5547_v49, %v8549_v29 }
 0xdac   : > { %5006 = vst.msk [vmem:[%s8556_s22 + $0x30] sm:$0xff] %vm593_vm0, %v4990_v53  ;;  %v4991_v38 = vadd.f32 %v4949_v8, %v7983_v62 }
 0xdae   : > { %5007 = vst.msk [vmem:[%s8556_s22 + $0x38] sm:$0xff] %vm593_vm0, %v4991_v38 }
 0xdb1   : > { %v5548_v45 = vpop.f32.mrb[100].mxu1 }
 0xdb2   : > { %v5549_v0 = vpop.f32.mrb[101].mxu1 }
 0xdb3   : > { %v5550_v30 = vadd.f32 %v5549_v0, %v5548_v45  ;;  %v5551_v55 = vpop.f32.mrb[102].mxu1 }
 0xdb4   : > { %v5552_v43 = vpop.f32.mrb[103].mxu1 }
 0xdb5   : > { %v4954_v27 = vadd.f32 %v5550_v30, %v8549_v29  ;;  %v5553_v4 = vadd.f32 %v5552_v43, %v5551_v55 }
 0xdb7   : > { %v4992_v2 = vadd.f32 %v4954_v27, %v7992_v34  ;;  %v4957_v16 = vadd.f32 %v5553_v4, %v8549_v29 }
 0xdb9   : > { %5008 = vst.msk [vmem:[%s8556_s22 + $0x40] sm:$0xff] %vm593_vm0, %v4992_v2  ;;  %v4993_v62 = vadd.f32 %v4957_v16, %v8002_v9  ;;  %v5554_v59 = vpop.f32.mrb[104].mxu1 }
 0xdba   : > { %v5555_v24 = vpop.f32.mrb[105].mxu1 }
 0xdbb   : > { %5009 = vst.msk [vmem:[%s8556_s22 + $0x48] sm:$0xff] %vm593_vm0, %v4993_v62  ;;  %v5556_v12 = vadd.f32 %v5555_v24, %v5554_v59  ;;  %v5557_v13 = vpop.f32.mrb[106].mxu1 }
 0xdbc   : > { %v5558_v20 = vpop.f32.mrb[107].mxu1 }
 0xdbd   : > { %v4962_v41 = vadd.f32 %v5556_v12, %v8549_v29  ;;  %v5559_v35 = vadd.f32 %v5558_v20, %v5557_v13 }
 0xdbf   : > { %v4994_v34 = vadd.f32 %v4962_v41, %v7999_v50  ;;  %v4965_v26 = vadd.f32 %v5559_v35, %v8549_v29 }
 0xdc1   : > { %5010 = vst.msk [vmem:[%s8556_s22 + $0x50] sm:$0xff] %vm593_vm0, %v4994_v34  ;;  %v4995_v9 = vadd.f32 %v4965_v26, %v8007_v40  ;;  %v5560_v57 = vpop.f32.mrb[108].mxu1 }
 0xdc2   : > { %v5561_v14 = vpop.f32.mrb[109].mxu1 }
 0xdc3   : > { %5011 = vst.msk [vmem:[%s8556_s22 + $0x58] sm:$0xff] %vm593_vm0, %v4995_v9  ;;  %v5562_v1 = vadd.f32 %v5561_v14, %v5560_v57  ;;  %v5563_v37 = vpop.f32.mrb[110].mxu1 }
 0xdc4   : > { %v5564_v6 = vpop.f32.mrb[111].mxu1 }
 0xdc5   : > { %v4970_v33 = vadd.f32 %v5562_v1, %v8549_v29  ;;  %v5565_v60 = vadd.f32 %v5564_v6, %v5563_v37 }
 0xdc7   : > { %v4996_v50 = vadd.f32 %v4970_v33, %v8016_v15  ;;  %v4973_v51 = vadd.f32 %v5565_v60, %v8549_v29 }
 0xdc9   : > { %5012 = vst.msk [vmem:[%s8556_s22 + $0x60] sm:$0xff] %vm593_vm0, %v4996_v50  ;;  %v4997_v40 = vadd.f32 %v4973_v51, %v8026_v10  ;;  %v5566_v36 = vpop.f32.mrb[112].mxu1 }
 0xdca   : > { %v5567_v17 = vpop.f32.mrb[113].mxu1 }
 0xdcb   : > { %5013 = vst.msk [vmem:[%s8556_s22 + $0x68] sm:$0xff] %vm593_vm0, %v4997_v40  ;;  %v5568_v19 = vadd.f32 %v5567_v17, %v5566_v36  ;;  %v5569_v7 = vpop.f32.mrb[114].mxu1 }
 0xdcc   : > { %v5570_v63 = vpop.f32.mrb[115].mxu1 }
 0xdcd   : > { %v4978_v56 = vadd.f32 %v5568_v19, %v8549_v29  ;;  %v5571_v23 = vadd.f32 %v5570_v63, %v5569_v7 }
 0xdcf   : > { %v4998_v58 = vadd.f32 %v4978_v56, %v8023_v47  ;;  %v4981_v15 = vadd.f32 %v5571_v23, %v8549_v29 }
 0xdd1   : > { %5014 = vst.msk [vmem:[%s8556_s22 + $0x70] sm:$0xff] %vm593_vm0, %v4998_v58  ;;  %v4999_v5 = vadd.f32 %v4981_v15, %v8031_v61 }
 0xdd3   : > { %5015 = vst.msk [vmem:[%s8556_s22 + $0x78] sm:$0xff] %vm593_vm0, %v4999_v5 }
 0xdd4 PF: > { %s27_s24 = sadd.s32 1, %s6424_s24  }
 0xdd5   : > { %p24_p4 = scmp.ge.s32.totalorder %s27_s24, 4  }
 0xdd7   :  { %26 = sbr.rel (!%p24_p4) target bundleno = 3 (0x3), region = 136 }

</bundles_post_ra>
